<compile_context>
chip_gen: v7x
topology: tpu7x:2x2x1
jax: 0.10.0
libtpu: 0.0.40
codegen_flags: <defaults>
</compile_context>

<pallas_src>
import jax
import jax.numpy as jnp
from jax.experimental import pallas as pl
from jax.experimental.pallas import tpu as pltpu


# ---------------------------------------------------------------------------
# Fused kernel: one batch element per grid step
# ---------------------------------------------------------------------------
def _fused_basic_block_kernel(x_ref, w1_ref, w2_ref, s1_ref, b1_ref,
                              s2_ref, b2_ref, o_ref, pad_ref, col_ref):
    """Refs:
      x_ref:   (1, C, H*W)   input in native NCHW (spatial flattened), lane-dense
      w1_ref:  (9*C, C)      conv1 weight, rows ordered (kh, kw, cin)
      w2_ref:  (9*C, C)      conv2 weight
      s*_ref:  (1, C)        folded BN scale / bias
      o_ref:   (1, C, H*W)   output, lane-dense store
      pad_ref: (H+2, W+2, C) f32 VMEM halo scratch (reused by both convs)
      col_ref: (H*W, 9*C)    VMEM im2col slab (matmul dtype)
    """
    Hp, Wp, C = pad_ref.shape
    H, W = Hp - 2, Wp - 2
    HW = H * W

    # Stage x into the zero-padded halo scratch: (C, HW) -> (H, W, C) in VMEM.
    pad_ref[...] = jnp.zeros_like(pad_ref)
    x_hwc = x_ref[0].T.reshape(H, W, C)
    pad_ref[1:H + 1, 1:W + 1, :] = x_hwc.astype(pad_ref.dtype)

    def conv3x3(w_ref):
        # im2col: one strided copy per tap into the slab, then ONE MXU matmul
        # (contraction depth 9*C instead of C; one MXU result pop per conv).
        for kh in range(3):
            for kw in range(3):
                t = kh * 3 + kw
                col_ref[:, t * C:(t + 1) * C] = (
                    pad_ref[kh:kh + H, kw:kw + W, :]
                    .reshape(HW, C).astype(col_ref.dtype))
        return jnp.dot(col_ref[...], w_ref[...],
                       preferred_element_type=jnp.float32)      # (HW, C) f32

    # conv1 -> bn1 -> relu (intermediate never leaves VMEM)
    h1 = conv3x3(w1_ref)
    h1 = jnp.maximum(h1 * s1_ref[...] + b1_ref[...], 0.0)

    # Reuse the same halo scratch for the intermediate; borders are still zero.
    pad_ref[1:H + 1, 1:W + 1, :] = h1.reshape(H, W, C).astype(pad_ref.dtype)

    # conv2 -> bn2 -> (+ identity from the resident x tile) -> relu
    h2 = conv3x3(w2_ref)
    h2 = h2 * s2_ref[...] + b2_ref[...]
    out = h2.T + x_ref[0].astype(jnp.float32)    # residual add in lane-dense (C, HW)
    out = jnp.maximum(out, 0.0)
    o_ref[...] = out.reshape(1, C, HW).astype(o_ref.dtype)


# ---------------------------------------------------------------------------
# Wrapper
# ---------------------------------------------------------------------------
def _fold_bn(gamma, beta, mean, var, eps=1e-5):
    scale = gamma / jnp.sqrt(var + eps)
    bias = beta - mean * scale
    return scale, bias


def basic_block_forward(params, x_nchw, b, *, matmul_dtype=jnp.float32):
    """BasicBlock.forward(x, b) with stride=1, downsample=None.

    x_nchw: (N, C, H, W) float32;  b: Python int in {2, 3, 4, 5}.
    Returns (out_nchw, b). Set matmul_dtype=jnp.bfloat16 for bf16 MXU operands
    (f32 accumulation) — a throughput / bandwidth win, largest on v5e.
    """
    assert b in (2, 3, 4, 5), "b selects which BN branch to apply"
    idx = b - 2
    N, C, H, W = x_nchw.shape
    HW = H * W

    # Conv weights are stored HWIO (3,3,Cin,Cout); flatten once to (9*Cin, Cout)
    # so the kernel performs a single matmul per conv.
    w1 = params["conv1_w"].reshape(9 * C, -1).astype(matmul_dtype)
    w2 = params["conv2_w"].reshape(9 * C, -1).astype(matmul_dtype)
    assert w1.shape[1] == C and w2.shape == w1.shape, (
        "residual add (stride=1, downsample=None) requires Cin == Cout")

    bn1 = params[f"bn1{idx}"]
    bn2 = params[f"bn2{idx}"]
    s1, o1 = _fold_bn(**bn1)
    s2, o2 = _fold_bn(**bn2)

    # Keep HBM I/O in native NCHW; flattening spatial dims is free and makes the
    # last BlockSpec dim H*W -> lane-dense DMA (no NCHW<->NHWC transpose passes).
    x_flat = x_nchw.reshape(N, C, HW)

    out_flat = pl.pallas_call(
        _fused_basic_block_kernel,
        out_shape=jax.ShapeDtypeStruct((N, C, HW), jnp.float32),
        grid_spec=pltpu.PrefetchScalarGridSpec(
            num_scalar_prefetch=0,
            # TODO(synk): for real ResNet sizes (56x56x64+), add a parallel
            # H-row-tile grid axis (2-row halo) to bound VMEM per step and to
            # feed both v7x TensorCores; whole-image-per-step is fine here.
            grid=(N,),
            in_specs=[
                pl.BlockSpec((1, C, HW), lambda n: (n, 0, 0)),   # x
                pl.BlockSpec((9 * C, C), lambda n: (0, 0)),      # w1
                pl.BlockSpec((9 * C, C), lambda n: (0, 0)),      # w2
                pl.BlockSpec((1, C), lambda n: (0, 0)),          # bn1 scale
                pl.BlockSpec((1, C), lambda n: (0, 0)),          # bn1 bias
                pl.BlockSpec((1, C), lambda n: (0, 0)),          # bn2 scale
                pl.BlockSpec((1, C), lambda n: (0, 0)),          # bn2 bias
            ],
            out_specs=pl.BlockSpec((1, C, HW), lambda n: (n, 0, 0)),
            scratch_shapes=[
                pltpu.VMEM((H + 2, W + 2, C), jnp.float32),      # halo buffer (reused)
                pltpu.VMEM((HW, 9 * C), matmul_dtype),           # im2col slab (reused)
            ],
        ),
        compiler_params=pltpu.CompilerParams(
            dimension_semantics=("parallel",),
            vmem_limit_bytes=32 * 1024 * 1024,   # explicit; well within v7x's 64 MiB
        ),
    )(x_flat, w1, w2,
      s1.reshape(1, C), o1.reshape(1, C), s2.reshape(1, C), o2.reshape(1, C))

    return out_flat.reshape(N, C, H, W), b


# ---------------------------------------------------------------------------
# Deterministic parameter init + pure-JAX reference
# ---------------------------------------------------------------------------
def init_basic_block_params(key, inplanes, planes):
    """Deterministic parameters matching BasicBlock's shapes (weights in HWIO)."""
    k1, k2 = jax.random.split(key)
    params = {
        "conv1_w": jax.random.normal(k1, (3, 3, inplanes, planes), jnp.float32) * 0.1,
        "conv2_w": jax.random.normal(k2, (3, 3, planes, planes), jnp.float32) * 0.1,
    }
    for i in range(4):   # bn10..bn13 / bn20..bn23
        params[f"bn1{i}"] = dict(
            gamma=jnp.full((planes,), 1.0 + 0.05 * i, jnp.float32),
            beta=jnp.full((planes,), 0.01 * i, jnp.float32),
            mean=jnp.full((planes,), 0.02 * i, jnp.float32),
            var=jnp.full((planes,), 1.0 + 0.1 * i, jnp.float32),
        )
        params[f"bn2{i}"] = dict(
            gamma=jnp.full((planes,), 1.0 - 0.03 * i, jnp.float32),
            beta=jnp.full((planes,), -0.01 * i, jnp.float32),
            mean=jnp.full((planes,), 0.01 * i, jnp.float32),
            var=jnp.full((planes,), 1.0 + 0.05 * i, jnp.float32),
        )
    return params


def _reference_forward(params, x, b):
    """Pure-JAX reference (XLA conv) for correctness checking."""
    idx = b - 2

    def conv(inp, w):
        return jax.lax.conv_general_dilated(
            inp, w, window_strides=(1, 1), padding=((1, 1), (1, 1)),
            dimension_numbers=("NCHW", "HWIO", "NCHW"),
            precision=jax.lax.Precision.HIGHEST)

    s1, o1 = _fold_bn(**params[f"bn1{idx}"])
    s2, o2 = _fold_bn(**params[f"bn2{idx}"])
    out = conv(x, params["conv1_w"])
    out = jnp.maximum(out * s1[None, :, None, None] + o1[None, :, None, None], 0.0)
    out = conv(out, params["conv2_w"])
    out = out * s2[None, :, None, None] + o2[None, :, None, None]
    return jnp.maximum(out + x, 0.0)


if __name__ == "__main__":
    N, C, H, W = 2, 8, 16, 16          # inplanes == planes (residual add); H*W = 256
    key = jax.random.PRNGKey(0)
    kx, kp = jax.random.split(key)
    x = jax.random.normal(kx, (N, C, H, W), jnp.float32)
    params = init_basic_block_params(kp, inplanes=C, planes=C)

    b = 3
    out, b_out = basic_block_forward(params, x, b)
    out = jax.block_until_ready(out)
    assert out.shape == (N, C, H, W) and b_out == b

    ref = jax.block_until_ready(_reference_forward(params, x, b))
    max_err = float(jnp.max(jnp.abs(out - ref)))
    assert max_err < 1e-3, f"mismatch vs reference: max abs err = {max_err}"

    print("KERNEL_OK")
</pallas_src>

<mosaic_0001>
module attributes {stable_mosaic.version = 11 : i64} {
  func.func @_fused_basic_block_kernel(%arg0: i32, %arg1: memref<1x8x256xf32, #tpu.memory_space<vmem>>, %arg2: memref<72x8xf32, #tpu.memory_space<vmem>>, %arg3: memref<72x8xf32, #tpu.memory_space<vmem>>, %arg4: memref<1x8xf32, #tpu.memory_space<vmem>>, %arg5: memref<1x8xf32, #tpu.memory_space<vmem>>, %arg6: memref<1x8xf32, #tpu.memory_space<vmem>>, %arg7: memref<1x8xf32, #tpu.memory_space<vmem>>, %arg8: memref<1x8x256xf32, #tpu.memory_space<vmem>>, %arg9: memref<18x18x8xf32, #tpu.memory_space<vmem>>, %arg10: memref<256x72xf32, #tpu.memory_space<vmem>>) attributes {dimension_semantics = [#tpu.dimension_semantics<parallel>], iteration_bounds = array<i64: 2>, scalar_prefetch = 0 : i64, scratch_operands = 2 : i64, tpu.core_type = #tpu.core_type<tc>, window_params = [{transform_indices = @transform_0, window_bounds = array<i64: 1, 8, 256>}, {pipeline_mode = #tpu.pipeline_mode<synchronous>, transform_indices = @transform_1, window_bounds = array<i64: 72, 8>}, {pipeline_mode = #tpu.pipeline_mode<synchronous>, transform_indices = @transform_2, window_bounds = array<i64: 72, 8>}, {pipeline_mode = #tpu.pipeline_mode<synchronous>, transform_indices = @transform_3, window_bounds = array<i64: 1, 8>}, {pipeline_mode = #tpu.pipeline_mode<synchronous>, transform_indices = @transform_4, window_bounds = array<i64: 1, 8>}, {pipeline_mode = #tpu.pipeline_mode<synchronous>, transform_indices = @transform_5, window_bounds = array<i64: 1, 8>}, {pipeline_mode = #tpu.pipeline_mode<synchronous>, transform_indices = @transform_6, window_bounds = array<i64: 1, 8>}, {transform_indices = @transform_7, window_bounds = array<i64: 1, 8, 256>}]} {
    %cst = arith.constant 0.000000e+00 : f32
    %0 = vector.broadcast %cst : f32 to vector<18x18x8xf32>
    %c0 = arith.constant 0 : index
    %c0_0 = arith.constant 0 : index
    %c0_1 = arith.constant 0 : index
    %1 = vector.load %arg9[%c0, %c0_0, %c0_1] : memref<18x18x8xf32, #tpu.memory_space<vmem>>, vector<18x18x8xf32>
    tpu.vector_store %arg9[%c0, %c0_0, %c0_1], %0 {strides = array<i32>} : memref<18x18x8xf32, #tpu.memory_space<vmem>>, vector<18x18x8xf32>,
    %c0_2 = arith.constant 0 : index
    %c0_3 = arith.constant 0 : index
    %c0_4 = arith.constant 0 : index
    %2 = vector.load %arg1[%c0_2, %c0_3, %c0_4] : memref<1x8x256xf32, #tpu.memory_space<vmem>>, vector<1x8x256xf32>
    %3 = vector.shape_cast %2 : vector<1x8x256xf32> to vector<8x256xf32>
    %4 = tpu.transpose %3, [1, 0] : vector<8x256xf32> -> vector<256x8xf32>
    %5 = vector.shape_cast %4 : vector<256x8xf32> to vector<16x16x8xf32>
    %c1 = arith.constant 1 : index
    %c1_5 = arith.constant 1 : index
    %c0_6 = arith.constant 0 : index
    %6 = vector.load %arg9[%c1, %c1_5, %c0_6] : memref<18x18x8xf32, #tpu.memory_space<vmem>>, vector<16x16x8xf32>
    tpu.vector_store %arg9[%c1, %c1_5, %c0_6], %5 {strides = array<i32>} : memref<18x18x8xf32, #tpu.memory_space<vmem>>, vector<16x16x8xf32>,
    %c0_7 = arith.constant 0 : index
    %c0_8 = arith.constant 0 : index
    %c0_9 = arith.constant 0 : index
    %7 = vector.load %arg9[%c0_7, %c0_8, %c0_9] : memref<18x18x8xf32, #tpu.memory_space<vmem>>, vector<16x16x8xf32>
    %8 = vector.shape_cast %7 : vector<16x16x8xf32> to vector<256x8xf32>
    %c0_10 = arith.constant 0 : index
    %c0_11 = arith.constant 0 : index
    %9 = vector.load %arg10[%c0_10, %c0_11] : memref<256x72xf32, #tpu.memory_space<vmem>>, vector<256x8xf32>
    tpu.vector_store %arg10[%c0_10, %c0_11], %8 {strides = array<i32>} : memref<256x72xf32, #tpu.memory_space<vmem>>, vector<256x8xf32>,
    %c0_12 = arith.constant 0 : index
    %c1_13 = arith.constant 1 : index
    %c0_14 = arith.constant 0 : index
    %10 = vector.load %arg9[%c0_12, %c1_13, %c0_14] : memref<18x18x8xf32, #tpu.memory_space<vmem>>, vector<16x16x8xf32>
    %11 = vector.shape_cast %10 : vector<16x16x8xf32> to vector<256x8xf32>
    %c0_15 = arith.constant 0 : index
    %c8 = arith.constant 8 : index
    %12 = vector.load %arg10[%c0_15, %c8] : memref<256x72xf32, #tpu.memory_space<vmem>>, vector<256x8xf32>
    tpu.vector_store %arg10[%c0_15, %c8], %11 {strides = array<i32>} : memref<256x72xf32, #tpu.memory_space<vmem>>, vector<256x8xf32>,
    %c0_16 = arith.constant 0 : index
    %c2 = arith.constant 2 : index
    %c0_17 = arith.constant 0 : index
    %13 = vector.load %arg9[%c0_16, %c2, %c0_17] : memref<18x18x8xf32, #tpu.memory_space<vmem>>, vector<16x16x8xf32>
    %14 = vector.shape_cast %13 : vector<16x16x8xf32> to vector<256x8xf32>
    %c0_18 = arith.constant 0 : index
    %c16 = arith.constant 16 : index
    %15 = vector.load %arg10[%c0_18, %c16] : memref<256x72xf32, #tpu.memory_space<vmem>>, vector<256x8xf32>
    tpu.vector_store %arg10[%c0_18, %c16], %14 {strides = array<i32>} : memref<256x72xf32, #tpu.memory_space<vmem>>, vector<256x8xf32>,
    %c1_19 = arith.constant 1 : index
    %c0_20 = arith.constant 0 : index
    %c0_21 = arith.constant 0 : index
    %16 = vector.load %arg9[%c1_19, %c0_20, %c0_21] : memref<18x18x8xf32, #tpu.memory_space<vmem>>, vector<16x16x8xf32>
    %17 = vector.shape_cast %16 : vector<16x16x8xf32> to vector<256x8xf32>
    %c0_22 = arith.constant 0 : index
    %c24 = arith.constant 24 : index
    %18 = vector.load %arg10[%c0_22, %c24] : memref<256x72xf32, #tpu.memory_space<vmem>>, vector<256x8xf32>
    tpu.vector_store %arg10[%c0_22, %c24], %17 {strides = array<i32>} : memref<256x72xf32, #tpu.memory_space<vmem>>, vector<256x8xf32>,
    %c1_23 = arith.constant 1 : index
    %c1_24 = arith.constant 1 : index
    %c0_25 = arith.constant 0 : index
    %19 = vector.load %arg9[%c1_23, %c1_24, %c0_25] : memref<18x18x8xf32, #tpu.memory_space<vmem>>, vector<16x16x8xf32>
    %20 = vector.shape_cast %19 : vector<16x16x8xf32> to vector<256x8xf32>
    %c0_26 = arith.constant 0 : index
    %c32 = arith.constant 32 : index
    %21 = vector.load %arg10[%c0_26, %c32] : memref<256x72xf32, #tpu.memory_space<vmem>>, vector<256x8xf32>
    tpu.vector_store %arg10[%c0_26, %c32], %20 {strides = array<i32>} : memref<256x72xf32, #tpu.memory_space<vmem>>, vector<256x8xf32>,
    %c1_27 = arith.constant 1 : index
    %c2_28 = arith.constant 2 : index
    %c0_29 = arith.constant 0 : index
    %22 = vector.load %arg9[%c1_27, %c2_28, %c0_29] : memref<18x18x8xf32, #tpu.memory_space<vmem>>, vector<16x16x8xf32>
    %23 = vector.shape_cast %22 : vector<16x16x8xf32> to vector<256x8xf32>
    %c0_30 = arith.constant 0 : index
    %c40 = arith.constant 40 : index
    %24 = vector.load %arg10[%c0_30, %c40] : memref<256x72xf32, #tpu.memory_space<vmem>>, vector<256x8xf32>
    tpu.vector_store %arg10[%c0_30, %c40], %23 {strides = array<i32>} : memref<256x72xf32, #tpu.memory_space<vmem>>, vector<256x8xf32>,
    %c2_31 = arith.constant 2 : index
    %c0_32 = arith.constant 0 : index
    %c0_33 = arith.constant 0 : index
    %25 = vector.load %arg9[%c2_31, %c0_32, %c0_33] : memref<18x18x8xf32, #tpu.memory_space<vmem>>, vector<16x16x8xf32>
    %26 = vector.shape_cast %25 : vector<16x16x8xf32> to vector<256x8xf32>
    %c0_34 = arith.constant 0 : index
    %c48 = arith.constant 48 : index
    %27 = vector.load %arg10[%c0_34, %c48] : memref<256x72xf32, #tpu.memory_space<vmem>>, vector<256x8xf32>
    tpu.vector_store %arg10[%c0_34, %c48], %26 {strides = array<i32>} : memref<256x72xf32, #tpu.memory_space<vmem>>, vector<256x8xf32>,
    %c2_35 = arith.constant 2 : index
    %c1_36 = arith.constant 1 : index
    %c0_37 = arith.constant 0 : index
    %28 = vector.load %arg9[%c2_35, %c1_36, %c0_37] : memref<18x18x8xf32, #tpu.memory_space<vmem>>, vector<16x16x8xf32>
    %29 = vector.shape_cast %28 : vector<16x16x8xf32> to vector<256x8xf32>
    %c0_38 = arith.constant 0 : index
    %c56 = arith.constant 56 : index
    %30 = vector.load %arg10[%c0_38, %c56] : memref<256x72xf32, #tpu.memory_space<vmem>>, vector<256x8xf32>
    tpu.vector_store %arg10[%c0_38, %c56], %29 {strides = array<i32>} : memref<256x72xf32, #tpu.memory_space<vmem>>, vector<256x8xf32>,
    %c2_39 = arith.constant 2 : index
    %c2_40 = arith.constant 2 : index
    %c0_41 = arith.constant 0 : index
    %31 = vector.load %arg9[%c2_39, %c2_40, %c0_41] : memref<18x18x8xf32, #tpu.memory_space<vmem>>, vector<16x16x8xf32>
    %32 = vector.shape_cast %31 : vector<16x16x8xf32> to vector<256x8xf32>
    %c0_42 = arith.constant 0 : index
    %c64 = arith.constant 64 : index
    %33 = vector.load %arg10[%c0_42, %c64] : memref<256x72xf32, #tpu.memory_space<vmem>>, vector<256x8xf32>
    tpu.vector_store %arg10[%c0_42, %c64], %32 {strides = array<i32>} : memref<256x72xf32, #tpu.memory_space<vmem>>, vector<256x8xf32>,
    %c0_43 = arith.constant 0 : index
    %c0_44 = arith.constant 0 : index
    %34 = vector.load %arg10[%c0_43, %c0_44] : memref<256x72xf32, #tpu.memory_space<vmem>>, vector<256x72xf32>
    %c0_45 = arith.constant 0 : index
    %c0_46 = arith.constant 0 : index
    %35 = vector.load %arg2[%c0_45, %c0_46] : memref<72x8xf32, #tpu.memory_space<vmem>>, vector<72x8xf32>
    %cst_47 = arith.constant dense<0.000000e+00> : vector<256x8xf32>
    %36 = tpu.matmul %34, %35, %cst_47 {dimension_numbers = #tpu.dot_dimension_numbers<[1], [0], [0], [1], [0, 0, 1, 1], [], []>} : vector<256x72xf32>, vector<72x8xf32>, vector<256x8xf32> -> vector<256x8xf32>
    %c0_48 = arith.constant 0 : index
    %c0_49 = arith.constant 0 : index
    %37 = vector.load %arg4[%c0_48, %c0_49] : memref<1x8xf32, #tpu.memory_space<vmem>>, vector<1x8xf32>
    %38 = vector.broadcast %37 : vector<1x8xf32> to vector<256x8xf32>
    %39 = arith.mulf %36, %38 : vector<256x8xf32>
    %c0_50 = arith.constant 0 : index
    %c0_51 = arith.constant 0 : index
    %40 = vector.load %arg5[%c0_50, %c0_51] : memref<1x8xf32, #tpu.memory_space<vmem>>, vector<1x8xf32>
    %41 = vector.broadcast %40 : vector<1x8xf32> to vector<256x8xf32>
    %42 = arith.addf %39, %41 : vector<256x8xf32>
    %cst_52 = arith.constant 0.000000e+00 : f32
    %43 = vector.broadcast %cst_52 : f32 to vector<256x8xf32>
    %44 = arith.maximumf %42, %43 : vector<256x8xf32>
    %45 = vector.shape_cast %44 : vector<256x8xf32> to vector<16x16x8xf32>
    %c1_53 = arith.constant 1 : index
    %c1_54 = arith.constant 1 : index
    %c0_55 = arith.constant 0 : index
    %46 = vector.load %arg9[%c1_53, %c1_54, %c0_55] : memref<18x18x8xf32, #tpu.memory_space<vmem>>, vector<16x16x8xf32>
    tpu.vector_store %arg9[%c1_53, %c1_54, %c0_55], %45 {strides = array<i32>} : memref<18x18x8xf32, #tpu.memory_space<vmem>>, vector<16x16x8xf32>,
    %c0_56 = arith.constant 0 : index
    %c0_57 = arith.constant 0 : index
    %c0_58 = arith.constant 0 : index
    %47 = vector.load %arg9[%c0_56, %c0_57, %c0_58] : memref<18x18x8xf32, #tpu.memory_space<vmem>>, vector<16x16x8xf32>
    %48 = vector.shape_cast %47 : vector<16x16x8xf32> to vector<256x8xf32>
    %c0_59 = arith.constant 0 : index
    %c0_60 = arith.constant 0 : index
    %49 = vector.load %arg10[%c0_59, %c0_60] : memref<256x72xf32, #tpu.memory_space<vmem>>, vector<256x8xf32>
    tpu.vector_store %arg10[%c0_59, %c0_60], %48 {strides = array<i32>} : memref<256x72xf32, #tpu.memory_space<vmem>>, vector<256x8xf32>,
    %c0_61 = arith.constant 0 : index
    %c1_62 = arith.constant 1 : index
    %c0_63 = arith.constant 0 : index
    %50 = vector.load %arg9[%c0_61, %c1_62, %c0_63] : memref<18x18x8xf32, #tpu.memory_space<vmem>>, vector<16x16x8xf32>
    %51 = vector.shape_cast %50 : vector<16x16x8xf32> to vector<256x8xf32>
    %c0_64 = arith.constant 0 : index
    %c8_65 = arith.constant 8 : index
    %52 = vector.load %arg10[%c0_64, %c8_65] : memref<256x72xf32, #tpu.memory_space<vmem>>, vector<256x8xf32>
    tpu.vector_store %arg10[%c0_64, %c8_65], %51 {strides = array<i32>} : memref<256x72xf32, #tpu.memory_space<vmem>>, vector<256x8xf32>,
    %c0_66 = arith.constant 0 : index
    %c2_67 = arith.constant 2 : index
    %c0_68 = arith.constant 0 : index
    %53 = vector.load %arg9[%c0_66, %c2_67, %c0_68] : memref<18x18x8xf32, #tpu.memory_space<vmem>>, vector<16x16x8xf32>
    %54 = vector.shape_cast %53 : vector<16x16x8xf32> to vector<256x8xf32>
    %c0_69 = arith.constant 0 : index
    %c16_70 = arith.constant 16 : index
    %55 = vector.load %arg10[%c0_69, %c16_70] : memref<256x72xf32, #tpu.memory_space<vmem>>, vector<256x8xf32>
    tpu.vector_store %arg10[%c0_69, %c16_70], %54 {strides = array<i32>} : memref<256x72xf32, #tpu.memory_space<vmem>>, vector<256x8xf32>,
    %c1_71 = arith.constant 1 : index
    %c0_72 = arith.constant 0 : index
    %c0_73 = arith.constant 0 : index
    %56 = vector.load %arg9[%c1_71, %c0_72, %c0_73] : memref<18x18x8xf32, #tpu.memory_space<vmem>>, vector<16x16x8xf32>
    %57 = vector.shape_cast %56 : vector<16x16x8xf32> to vector<256x8xf32>
    %c0_74 = arith.constant 0 : index
    %c24_75 = arith.constant 24 : index
    %58 = vector.load %arg10[%c0_74, %c24_75] : memref<256x72xf32, #tpu.memory_space<vmem>>, vector<256x8xf32>
    tpu.vector_store %arg10[%c0_74, %c24_75], %57 {strides = array<i32>} : memref<256x72xf32, #tpu.memory_space<vmem>>, vector<256x8xf32>,
    %c1_76 = arith.constant 1 : index
    %c1_77 = arith.constant 1 : index
    %c0_78 = arith.constant 0 : index
    %59 = vector.load %arg9[%c1_76, %c1_77, %c0_78] : memref<18x18x8xf32, #tpu.memory_space<vmem>>, vector<16x16x8xf32>
    %60 = vector.shape_cast %59 : vector<16x16x8xf32> to vector<256x8xf32>
    %c0_79 = arith.constant 0 : index
    %c32_80 = arith.constant 32 : index
    %61 = vector.load %arg10[%c0_79, %c32_80] : memref<256x72xf32, #tpu.memory_space<vmem>>, vector<256x8xf32>
    tpu.vector_store %arg10[%c0_79, %c32_80], %60 {strides = array<i32>} : memref<256x72xf32, #tpu.memory_space<vmem>>, vector<256x8xf32>,
    %c1_81 = arith.constant 1 : index
    %c2_82 = arith.constant 2 : index
    %c0_83 = arith.constant 0 : index
    %62 = vector.load %arg9[%c1_81, %c2_82, %c0_83] : memref<18x18x8xf32, #tpu.memory_space<vmem>>, vector<16x16x8xf32>
    %63 = vector.shape_cast %62 : vector<16x16x8xf32> to vector<256x8xf32>
    %c0_84 = arith.constant 0 : index
    %c40_85 = arith.constant 40 : index
    %64 = vector.load %arg10[%c0_84, %c40_85] : memref<256x72xf32, #tpu.memory_space<vmem>>, vector<256x8xf32>
    tpu.vector_store %arg10[%c0_84, %c40_85], %63 {strides = array<i32>} : memref<256x72xf32, #tpu.memory_space<vmem>>, vector<256x8xf32>,
    %c2_86 = arith.constant 2 : index
    %c0_87 = arith.constant 0 : index
    %c0_88 = arith.constant 0 : index
    %65 = vector.load %arg9[%c2_86, %c0_87, %c0_88] : memref<18x18x8xf32, #tpu.memory_space<vmem>>, vector<16x16x8xf32>
    %66 = vector.shape_cast %65 : vector<16x16x8xf32> to vector<256x8xf32>
    %c0_89 = arith.constant 0 : index
    %c48_90 = arith.constant 48 : index
    %67 = vector.load %arg10[%c0_89, %c48_90] : memref<256x72xf32, #tpu.memory_space<vmem>>, vector<256x8xf32>
    tpu.vector_store %arg10[%c0_89, %c48_90], %66 {strides = array<i32>} : memref<256x72xf32, #tpu.memory_space<vmem>>, vector<256x8xf32>,
    %c2_91 = arith.constant 2 : index
    %c1_92 = arith.constant 1 : index
    %c0_93 = arith.constant 0 : index
    %68 = vector.load %arg9[%c2_91, %c1_92, %c0_93] : memref<18x18x8xf32, #tpu.memory_space<vmem>>, vector<16x16x8xf32>
    %69 = vector.shape_cast %68 : vector<16x16x8xf32> to vector<256x8xf32>
    %c0_94 = arith.constant 0 : index
    %c56_95 = arith.constant 56 : index
    %70 = vector.load %arg10[%c0_94, %c56_95] : memref<256x72xf32, #tpu.memory_space<vmem>>, vector<256x8xf32>
    tpu.vector_store %arg10[%c0_94, %c56_95], %69 {strides = array<i32>} : memref<256x72xf32, #tpu.memory_space<vmem>>, vector<256x8xf32>,
    %c2_96 = arith.constant 2 : index
    %c2_97 = arith.constant 2 : index
    %c0_98 = arith.constant 0 : index
    %71 = vector.load %arg9[%c2_96, %c2_97, %c0_98] : memref<18x18x8xf32, #tpu.memory_space<vmem>>, vector<16x16x8xf32>
    %72 = vector.shape_cast %71 : vector<16x16x8xf32> to vector<256x8xf32>
    %c0_99 = arith.constant 0 : index
    %c64_100 = arith.constant 64 : index
    %73 = vector.load %arg10[%c0_99, %c64_100] : memref<256x72xf32, #tpu.memory_space<vmem>>, vector<256x8xf32>
    tpu.vector_store %arg10[%c0_99, %c64_100], %72 {strides = array<i32>} : memref<256x72xf32, #tpu.memory_space<vmem>>, vector<256x8xf32>,
    %c0_101 = arith.constant 0 : index
    %c0_102 = arith.constant 0 : index
    %74 = vector.load %arg10[%c0_101, %c0_102] : memref<256x72xf32, #tpu.memory_space<vmem>>, vector<256x72xf32>
    %c0_103 = arith.constant 0 : index
    %c0_104 = arith.constant 0 : index
    %75 = vector.load %arg3[%c0_103, %c0_104] : memref<72x8xf32, #tpu.memory_space<vmem>>, vector<72x8xf32>
    %cst_105 = arith.constant dense<0.000000e+00> : vector<256x8xf32>
    %76 = tpu.matmul %74, %75, %cst_105 {dimension_numbers = #tpu.dot_dimension_numbers<[1], [0], [0], [1], [0, 0, 1, 1], [], []>} : vector<256x72xf32>, vector<72x8xf32>, vector<256x8xf32> -> vector<256x8xf32>
    %c0_106 = arith.constant 0 : index
    %c0_107 = arith.constant 0 : index
    %77 = vector.load %arg6[%c0_106, %c0_107] : memref<1x8xf32, #tpu.memory_space<vmem>>, vector<1x8xf32>
    %78 = vector.broadcast %77 : vector<1x8xf32> to vector<256x8xf32>
    %79 = arith.mulf %76, %78 : vector<256x8xf32>
    %c0_108 = arith.constant 0 : index
    %c0_109 = arith.constant 0 : index
    %80 = vector.load %arg7[%c0_108, %c0_109] : memref<1x8xf32, #tpu.memory_space<vmem>>, vector<1x8xf32>
    %81 = vector.broadcast %80 : vector<1x8xf32> to vector<256x8xf32>
    %82 = arith.addf %79, %81 : vector<256x8xf32>
    %83 = tpu.transpose %82, [1, 0] : vector<256x8xf32> -> vector<8x256xf32>
    %c0_110 = arith.constant 0 : index
    %c0_111 = arith.constant 0 : index
    %c0_112 = arith.constant 0 : index
    %84 = vector.load %arg1[%c0_110, %c0_111, %c0_112] : memref<1x8x256xf32, #tpu.memory_space<vmem>>, vector<1x8x256xf32>
    %85 = vector.shape_cast %84 : vector<1x8x256xf32> to vector<8x256xf32>
    %86 = arith.addf %83, %85 : vector<8x256xf32>
    %cst_113 = arith.constant 0.000000e+00 : f32
    %87 = vector.broadcast %cst_113 : f32 to vector<8x256xf32>
    %88 = arith.maximumf %86, %87 : vector<8x256xf32>
    %89 = vector.shape_cast %88 : vector<8x256xf32> to vector<1x8x256xf32>
    %c0_114 = arith.constant 0 : index
    %c0_115 = arith.constant 0 : index
    %c0_116 = arith.constant 0 : index
    %90 = vector.load %arg8[%c0_114, %c0_115, %c0_116] : memref<1x8x256xf32, #tpu.memory_space<vmem>>, vector<1x8x256xf32>
    tpu.vector_store %arg8[%c0_114, %c0_115, %c0_116], %89 {strides = array<i32>} : memref<1x8x256xf32, #tpu.memory_space<vmem>>, vector<1x8x256xf32>,
    return
  }
  func.func @transform_0(%arg0: i32) -> (i32, i32, i32) {
    %c0_i32 = arith.constant 0 : i32
    %c0_i32_0 = arith.constant 0 : i32
    %c0_i32_1 = arith.constant 0 : i32
    return %arg0, %c0_i32, %c0_i32_0 : i32, i32, i32
  }
  func.func @transform_1(%arg0: i32) -> (i32, i32) {
    %c0_i32 = arith.constant 0 : i32
    %c0_i32_0 = arith.constant 0 : i32
    %c0_i32_1 = arith.constant 0 : i32
    return %c0_i32, %c0_i32_0 : i32, i32
  }
  func.func @transform_2(%arg0: i32) -> (i32, i32) {
    %c0_i32 = arith.constant 0 : i32
    %c0_i32_0 = arith.constant 0 : i32
    %c0_i32_1 = arith.constant 0 : i32
    return %c0_i32, %c0_i32_0 : i32, i32
  }
  func.func @transform_3(%arg0: i32) -> (i32, i32) {
    %c0_i32 = arith.constant 0 : i32
    %c0_i32_0 = arith.constant 0 : i32
    %c0_i32_1 = arith.constant 0 : i32
    return %c0_i32, %c0_i32_0 : i32, i32
  }
  func.func @transform_4(%arg0: i32) -> (i32, i32) {
    %c0_i32 = arith.constant 0 : i32
    %c0_i32_0 = arith.constant 0 : i32
    %c0_i32_1 = arith.constant 0 : i32
    return %c0_i32, %c0_i32_0 : i32, i32
  }
  func.func @transform_5(%arg0: i32) -> (i32, i32) {
    %c0_i32 = arith.constant 0 : i32
    %c0_i32_0 = arith.constant 0 : i32
    %c0_i32_1 = arith.constant 0 : i32
    return %c0_i32, %c0_i32_0 : i32, i32
  }
  func.func @transform_6(%arg0: i32) -> (i32, i32) {
    %c0_i32 = arith.constant 0 : i32
    %c0_i32_0 = arith.constant 0 : i32
    %c0_i32_1 = arith.constant 0 : i32
    return %c0_i32, %c0_i32_0 : i32, i32
  }
  func.func @transform_7(%arg0: i32) -> (i32, i32, i32) {
    %c0_i32 = arith.constant 0 : i32
    %c0_i32_0 = arith.constant 0 : i32
    %c0_i32_1 = arith.constant 0 : i32
    return %arg0, %c0_i32, %c0_i32_0 : i32, i32, i32
  }
}

</mosaic_0001>

<bundles_post_ra>
// kernel: tpu_custom_call.1
= control target key start
LH: loop header
LB: loop body
LE: loop exit
PB: predicated region body
PF: predicated region fallthrough
CT: control target
= control target key end

     0   :  { %12 = vsyncpa [#allocation5], 0  ;;  %s7457_s0 = inlined_call_operand.vmem [shape: f32[2,8,256], index: 0, kind: input, shape index: {}]   ;;  %s7458_s1 = inlined_call_operand.vmem [shape: f32[72,8], index: 1, kind: input, shape index: {}]   ;;  %s7459_s2 = inlined_call_operand.vmem [shape: f32[72,8], index: 2, kind: input, shape index: {}]   ;;  %s7460_s3 = inlined_call_operand.vmem [shape: f32[1,8], index: 3, kind: input, shape index: {}]   ;;  %s7461_s4 = inlined_call_operand.vmem [shape: f32[1,8], index: 4, kind: input, shape index: {}]   ;;  %s7462_s5 = inlined_call_operand.vmem [shape: f32[1,8], index: 5, kind: input, shape index: {}]   ;;  %s7463_s6 = inlined_call_operand.vmem [shape: f32[1,8], index: 6, kind: input, shape index: {}]   ;;  %s7464_s7 = inlined_call_operand.hbm [shape: f32[2,8,256], index: 7, kind: output, shape index: {}]  }
   0x1   :  { %14 = vsyncpa [#allocation5 + $0x1], 0  ;;  %s5222_s24 = smov 0   ;;  %s5224_s25 = smov 0  }
   0x2   :  { %s5226_s26 = smov 0   ;;  %s5228_s27 = smov 0  }
   0x3 LB: > { %s5243_s28 = sadd.s32 4294967295, %s5170_s27   ;;  %s4732_s29 = sadd.s32 4294967294, %s5170_s27   ;;  %s5170_s27 = sphi %s5228_s27, %s7551_s27   ;;  %s5166_s26 = sphi %s5226_s26, %s7550_s26   ;;  %s5162_s25 = sphi %s5224_s25, %s7549_s25   ;;  %s5158_s24 = sphi %s5222_s24, %s7548_s24  }
   0x4   : > { %s5247_s30 = sadd.s32 1, %s5170_s27   ;;  %s179_s8 = sadd.s32 1, %s5166_s26 }
   0x5   : > { %s176_s9 = ssub.s32 %s5170_s27, %s5247_s30  ;;  %p189_p0 = scmp.ne.s32.totalorder %s5166_s26, %s5162_s25 }
   0x6   : > { %p177_p1 = scmp.eq.s32.totalorder %s176_s9, 0  ;;  %p190_p2 = scmp.eq.s32.totalorder %s5243_s28, 1 }
   0x7   : > { %p195_p3 = scmp.ne.s32.totalorder %s5162_s25, %s5158_s24  ;;  %p196_p4 = scmp.eq.s32.totalorder %s4732_s29, 1 }
   0x8   : > { %s5258_s10 = scalar_select %p177_p1, %s5166_s26, %s179_s8  }
   0x9   : > { %p5260_p5 = por %p190_p2, %p189_p0  ;;  %p5264_p6 = por %p196_p4, %p195_p3 }
   0xa   : > { %p4735_p7 = scmp.ge.s32.totalorder %s5170_s27, 1  ;;  %p240_p8 = scmp.lt.s32.totalorder %s5170_s27, 3 }
   0xc   : > { %p241_p9 = pnand %p4735_p7, %p240_p8 }
   0xe   : > { %244 = sbr.rel (%p241_p9) target bundleno = 1973 (0x7b5), region = 48 }
  0x15   : > { %p272_p10 = scmp.lt.s32.totalorder %s5243_s28, 1  ;;  %vm277_vm0 = vcmask 64512   ;;  %v5172_v0 = vmov 0.0   ;;  %vm280_vm1 = vcmask 58368   ;;  %s5173_s18 = smov 8   ;;  %vm656_vm2 = vcmask 130112  }
  0x16   : > { %282 = vst.msk [vmem:[#allocation2 + $0x18] sm:$0xff] %vm277_vm0, %v5172_v0  ;;  %283 = vst.msk [vmem:[#allocation2 + $0x20] sm:$0xff] %vm277_vm0, %v5172_v0  ;;  %s5174_s19 = smov 16   ;;  %s5175_s20 = smov 24   ;;  %vm849_vm3 = vcmask 195712   ;;  %vm1042_vm4 = vcmask 261312  }
  0x17   : > { %278 = vst.msk [vmem:[#allocation2] sm:$0xff] %vm277_vm0, %v5172_v0  ;;  %279 = vst.msk [vmem:[#allocation2 + $0x8] sm:$0xff] %vm277_vm0, %v5172_v0  ;;  %s273_s13 = scalar_select %p272_p10, %s5243_s28, 1  ;;  %vm1235_vm5 = vcmask 326912   ;;  %vm1428_vm6 = vcmask 392512   ;;  %vm1622_vm7 = vcmask 458112  }
  0x18   : > { %285 = vst.msk [vmem:[#allocation2 + $0x30] sm:$0xff] %vm277_vm0, %v5172_v0  ;;  %286 = vst.msk [vmem:[#allocation2 + $0x38] sm:$0xff] %vm277_vm0, %v5172_v0  ;;  %s5176_s21 = smov 32   ;;  %s5177_s22 = smov 40   ;;  %vm1815_vm8 = vcmask 523712   ;;  %vm2008_vm9 = vcmask 589312  }
  0x19   : > { %288 = vst.msk [vmem:[#allocation2 + $0x48] sm:$0xff] %vm277_vm0, %v5172_v0  ;;  %289 = vst.msk [vmem:[#allocation2 + $0x50] sm:$0xff] %vm277_vm0, %v5172_v0  ;;  %s4812_s14 = sshll.u32 %s273_s13, 4  ;;  %s5178_s23 = smov 48   ;;  %vm2082_vm10 = vcmask 588800  }
  0x1a   : > { %291 = vst.msk [vmem:[#allocation2 + $0x60] sm:$0xff] %vm277_vm0, %v5172_v0  ;;  %292 = vst.msk [vmem:[#allocation2 + $0x68] sm:$0xff] %vm277_vm0, %v5172_v0  ;;  %s5331_s17 = scalar_lea.vmem %s7457_s0, %s4812_s14  ;;  %s5179_s29 = smov 56  }
  0x1b   : > { %294 = vst.msk [vmem:[#allocation2 + $0x78] sm:$0xff] %vm277_vm0, %v5172_v0  ;;  %295 = vst.msk [vmem:[#allocation2 + $0x80] sm:$0xff] %vm277_vm0, %v5172_v0  ;;  %v333_v1 = vld [vmem:[%s5331_s17] sm:$0xff]  ;;  %v334_v4 = vld [vmem:[%s5331_s17 + $0x8] sm:$0xff]  ;;  %s5180_s8 = smov 64  }
  0x1c   : > { %297 = vst.msk [vmem:[#allocation2 + $0x90] sm:$0xff] %vm277_vm0, %v5172_v0  ;;  %298 = vst.msk [vmem:[#allocation2 + $0x98] sm:$0xff] %vm277_vm0, %v5172_v0  ;;  %335 = vxpose.xlu0.b32.start.end [1/1] (short) %v333_v1, 128 }
  0x1d   : > { %300 = vst.msk [vmem:[#allocation2 + $0xa8] sm:$0xff] %vm277_vm0, %v5172_v0  ;;  %301 = vst.msk [vmem:[#allocation2 + $0xb0] sm:$0xff] %vm277_vm0, %v5172_v0 }
  0x1e   : > { %303 = vst.msk [vmem:[#allocation2 + $0xc0] sm:$0xff] %vm277_vm0, %v5172_v0  ;;  %304 = vst.msk [vmem:[#allocation2 + $0xc8] sm:$0xff] %vm277_vm0, %v5172_v0  ;;  %v496_v2 = vld [vmem:[#allocation2 + $0x1] sm:$0xff] }
  0x1f   : > { %306 = vst.msk [vmem:[#allocation2 + $0xd8] sm:$0xff] %vm277_vm0, %v5172_v0  ;;  %307 = vst.msk [vmem:[#allocation2 + $0xe0] sm:$0xff] %vm277_vm0, %v5172_v0  ;;  %560 = vrot.lane.b32.xlu1 %v496_v2, %s5173_s18  ;;  %v432_v5 = vld [vmem:[#allocation2] sm:$0xff]  ;;  %v433_v7 = vld [vmem:[#allocation2 + $0x8] sm:$0xff] }
  0x20   : > { %309 = vst.msk [vmem:[#allocation2 + $0xf0] sm:$0xff] %vm277_vm0, %v5172_v0  ;;  %310 = vst.msk [vmem:[#allocation2 + $0xf8] sm:$0xff] %vm277_vm0, %v5172_v0 }
  0x21   : > { %312 = vst.msk [vmem:[#allocation2 + $0x108] sm:$0xff] %vm277_vm0, %v5172_v0  ;;  %313 = vst.msk [vmem:[#allocation2 + $0x110] sm:$0xff] %vm277_vm0, %v5172_v0 }
  0x22   : > { %315 = vst.msk [vmem:[#allocation2 + $0x120] sm:$0xff] %vm277_vm0, %v5172_v0  ;;  %316 = vst.msk [vmem:[#allocation2 + $0x128] sm:$0xff] %vm277_vm0, %v5172_v0 }
  0x23   : > { %318 = vst.msk [vmem:[#allocation2 + $0x138] sm:$0xff] %vm277_vm0, %v5172_v0  ;;  %319 = vst.msk [vmem:[#allocation2 + $0x140] sm:$0xff] %vm277_vm0, %v5172_v0 }
  0x24   : > { %321 = vst.msk [vmem:[#allocation2 + $0x150] sm:$0xff] %vm277_vm0, %v5172_v0  ;;  %322 = vst.msk [vmem:[#allocation2 + $0x158] sm:$0xff] %vm277_vm0, %v5172_v0 }
  0x25   : > { %324 = vst.msk [vmem:[#allocation2 + $0x168] sm:$0xff] %vm277_vm0, %v5172_v0  ;;  %325 = vst.msk [vmem:[#allocation2 + $0x170] sm:$0xff] %vm277_vm0, %v5172_v0 }
  0x26   : > { %327 = vst.msk [vmem:[#allocation2 + $0x180] sm:$0xff] %vm277_vm0, %v5172_v0  ;;  %328 = vst.msk [vmem:[#allocation2 + $0x188] sm:$0xff] %vm277_vm0, %v5172_v0 }
  0x27   : > { %330 = vst.msk [vmem:[#allocation2 + $0x198] sm:$0xff] %vm277_vm0, %v5172_v0  ;;  %331 = vst.msk [vmem:[#allocation2 + $0x1a0] sm:$0xff] %vm277_vm0, %v5172_v0 }
  0x28   : > { %284 = vst.msk [vmem:[#allocation2 + $0x28] sm:$0x3] %vm280_vm1, %v5172_v0  ;;  %281 = vst.msk [vmem:[#allocation2 + $0x10] sm:$0x3] %vm280_vm1, %v5172_v0 }
  0x29   : > { %287 = vst.msk [vmem:[#allocation2 + $0x40] sm:$0x3] %vm280_vm1, %v5172_v0  ;;  %290 = vst.msk [vmem:[#allocation2 + $0x58] sm:$0x3] %vm280_vm1, %v5172_v0 }
  0x2a   : > { %293 = vst.msk [vmem:[#allocation2 + $0x70] sm:$0x3] %vm280_vm1, %v5172_v0  ;;  %296 = vst.msk [vmem:[#allocation2 + $0x88] sm:$0x3] %vm280_vm1, %v5172_v0 }
  0x2b   : > { %299 = vst.msk [vmem:[#allocation2 + $0xa0] sm:$0x3] %vm280_vm1, %v5172_v0  ;;  %302 = vst.msk [vmem:[#allocation2 + $0xb8] sm:$0x3] %vm280_vm1, %v5172_v0 }
  0x2c   : > { %305 = vst.msk [vmem:[#allocation2 + $0xd0] sm:$0x3] %vm280_vm1, %v5172_v0  ;;  %308 = vst.msk [vmem:[#allocation2 + $0xe8] sm:$0x3] %vm280_vm1, %v5172_v0 }
  0x2d   : > { %311 = vst.msk [vmem:[#allocation2 + $0x100] sm:$0x3] %vm280_vm1, %v5172_v0  ;;  %314 = vst.msk [vmem:[#allocation2 + $0x118] sm:$0x3] %vm280_vm1, %v5172_v0 }
  0x2e   : > { %317 = vst.msk [vmem:[#allocation2 + $0x130] sm:$0x3] %vm280_vm1, %v5172_v0  ;;  %320 = vst.msk [vmem:[#allocation2 + $0x148] sm:$0x3] %vm280_vm1, %v5172_v0 }
  0x2f   : > { %323 = vst.msk [vmem:[#allocation2 + $0x160] sm:$0x3] %vm280_vm1, %v5172_v0  ;;  %326 = vst.msk [vmem:[#allocation2 + $0x178] sm:$0x3] %vm280_vm1, %v5172_v0  ;;  %v497_v3 = vld [vmem:[#allocation2 + $0x9] sm:$0xff] }
  0x30   : > { %329 = vst.msk [vmem:[#allocation2 + $0x190] sm:$0x3] %vm280_vm1, %v5172_v0  ;;  %332 = vst.msk [vmem:[#allocation2 + $0x1a8] sm:$0x3] %vm280_vm1, %v5172_v0  ;;  %562 = vrot.lane.b32.xlu1 %v497_v3, %s5173_s18 }
  0x31   : > { %464 = vst.msk [vmem:[#allocation3] sm:$0xff] %vm277_vm0, %v432_v5  ;;  %465 = vst.msk [vmem:[#allocation3 + $0x8] sm:$0xff] %vm277_vm0, %v433_v7 }
  0x59   : > { %367 = vxpose.xlu0.b32.start.end [1/1] (short) %v334_v4, 128 }
  0x91   : > { %v561_v6 = vpop.permute.xlu1 %560 }
  0x92   : > { %657 = vst.msk [vmem:[#allocation3] sm:$0xff] %vm656_vm2, %v561_v6 }
  0x9c   : > { %v351_v9 = vpop.trf.xlu0 }
  0x9d   : > { %400 = vst.msk [vmem:[#allocation2 + $0x19] sm:$0xff] %vm277_vm0, %v351_v9 }
  0xa0   : > { %v352_v10 = vpop.trf.xlu0 }
  0xa1   : > { %401 = vst.msk [vmem:[#allocation2 + $0x21] sm:$0xff] %vm277_vm0, %v352_v10 }
  0xa2   : > { %v563_v8 = vpop.permute.xlu1 %562 }
  0xa3   : > { %658 = vst.msk [vmem:[#allocation3 + $0x8] sm:$0xff] %vm656_vm2, %v563_v8 }
  0xa4   : > { %v353_v11 = vpop.trf.xlu0  ;;  %v5343_v12 = vld [vmem:[#allocation2 + $0x19] sm:$0xff] }
  0xa5   : > { %v5345_v13 = vld [vmem:[#allocation2 + $0x18] sm:$0xff]  ;;  %402 = vst.msk [vmem:[#allocation2 + $0x31] sm:$0xff] %vm277_vm0, %v353_v11  ;;  %564 = vrot.lane.b32.xlu1 %v5343_v12, %s5173_s18 }
  0xa6   : > { %466 = vst.msk [vmem:[#allocation3 + $0x10] sm:$0xff] %vm277_vm0, %v5345_v13 }
  0xa8   : > { %v354_v14 = vpop.trf.xlu0  ;;  %v5352_v15 = vld [vmem:[#allocation2 + $0x21] sm:$0xff] }
  0xa9   : > { %v5354_v16 = vld [vmem:[#allocation2 + $0x20] sm:$0xff]  ;;  %403 = vst.msk [vmem:[#allocation2 + $0x39] sm:$0xff] %vm277_vm0, %v354_v14  ;;  %566 = vrot.lane.b32.xlu1 %v5352_v15, %s5173_s18 }
  0xaa   : > { %467 = vst.msk [vmem:[#allocation3 + $0x18] sm:$0xff] %vm277_vm0, %v5354_v16 }
  0xac   : > { %v355_v17 = vpop.trf.xlu0  ;;  %v5361_v18 = vld [vmem:[#allocation2 + $0x31] sm:$0xff] }
  0xad   : > { %v5363_v19 = vld [vmem:[#allocation2 + $0x30] sm:$0xff]  ;;  %404 = vst.msk [vmem:[#allocation2 + $0x49] sm:$0xff] %vm277_vm0, %v355_v17  ;;  %568 = vrot.lane.b32.xlu1 %v5361_v18, %s5173_s18 }
  0xae   : > { %468 = vst.msk [vmem:[#allocation3 + $0x20] sm:$0xff] %vm277_vm0, %v5363_v19 }
  0xb0   : > { %v356_v20 = vpop.trf.xlu0  ;;  %v5370_v21 = vld [vmem:[#allocation2 + $0x39] sm:$0xff] }
  0xb1   : > { %v5372_v22 = vld [vmem:[#allocation2 + $0x38] sm:$0xff]  ;;  %405 = vst.msk [vmem:[#allocation2 + $0x51] sm:$0xff] %vm277_vm0, %v356_v20  ;;  %570 = vrot.lane.b32.xlu1 %v5370_v21, %s5173_s18 }
  0xb2   : > { %469 = vst.msk [vmem:[#allocation3 + $0x28] sm:$0xff] %vm277_vm0, %v5372_v22 }
  0xb4   : > { %v357_v23 = vpop.trf.xlu0  ;;  %v5379_v24 = vld [vmem:[#allocation2 + $0x49] sm:$0xff] }
  0xb5   : > { %v5381_v25 = vld [vmem:[#allocation2 + $0x48] sm:$0xff]  ;;  %406 = vst.msk [vmem:[#allocation2 + $0x61] sm:$0xff] %vm277_vm0, %v357_v23  ;;  %572 = vrot.lane.b32.xlu1 %v5379_v24, %s5173_s18 }
  0xb6   : > { %470 = vst.msk [vmem:[#allocation3 + $0x30] sm:$0xff] %vm277_vm0, %v5381_v25 }
  0xb8   : > { %v358_v26 = vpop.trf.xlu0  ;;  %v5388_v27 = vld [vmem:[#allocation2 + $0x51] sm:$0xff] }
  0xb9   : > { %v5390_v28 = vld [vmem:[#allocation2 + $0x50] sm:$0xff]  ;;  %407 = vst.msk [vmem:[#allocation2 + $0x69] sm:$0xff] %vm277_vm0, %v358_v26  ;;  %574 = vrot.lane.b32.xlu1 %v5388_v27, %s5173_s18 }
  0xba   : > { %471 = vst.msk [vmem:[#allocation3 + $0x38] sm:$0xff] %vm277_vm0, %v5390_v28 }
  0xbc   : > { %v359_v29 = vpop.trf.xlu0  ;;  %v5397_v30 = vld [vmem:[#allocation2 + $0x61] sm:$0xff] }
  0xbd   : > { %v5399_v31 = vld [vmem:[#allocation2 + $0x60] sm:$0xff]  ;;  %408 = vst.msk [vmem:[#allocation2 + $0x79] sm:$0xff] %vm277_vm0, %v359_v29  ;;  %576 = vrot.lane.b32.xlu1 %v5397_v30, %s5173_s18 }
  0xbe   : > { %472 = vst.msk [vmem:[#allocation3 + $0x40] sm:$0xff] %vm277_vm0, %v5399_v31 }
  0xc0   : > { %v360_v32 = vpop.trf.xlu0  ;;  %v5406_v33 = vld [vmem:[#allocation2 + $0x69] sm:$0xff] }
  0xc1   : > { %v5408_v34 = vld [vmem:[#allocation2 + $0x68] sm:$0xff]  ;;  %409 = vst.msk [vmem:[#allocation2 + $0x81] sm:$0xff] %vm277_vm0, %v360_v32  ;;  %578 = vrot.lane.b32.xlu1 %v5406_v33, %s5173_s18 }
  0xc2   : > { %473 = vst.msk [vmem:[#allocation3 + $0x48] sm:$0xff] %vm277_vm0, %v5408_v34 }
  0xc4   : > { %v361_v35 = vpop.trf.xlu0  ;;  %v5415_v36 = vld [vmem:[#allocation2 + $0x79] sm:$0xff] }
  0xc5   : > { %v5417_v37 = vld [vmem:[#allocation2 + $0x78] sm:$0xff]  ;;  %410 = vst.msk [vmem:[#allocation2 + $0x91] sm:$0xff] %vm277_vm0, %v361_v35  ;;  %580 = vrot.lane.b32.xlu1 %v5415_v36, %s5173_s18 }
  0xc6   : > { %474 = vst.msk [vmem:[#allocation3 + $0x50] sm:$0xff] %vm277_vm0, %v5417_v37 }
  0xc8   : > { %v362_v38 = vpop.trf.xlu0  ;;  %v5424_v39 = vld [vmem:[#allocation2 + $0x81] sm:$0xff] }
  0xc9   : > { %v5426_v40 = vld [vmem:[#allocation2 + $0x80] sm:$0xff]  ;;  %411 = vst.msk [vmem:[#allocation2 + $0x99] sm:$0xff] %vm277_vm0, %v362_v38  ;;  %582 = vrot.lane.b32.xlu1 %v5424_v39, %s5173_s18 }
  0xca   : > { %475 = vst.msk [vmem:[#allocation3 + $0x58] sm:$0xff] %vm277_vm0, %v5426_v40  ;;  %v5487_v60 = vld [vmem:[#allocation2 + $0x82] sm:$0xff] }
  0xcc   : > { %v363_v41 = vpop.trf.xlu0  ;;  %v5433_v42 = vld [vmem:[#allocation2 + $0x91] sm:$0xff] }
  0xcd   : > { %v5435_v43 = vld [vmem:[#allocation2 + $0x90] sm:$0xff]  ;;  %412 = vst.msk [vmem:[#allocation2 + $0xa9] sm:$0xff] %vm277_vm0, %v363_v41  ;;  %584 = vrot.lane.b32.xlu1 %v5433_v42, %s5173_s18 }
  0xce   : > { %476 = vst.msk [vmem:[#allocation3 + $0x60] sm:$0xff] %vm277_vm0, %v5435_v43 }
  0xd0   : > { %v364_v44 = vpop.trf.xlu0  ;;  %v5442_v45 = vld [vmem:[#allocation2 + $0x99] sm:$0xff] }
  0xd1   : > { %v5444_v46 = vld [vmem:[#allocation2 + $0x98] sm:$0xff]  ;;  %413 = vst.msk [vmem:[#allocation2 + $0xb1] sm:$0xff] %vm277_vm0, %v364_v44  ;;  %586 = vrot.lane.b32.xlu1 %v5442_v45, %s5173_s18 }
  0xd2   : > { %477 = vst.msk [vmem:[#allocation3 + $0x68] sm:$0xff] %vm277_vm0, %v5444_v46  ;;  %v5500_v0 = vld [vmem:[#allocation2 + $0x9a] sm:$0xff] }
  0xd4   : > { %v365_v47 = vpop.trf.xlu0  ;;  %v5451_v48 = vld [vmem:[#allocation2 + $0xa9] sm:$0xff] }
  0xd5   : > { %7494 = vst [vmem:[#allocation7_spill] sm:$0xff] %v5451_v48  ;;  %v5453_v49 = vld [vmem:[#allocation2 + $0xa8] sm:$0xff]  ;;  %414 = vst.msk [vmem:[#allocation2 + $0xc1] sm:$0xff] %vm277_vm0, %v365_v47  ;;  %588 = vrot.lane.b32.xlu1 %v5451_v48, %s5173_s18  ;;  %v5667_v48 = vld [vmem:[#allocation2 + $0x1a] sm:$0xff] }
  0xd6   : > { %478 = vst.msk [vmem:[#allocation3 + $0x70] sm:$0xff] %vm277_vm0, %v5453_v49  ;;  %7514 = vst [vmem:[#allocation27_spill] sm:$0xff] %v5667_v48 }
  0xd8   : > { %v366_v50 = vpop.trf.xlu0  ;;  %v5460_v51 = vld [vmem:[#allocation2 + $0xb1] sm:$0xff] }
  0xd9   : > { %v5462_v52 = vld [vmem:[#allocation2 + $0xb0] sm:$0xff]  ;;  %415 = vst.msk [vmem:[#allocation2 + $0xc9] sm:$0xff] %vm277_vm0, %v366_v50  ;;  %590 = vrot.lane.b32.xlu1 %v5460_v51, %s5173_s18 }
  0xda   : > { %479 = vst.msk [vmem:[#allocation3 + $0x78] sm:$0xff] %vm277_vm0, %v5462_v52  ;;  %v5513_v4 = vld [vmem:[#allocation2 + $0xb2] sm:$0xff] }
  0xdc   : > { %v383_v53 = vpop.trf.xlu0  ;;  %v5469_v54 = vld [vmem:[#allocation2 + $0xc1] sm:$0xff] }
  0xdd   : > { %7495 = vst [vmem:[#allocation8_spill] sm:$0xff] %v5469_v54  ;;  %v5471_v55 = vld [vmem:[#allocation2 + $0xc0] sm:$0xff]  ;;  %416 = vst.msk [vmem:[#allocation2 + $0xd9] sm:$0xff] %vm277_vm0, %v383_v53  ;;  %592 = vrot.lane.b32.xlu1 %v5469_v54, %s5173_s18 }
  0xde   : > { %480 = vst.msk [vmem:[#allocation3 + $0x80] sm:$0xff] %vm277_vm0, %v5471_v55 }
  0xe0   : > { %v384_v56 = vpop.trf.xlu0  ;;  %v5478_v57 = vld [vmem:[#allocation2 + $0xc9] sm:$0xff] }
  0xe1   : > { %v5480_v58 = vld [vmem:[#allocation2 + $0xc8] sm:$0xff]  ;;  %417 = vst.msk [vmem:[#allocation2 + $0xe1] sm:$0xff] %vm277_vm0, %v384_v56  ;;  %594 = vrot.lane.b32.xlu0 %v5478_v57, %s5173_s18 }
  0xe2   : > { %7496 = vst [vmem:[#allocation9_spill] sm:$0xff] %v5480_v58  ;;  %481 = vst.msk [vmem:[#allocation3 + $0x88] sm:$0xff] %vm277_vm0, %v5480_v58  ;;  %v5526_v8 = vld [vmem:[#allocation2 + $0xca] sm:$0xff] }
  0xe4   : > { %v385_v59 = vpop.trf.xlu0  ;;  %v5489_v61 = vld [vmem:[#allocation2 + $0xd9] sm:$0xff] }
  0xe5   : > { %7497 = vst [vmem:[#allocation10_spill] sm:$0xff] %v5489_v61  ;;  %v5491_v62 = vld [vmem:[#allocation2 + $0xd8] sm:$0xff]  ;;  %418 = vst.msk [vmem:[#allocation2 + $0xf1] sm:$0xff] %vm277_vm0, %v385_v59  ;;  %775 = vrot.lane.b32.xlu0 %v5487_v60, %s5174_s19  ;;  %596 = vrot.lane.b32.xlu1 %v5489_v61, %s5173_s18 }
  0xe6   : > { %482 = vst.msk [vmem:[#allocation3 + $0x90] sm:$0xff] %vm277_vm0, %v5491_v62 }
  0xe8   : > { %v386_v63 = vpop.trf.xlu0  ;;  %v5502_v1 = vld [vmem:[#allocation2 + $0xe1] sm:$0xff] }
  0xe9   : > { %v5504_v2 = vld [vmem:[#allocation2 + $0xe0] sm:$0xff]  ;;  %419 = vst.msk [vmem:[#allocation2 + $0xf9] sm:$0xff] %vm277_vm0, %v386_v63  ;;  %779 = vrot.lane.b32.xlu0 %v5500_v0, %s5174_s19  ;;  %598 = vrot.lane.b32.xlu1 %v5502_v1, %s5173_s18 }
  0xea   : > { %483 = vst.msk [vmem:[#allocation3 + $0x98] sm:$0xff] %vm277_vm0, %v5504_v2  ;;  %v5539_v14 = vld [vmem:[#allocation2 + $0xe2] sm:$0xff] }
  0xec   : > { %v387_v3 = vpop.trf.xlu0  ;;  %v5515_v5 = vld [vmem:[#allocation2 + $0xf1] sm:$0xff] }
  0xed   : > { %7498 = vst [vmem:[#allocation11_spill] sm:$0xff] %v5515_v5  ;;  %v5517_v6 = vld [vmem:[#allocation2 + $0xf0] sm:$0xff]  ;;  %420 = vst.msk [vmem:[#allocation2 + $0x109] sm:$0xff] %vm277_vm0, %v387_v3  ;;  %783 = vrot.lane.b32.xlu0 %v5513_v4, %s5174_s19  ;;  %600 = vrot.lane.b32.xlu1 %v5515_v5, %s5173_s18 }
  0xee   : > { %484 = vst.msk [vmem:[#allocation3 + $0xa0] sm:$0xff] %vm277_vm0, %v5517_v6 }
  0xf0   : > { %v388_v7 = vpop.trf.xlu0  ;;  %v5528_v9 = vld [vmem:[#allocation2 + $0xf9] sm:$0xff] }
  0xf1   : > { %v5530_v10 = vld [vmem:[#allocation2 + $0xf8] sm:$0xff]  ;;  %421 = vst.msk [vmem:[#allocation2 + $0x111] sm:$0xff] %vm277_vm0, %v388_v7  ;;  %787 = vrot.lane.b32.xlu0 %v5526_v8, %s5174_s19  ;;  %602 = vrot.lane.b32.xlu1 %v5528_v9, %s5173_s18 }
  0xf2   : > { %7499 = vst [vmem:[#allocation12_spill] sm:$0xff] %v5530_v10  ;;  %485 = vst.msk [vmem:[#allocation3 + $0xa8] sm:$0xff] %vm277_vm0, %v5530_v10  ;;  %v5552_v26 = vld [vmem:[#allocation2 + $0xfa] sm:$0xff] }
  0xf4   : > { %v389_v11 = vpop.trf.xlu0  ;;  %v5541_v17 = vld [vmem:[#allocation2 + $0x109] sm:$0xff] }
  0xf5   : > { %7500 = vst [vmem:[#allocation13_spill] sm:$0xff] %v5541_v17  ;;  %v5543_v20 = vld [vmem:[#allocation2 + $0x108] sm:$0xff]  ;;  %422 = vst.msk [vmem:[#allocation2 + $0x121] sm:$0xff] %vm277_vm0, %v389_v11  ;;  %791 = vrot.lane.b32.xlu0 %v5539_v14, %s5174_s19  ;;  %604 = vrot.lane.b32.xlu1 %v5541_v17, %s5173_s18 }
  0xf6   : > { %486 = vst.msk [vmem:[#allocation3 + $0xb0] sm:$0xff] %vm277_vm0, %v5543_v20 }
  0xf8   : > { %v390_v23 = vpop.trf.xlu0  ;;  %v5554_v29 = vld [vmem:[#allocation2 + $0x111] sm:$0xff] }
  0xf9   : > { %v5556_v32 = vld [vmem:[#allocation2 + $0x110] sm:$0xff]  ;;  %423 = vst.msk [vmem:[#allocation2 + $0x129] sm:$0xff] %vm277_vm0, %v390_v23  ;;  %795 = vrot.lane.b32.xlu0 %v5552_v26, %s5174_s19  ;;  %606 = vrot.lane.b32.xlu1 %v5554_v29, %s5173_s18 }
  0xfa   : > { %7501 = vst [vmem:[#allocation14_spill] sm:$0xff] %v5556_v32  ;;  %487 = vst.msk [vmem:[#allocation3 + $0xb8] sm:$0xff] %vm277_vm0, %v5556_v32  ;;  %v5565_v38 = vld [vmem:[#allocation2 + $0x112] sm:$0xff] }
  0xfc   : > { %v391_v35 = vpop.trf.xlu0  ;;  %v5567_v41 = vld [vmem:[#allocation2 + $0x121] sm:$0xff] }
  0xfd   : > { %7502 = vst [vmem:[#allocation15_spill] sm:$0xff] %v5567_v41  ;;  %v5569_v44 = vld [vmem:[#allocation2 + $0x120] sm:$0xff]  ;;  %424 = vst.msk [vmem:[#allocation2 + $0x139] sm:$0xff] %vm277_vm0, %v391_v35  ;;  %799 = vrot.lane.b32.xlu0 %v5565_v38, %s5174_s19  ;;  %608 = vrot.lane.b32.xlu1 %v5567_v41, %s5173_s18 }
  0xfe   : > { %488 = vst.msk [vmem:[#allocation3 + $0xc0] sm:$0xff] %vm277_vm0, %v5569_v44 }
 0x100   : > { %v392_v47 = vpop.trf.xlu0  ;;  %v5578_v50 = vld [vmem:[#allocation2 + $0x12a] sm:$0xff] }
 0x101   : > { %7503 = vst [vmem:[#allocation16_spill] sm:$0xff] %v5578_v50  ;;  %v5580_v53 = vld [vmem:[#allocation2 + $0x129] sm:$0xff]  ;;  %425 = vst.msk [vmem:[#allocation2 + $0x141] sm:$0xff] %vm277_vm0, %v392_v47  ;;  %803 = vrot.lane.b32.xlu0 %v5578_v50, %s5174_s19 }
 0x102   : > { %v5582_v56 = vld [vmem:[#allocation2 + $0x128] sm:$0xff]  ;;  %610 = vrot.lane.b32.xlu1 %v5580_v53, %s5173_s18 }
 0x103   : > { %7504 = vst [vmem:[#allocation17_spill] sm:$0xff] %v5582_v56  ;;  %489 = vst.msk [vmem:[#allocation3 + $0xc8] sm:$0xff] %vm277_vm0, %v5582_v56 }
 0x104   : > { %v393_v59 = vpop.trf.xlu0  ;;  %v5591_v63 = vld [vmem:[#allocation2 + $0x139] sm:$0xff] }
 0x105   : > { %7505 = vst [vmem:[#allocation18_spill] sm:$0xff] %v5591_v63  ;;  %v5593_v3 = vld [vmem:[#allocation2 + $0x138] sm:$0xff]  ;;  %426 = vst.msk [vmem:[#allocation2 + $0x151] sm:$0xff] %vm277_vm0, %v393_v59 }
 0x106   : > { %612 = vrot.lane.b32.xlu1 %v5591_v63, %s5173_s18  ;;  %490 = vst.msk [vmem:[#allocation3 + $0xd0] sm:$0xff] %vm277_vm0, %v5593_v3 }
 0x108   : > { %v394_v7 = vpop.trf.xlu0  ;;  %v5600_v11 = vld [vmem:[#allocation2 + $0x142] sm:$0xff] }
 0x109   : > { %7506 = vst [vmem:[#allocation19_spill] sm:$0xff] %v5600_v11  ;;  %v5602_v23 = vld [vmem:[#allocation2 + $0x141] sm:$0xff]  ;;  %427 = vst.msk [vmem:[#allocation2 + $0x159] sm:$0xff] %vm277_vm0, %v394_v7  ;;  %807 = vrot.lane.b32.xlu0 %v5600_v11, %s5174_s19 }
 0x10a   : > { %v5604_v35 = vld [vmem:[#allocation2 + $0x140] sm:$0xff]  ;;  %614 = vrot.lane.b32.xlu1 %v5602_v23, %s5173_s18 }
 0x10b   : > { %7507 = vst [vmem:[#allocation20_spill] sm:$0xff] %v5604_v35  ;;  %491 = vst.msk [vmem:[#allocation3 + $0xd8] sm:$0xff] %vm277_vm0, %v5604_v35 }
 0x10c   : > { %v395_v47 = vpop.trf.xlu0  ;;  %v5613_v59 = vld [vmem:[#allocation2 + $0x151] sm:$0xff] }
 0x10d   : > { %7508 = vst [vmem:[#allocation21_spill] sm:$0xff] %v5613_v59  ;;  %v5615_v63 = vld [vmem:[#allocation2 + $0x150] sm:$0xff]  ;;  %428 = vst.msk [vmem:[#allocation2 + $0x169] sm:$0xff] %vm277_vm0, %v395_v47 }
 0x10e   : > { %616 = vrot.lane.b32.xlu1 %v5613_v59, %s5173_s18  ;;  %492 = vst.msk [vmem:[#allocation3 + $0xe0] sm:$0xff] %vm277_vm0, %v5615_v63 }
 0x110   : > { %v396_v7 = vpop.trf.xlu0  ;;  %v5622_v41 = vld [vmem:[#allocation2 + $0x15a] sm:$0xff] }
 0x111   : > { %7509 = vst [vmem:[#allocation22_spill] sm:$0xff] %v5622_v41  ;;  %v5624_v17 = vld [vmem:[#allocation2 + $0x159] sm:$0xff]  ;;  %429 = vst.msk [vmem:[#allocation2 + $0x171] sm:$0xff] %vm277_vm0, %v396_v7  ;;  %811 = vrot.lane.b32.xlu0 %v5622_v41, %s5174_s19 }
 0x112   : > { %v5626_v5 = vld [vmem:[#allocation2 + $0x158] sm:$0xff]  ;;  %618 = vrot.lane.b32.xlu1 %v5624_v17, %s5173_s18 }
 0x113   : > { %7510 = vst [vmem:[#allocation23_spill] sm:$0xff] %v5626_v5  ;;  %493 = vst.msk [vmem:[#allocation3 + $0xe8] sm:$0xff] %vm277_vm0, %v5626_v5 }
 0x114   : > { %v5635_v47 = vld [vmem:[#allocation2 + $0x169] sm:$0xff]  ;;  %v397_v59 = vpop.trf.xlu0 }
 0x115   : > { %7511 = vst [vmem:[#allocation24_spill] sm:$0xff] %v5635_v47  ;;  %v5637_v61 = vld [vmem:[#allocation2 + $0x168] sm:$0xff]  ;;  %430 = vst.msk [vmem:[#allocation2 + $0x181] sm:$0xff] %vm277_vm0, %v397_v59 }
 0x116   : > { %620 = vrot.lane.b32.xlu1 %v5635_v47, %s5173_s18  ;;  %494 = vst.msk [vmem:[#allocation3 + $0xf0] sm:$0xff] %vm277_vm0, %v5637_v61  ;;  %v689_v59 = vld [vmem:[#allocation2 + $0x2] sm:$0xff]  ;;  %v690_v47 = vld [vmem:[#allocation2 + $0xa] sm:$0xff] }
 0x117   : > { %v565_v7 = vpop.permute.xlu1 %564 }
 0x118   : > { %659 = vst.msk [vmem:[#allocation3 + $0x10] sm:$0xff] %vm656_vm2, %v565_v7  ;;  %v5645_v41 = vld [vmem:[#allocation2 + $0x172] sm:$0xff]  ;;  %v398_v54 = vpop.trf.xlu0 }
 0x119   : > { %7512 = vst [vmem:[#allocation25_spill] sm:$0xff] %v5645_v41  ;;  %v5647_v11 = vld [vmem:[#allocation2 + $0x171] sm:$0xff]  ;;  %815 = vrot.lane.b32.xlu0 %v5645_v41, %s5174_s19  ;;  %431 = vst.msk [vmem:[#allocation2 + $0x189] sm:$0xff] %vm277_vm0, %v398_v54 }
 0x11a   : > { %v5649_v50 = vld [vmem:[#allocation2 + $0x170] sm:$0xff]  ;;  %622 = vrot.lane.b32.xlu1 %v5647_v11, %s5173_s18 }
 0x11b   : > { %7513 = vst [vmem:[#allocation26_spill] sm:$0xff] %v5649_v50  ;;  %495 = vst.msk [vmem:[#allocation3 + $0xf8] sm:$0xff] %vm277_vm0, %v5649_v50  ;;  %v567_v7 = vpop.permute.xlu1 %566 }
 0x11c   : > { %660 = vst.msk [vmem:[#allocation3 + $0x18] sm:$0xff] %vm656_vm2, %v567_v7 }
 0x11d   : > { %948 = vrot.lane.b32.xlu0 %v5354_v16, %s5175_s20 }
 0x11e   : > { %753 = vrot.lane.b32.xlu1 %v689_v59, %s5174_s19  ;;  %v5681_v59 = vld [vmem:[#allocation2 + $0x32] sm:$0xff] }
 0x11f   : > { %v569_v41 = vpop.permute.xlu1 %568  ;;  %7515 = vst [vmem:[#allocation28_spill] sm:$0xff] %v5681_v59 }
 0x120   : > { %661 = vst.msk [vmem:[#allocation3 + $0x20] sm:$0xff] %vm656_vm2, %v569_v41  ;;  %v5674_v41 = vld [vmem:[#allocation2 + $0x22] sm:$0xff] }
 0x121   : > { %952 = vrot.lane.b32.xlu0 %v5372_v22, %s5175_s20 }
 0x122   : > { %755 = vrot.lane.b32.xlu1 %v690_v47, %s5174_s19 }
 0x123   : > { %v571_v54 = vpop.permute.xlu1 %570 }
 0x124   : > { %662 = vst.msk [vmem:[#allocation3 + $0x28] sm:$0xff] %vm656_vm2, %v571_v54  ;;  %v5688_v54 = vld [vmem:[#allocation2 + $0x3a] sm:$0xff] }
 0x125   : > { %956 = vrot.lane.b32.xlu0 %v5390_v28, %s5175_s20 }
 0x126   : > { %757 = vrot.lane.b32.xlu1 %v5667_v48, %s5174_s19  ;;  %v5709_v48 = vld [vmem:[#allocation2 + $0x62] sm:$0xff] }
 0x127   : > { %v573_v16 = vpop.permute.xlu1 %572  ;;  %7517 = vst [vmem:[#allocation30_spill] sm:$0xff] %v5709_v48 }
 0x128   : > { %663 = vst.msk [vmem:[#allocation3 + $0x30] sm:$0xff] %vm656_vm2, %v573_v16 }
 0x129   : > { %960 = vrot.lane.b32.xlu0 %v5408_v34, %s5175_s20 }
 0x12a   : > { %759 = vrot.lane.b32.xlu1 %v5674_v41, %s5174_s19 }
 0x12b   : > { %v575_v47 = vpop.permute.xlu1 %574 }
 0x12c   : > { %664 = vst.msk [vmem:[#allocation3 + $0x38] sm:$0xff] %vm656_vm2, %v575_v47  ;;  %v5695_v47 = vld [vmem:[#allocation2 + $0x4a] sm:$0xff] }
 0x12d   : > { %964 = vrot.lane.b32.xlu0 %v5426_v40, %s5175_s20  ;;  %7516 = vst [vmem:[#allocation29_spill] sm:$0xff] %v5695_v47 }
 0x12e   : > { %761 = vrot.lane.b32.xlu1 %v5681_v59, %s5174_s19  ;;  %v5702_v59 = vld [vmem:[#allocation2 + $0x52] sm:$0xff] }
 0x12f   : > { %v577_v7 = vpop.permute.xlu1 %576 }
 0x130   : > { %665 = vst.msk [vmem:[#allocation3 + $0x40] sm:$0xff] %vm656_vm2, %v577_v7 }
 0x131   : > { %968 = vrot.lane.b32.xlu0 %v5444_v46, %s5175_s20 }
 0x132   : > { %763 = vrot.lane.b32.xlu1 %v5688_v54, %s5174_s19 }
 0x133   : > { %v579_v16 = vpop.permute.xlu1 %578 }
 0x134   : > { %666 = vst.msk [vmem:[#allocation3 + $0x48] sm:$0xff] %vm656_vm2, %v579_v16 }
 0x135   : > { %972 = vrot.lane.b32.xlu0 %v5462_v52, %s5175_s20 }
 0x136   : > { %765 = vrot.lane.b32.xlu1 %v5695_v47, %s5174_s19  ;;  %v5716_v47 = vld [vmem:[#allocation2 + $0x6a] sm:$0xff] }
 0x137   : > { %v581_v7 = vpop.permute.xlu1 %580 }
 0x138   : > { %667 = vst.msk [vmem:[#allocation3 + $0x50] sm:$0xff] %vm656_vm2, %v581_v7 }
 0x139   : > { %976 = vrot.lane.b32.xlu0 %v5480_v58, %s5175_s20  ;;  %v5723_v58 = vld [vmem:[#allocation2 + $0x7a] sm:$0xff] }
 0x13a   : > { %767 = vrot.lane.b32.xlu1 %v5702_v59, %s5174_s19 }
 0x13b   : > { %v583_v16 = vpop.permute.xlu1 %582 }
 0x13c   : > { %668 = vst.msk [vmem:[#allocation3 + $0x58] sm:$0xff] %vm656_vm2, %v583_v16 }
 0x13d   : > { %980 = vrot.lane.b32.xlu0 %v5504_v2, %s5175_s20 }
 0x13e   : > { %769 = vrot.lane.b32.xlu1 %v5709_v48, %s5174_s19  ;;  %v5730_v48 = vld [vmem:[#allocation2 + $0x92] sm:$0xff] }
 0x13f   : > { %v585_v7 = vpop.permute.xlu1 %584 }
 0x140   : > { %669 = vst.msk [vmem:[#allocation3 + $0x60] sm:$0xff] %vm656_vm2, %v585_v7 }
 0x141   : > { %984 = vrot.lane.b32.xlu0 %v5530_v10, %s5175_s20  ;;  %v5737_v10 = vld [vmem:[#allocation2 + $0xaa] sm:$0xff] }
 0x142   : > { %771 = vrot.lane.b32.xlu1 %v5716_v47, %s5174_s19  ;;  %7518 = vst [vmem:[#allocation31_spill] sm:$0xff] %v5737_v10 }
 0x143   : > { %v587_v16 = vpop.permute.xlu1 %586 }
 0x144   : > { %670 = vst.msk [vmem:[#allocation3 + $0x68] sm:$0xff] %vm656_vm2, %v587_v16 }
 0x145   : > { %988 = vrot.lane.b32.xlu0 %v5556_v32, %s5175_s20  ;;  %v5744_v32 = vld [vmem:[#allocation2 + $0xc2] sm:$0xff] }
 0x146   : > { %773 = vrot.lane.b32.xlu1 %v5723_v58, %s5174_s19 }
 0x147   : > { %v589_v7 = vpop.permute.xlu1 %588 }
 0x148   : > { %671 = vst.msk [vmem:[#allocation3 + $0x70] sm:$0xff] %vm656_vm2, %v589_v7 }
 0x149   : > { %992 = vrot.lane.b32.xlu0 %v5582_v56, %s5175_s20  ;;  %v5751_v56 = vld [vmem:[#allocation2 + $0xda] sm:$0xff] }
 0x14a   : > { %777 = vrot.lane.b32.xlu1 %v5730_v48, %s5174_s19  ;;  %7519 = vst [vmem:[#allocation32_spill] sm:$0xff] %v5751_v56 }
 0x14b   : > { %v591_v16 = vpop.permute.xlu1 %590 }
 0x14c   : > { %672 = vst.msk [vmem:[#allocation3 + $0x78] sm:$0xff] %vm656_vm2, %v591_v16 }
 0x14d   : > { %996 = vrot.lane.b32.xlu0 %v5604_v35, %s5175_s20 }
 0x14e   : > { %781 = vrot.lane.b32.xlu1 %v5737_v10, %s5174_s19 }
 0x14f   : > { %v593_v7 = vpop.permute.xlu1 %592 }
 0x150   : > { %673 = vst.msk [vmem:[#allocation3 + $0x80] sm:$0xff] %vm656_vm2, %v593_v7  ;;  %v5757_v7 = vld [vmem:[#allocation2 + $0x188] sm:$0xff] }
 0x151   : > { %1000 = vrot.lane.b32.xlu0 %v5626_v5, %s5175_s20  ;;  %7520 = vst [vmem:[#allocation33_spill] sm:$0xff] %v5757_v7  ;;  %v5761_v5 = vld [vmem:[#allocation2 + $0xf2] sm:$0xff] }
 0x152   : > { %785 = vrot.lane.b32.xlu1 %v5744_v32, %s5174_s19 }
 0x153   : > { %v595_v16 = vpop.permute.xlu0 %594 }
 0x154   : > { %674 = vst.msk [vmem:[#allocation3 + $0x88] sm:$0xff] %vm656_vm2, %v595_v16 }
 0x155   : > { %1004 = vrot.lane.b32.xlu0 %v5649_v50, %s5175_s20 }
 0x156   : > { %789 = vrot.lane.b32.xlu1 %v5751_v56, %s5174_s19  ;;  %v5769_v56 = vld [vmem:[#allocation2 + $0x10a] sm:$0xff] }
 0x157   : > { %v597_v35 = vpop.permute.xlu1 %596  ;;  %v776_v10 = vpop.permute.xlu0 %775 }
 0x158   : > { %675 = vst.msk [vmem:[#allocation3 + $0x90] sm:$0xff] %vm656_vm2, %v597_v35 }
 0x159   : > { %861 = vst.msk [vmem:[#allocation3 + $0x58] sm:$0xff] %vm849_vm3, %v776_v10  ;;  %1008 = vrot.lane.b32.xlu0 %v5757_v7, %s5175_s20  ;;  %v5777_v7 = vld [vmem:[#allocation2 + $0x122] sm:$0xff] }
 0x15a   : > { %793 = vrot.lane.b32.xlu1 %v5761_v5, %s5174_s19 }
 0x15b   : > { %v599_v16 = vpop.permute.xlu1 %598  ;;  %v780_v50 = vpop.permute.xlu0 %779 }
 0x15c   : > { %676 = vst.msk [vmem:[#allocation3 + $0x98] sm:$0xff] %vm656_vm2, %v599_v16 }
 0x15d   : > { %863 = vst.msk [vmem:[#allocation3 + $0x68] sm:$0xff] %vm849_vm3, %v780_v50  ;;  %1141 = vrot.lane.b32.xlu0 %v5352_v15, %s5176_s21  ;;  %v5785_v15 = vld [vmem:[#allocation2 + $0x13a] sm:$0xff] }
 0x15e   : > { %797 = vrot.lane.b32.xlu1 %v5769_v56, %s5174_s19 }
 0x15f   : > { %v601_v10 = vpop.permute.xlu1 %600  ;;  %v784_v35 = vpop.permute.xlu0 %783 }
 0x160   : > { %677 = vst.msk [vmem:[#allocation3 + $0xa0] sm:$0xff] %vm656_vm2, %v601_v10 }
 0x161   : > { %865 = vst.msk [vmem:[#allocation3 + $0x78] sm:$0xff] %vm849_vm3, %v784_v35  ;;  %1145 = vrot.lane.b32.xlu0 %v5370_v21, %s5176_s21  ;;  %v5793_v21 = vld [vmem:[#allocation2 + $0x152] sm:$0xff] }
 0x162   : > { %801 = vrot.lane.b32.xlu1 %v5777_v7, %s5174_s19 }
 0x163   : > { %v603_v50 = vpop.permute.xlu1 %602  ;;  %v788_v16 = vpop.permute.xlu0 %787 }
 0x164   : > { %678 = vst.msk [vmem:[#allocation3 + $0xa8] sm:$0xff] %vm656_vm2, %v603_v50 }
 0x165   : > { %867 = vst.msk [vmem:[#allocation3 + $0x88] sm:$0xff] %vm849_vm3, %v788_v16  ;;  %1149 = vrot.lane.b32.xlu0 %v5388_v27, %s5176_s21  ;;  %v5801_v27 = vld [vmem:[#allocation2 + $0x16a] sm:$0xff] }
 0x166   : > { %805 = vrot.lane.b32.xlu1 %v5785_v15, %s5174_s19 }
 0x167   : > { %v605_v10 = vpop.permute.xlu1 %604  ;;  %v792_v35 = vpop.permute.xlu0 %791 }
 0x168   : > { %679 = vst.msk [vmem:[#allocation3 + $0xb0] sm:$0xff] %vm656_vm2, %v605_v10 }
 0x169   : > { %869 = vst.msk [vmem:[#allocation3 + $0x98] sm:$0xff] %vm849_vm3, %v792_v35  ;;  %1153 = vrot.lane.b32.xlu0 %v5406_v33, %s5176_s21 }
 0x16a   : > { %809 = vrot.lane.b32.xlu1 %v5793_v21, %s5174_s19 }
 0x16b   : > { %v607_v50 = vpop.permute.xlu1 %606  ;;  %v796_v16 = vpop.permute.xlu0 %795 }
 0x16c   : > { %680 = vst.msk [vmem:[#allocation3 + $0xb8] sm:$0xff] %vm656_vm2, %v607_v50 }
 0x16d   : > { %871 = vst.msk [vmem:[#allocation3 + $0xa8] sm:$0xff] %vm849_vm3, %v796_v16  ;;  %1157 = vrot.lane.b32.xlu0 %v5424_v39, %s5176_s21 }
 0x16e   : > { %813 = vrot.lane.b32.xlu1 %v5801_v27, %s5174_s19 }
 0x16f   : > { %v609_v10 = vpop.permute.xlu1 %608  ;;  %v800_v35 = vpop.permute.xlu0 %799 }
 0x170   : > { %681 = vst.msk [vmem:[#allocation3 + $0xc0] sm:$0xff] %vm656_vm2, %v609_v10 }
 0x171   : > { %873 = vst.msk [vmem:[#allocation3 + $0xb8] sm:$0xff] %vm849_vm3, %v800_v35  ;;  %1161 = vrot.lane.b32.xlu0 %v5442_v45, %s5176_s21 }
 0x172   : > { %946 = vrot.lane.b32.xlu1 %v5345_v13, %s5175_s20 }
 0x173   : > { %v804_v50 = vpop.permute.xlu0 %803 }
 0x174   : > { %v611_v33 = vpop.permute.xlu1 %610 }
 0x175   : > { %682 = vst.msk [vmem:[#allocation3 + $0xc8] sm:$0xff] %vm656_vm2, %v611_v33  ;;  %1165 = vrot.lane.b32.xlu0 %v5460_v51, %s5176_s21 }
 0x176   : > { %875 = vst.msk [vmem:[#allocation3 + $0xc8] sm:$0xff] %vm849_vm3, %v804_v50  ;;  %950 = vrot.lane.b32.xlu1 %v5363_v19, %s5175_s20  ;;  %v5896_v50 = vld [vmem:[#allocation2 + $0x180] sm:$0xff] }
 0x178   : > { %v613_v39 = vpop.permute.xlu1 %612 }
 0x179   : > { %683 = vst.msk [vmem:[#allocation3 + $0xd0] sm:$0xff] %vm656_vm2, %v613_v39  ;;  %1169 = vrot.lane.b32.xlu0 %v5478_v57, %s5176_s21 }
 0x17a   : > { %954 = vrot.lane.b32.xlu1 %v5381_v25, %s5175_s20 }
 0x17b   : > { %v808_v45 = vpop.permute.xlu0 %807 }
 0x17c   : > { %v615_v13 = vpop.permute.xlu1 %614 }
 0x17d   : > { %684 = vst.msk [vmem:[#allocation3 + $0xd8] sm:$0xff] %vm656_vm2, %v615_v13  ;;  %1173 = vrot.lane.b32.xlu0 %v5502_v1, %s5176_s21 }
 0x17e   : > { %877 = vst.msk [vmem:[#allocation3 + $0xd8] sm:$0xff] %vm849_vm3, %v808_v45  ;;  %958 = vrot.lane.b32.xlu1 %v5399_v31, %s5175_s20 }
 0x180   : > { %v617_v19 = vpop.permute.xlu1 %616 }
 0x181   : > { %685 = vst.msk [vmem:[#allocation3 + $0xe0] sm:$0xff] %vm656_vm2, %v617_v19  ;;  %1177 = vrot.lane.b32.xlu0 %v5528_v9, %s5176_s21 }
 0x182   : > { %962 = vrot.lane.b32.xlu1 %v5417_v37, %s5175_s20 }
 0x183   : > { %v812_v51 = vpop.permute.xlu0 %811 }
 0x184   : > { %v619_v25 = vpop.permute.xlu1 %618 }
 0x185   : > { %686 = vst.msk [vmem:[#allocation3 + $0xe8] sm:$0xff] %vm656_vm2, %v619_v25  ;;  %1181 = vrot.lane.b32.xlu0 %v5554_v29, %s5176_s21 }
 0x186   : > { %879 = vst.msk [vmem:[#allocation3 + $0xe8] sm:$0xff] %vm849_vm3, %v812_v51  ;;  %966 = vrot.lane.b32.xlu1 %v5435_v43, %s5175_s20 }
 0x188   : > { %v621_v31 = vpop.permute.xlu1 %620 }
 0x189   : > { %687 = vst.msk [vmem:[#allocation3 + $0xf0] sm:$0xff] %vm656_vm2, %v621_v31  ;;  %1185 = vrot.lane.b32.xlu0 %v5580_v53, %s5176_s21 }
 0x18a   : > { %970 = vrot.lane.b32.xlu1 %v5453_v49, %s5175_s20 }
 0x18b   : > { %v816_v57 = vpop.permute.xlu0 %815 }
 0x18c   : > { %v623_v37 = vpop.permute.xlu1 %622 }
 0x18d   : > { %688 = vst.msk [vmem:[#allocation3 + $0xf8] sm:$0xff] %vm656_vm2, %v623_v37  ;;  %1189 = vrot.lane.b32.xlu0 %v5602_v23, %s5176_s21  ;;  %v7525_v37 = vld [vmem:[#allocation10_spill] sm:$0xff] }
 0x18e   : > { %881 = vst.msk [vmem:[#allocation3 + $0xf8] sm:$0xff] %vm849_vm3, %v816_v57  ;;  %974 = vrot.lane.b32.xlu1 %v5471_v55, %s5175_s20  ;;  %v5863_v55 = vld [vmem:[#allocation2 + $0x189] sm:$0xff] }
 0x18f   : > { %v949_v1 = vpop.permute.xlu0 %948  ;;  %v7526_v57 = vld [vmem:[#allocation22_spill] sm:$0xff] }
 0x190   : > { %v754_v43 = vpop.permute.xlu1 %753 }
 0x191   : > { %850 = vst.msk [vmem:[#allocation3] sm:$0xff] %vm849_vm3, %v754_v43  ;;  %1193 = vrot.lane.b32.xlu0 %v5624_v17, %s5176_s21 }
 0x192   : > { %978 = vrot.lane.b32.xlu1 %v5491_v62, %s5175_s20 }
 0x193   : > { %v953_v9 = vpop.permute.xlu0 %952 }
 0x194   : > { %v756_v49 = vpop.permute.xlu1 %755 }
 0x195   : > { %851 = vst.msk [vmem:[#allocation3 + $0x8] sm:$0xff] %vm849_vm3, %v756_v49  ;;  %1197 = vrot.lane.b32.xlu0 %v5647_v11, %s5176_s21  ;;  %v7527_v49 = vld [vmem:[#allocation11_spill] sm:$0xff] }
 0x196   : > { %982 = vrot.lane.b32.xlu1 %v5517_v6, %s5175_s20  ;;  %1044 = vst.msk [vmem:[#allocation3 + $0x8] sm:$0xff] %vm1042_vm4, %v949_v1 }
 0x197   : > { %v957_v62 = vpop.permute.xlu0 %956 }
 0x198   : > { %v758_v29 = vpop.permute.xlu1 %757 }
 0x199   : > { %852 = vst.msk [vmem:[#allocation3 + $0x10] sm:$0xff] %vm849_vm3, %v758_v29  ;;  %1201 = vrot.lane.b32.xlu0 %v5863_v55, %s5176_s21 }
 0x19a   : > { %986 = vrot.lane.b32.xlu1 %v5543_v20, %s5175_s20 }
 0x19b   : > { %v961_v53 = vpop.permute.xlu0 %960 }
 0x19c   : > { %v760_v17 = vpop.permute.xlu1 %759 }
 0x19d   : > { %853 = vst.msk [vmem:[#allocation3 + $0x18] sm:$0xff] %vm849_vm3, %v760_v17  ;;  %1334 = vrot.lane.b32.xlu0 %v5674_v41, %s5177_s22  ;;  %v5966_v17 = vld [vmem:[#allocation2 + $0x18a] sm:$0xff] }
 0x19e   : > { %990 = vrot.lane.b32.xlu1 %v5569_v44, %s5175_s20  ;;  %1046 = vst.msk [vmem:[#allocation3 + $0x18] sm:$0xff] %vm1042_vm4, %v953_v9  ;;  %v7528_v9 = vld [vmem:[#allocation25_spill] sm:$0xff] }
 0x19f   : > { %v965_v23 = vpop.permute.xlu0 %964 }
 0x1a0   : > { %v762_v11 = vpop.permute.xlu1 %761 }
 0x1a1   : > { %854 = vst.msk [vmem:[#allocation3 + $0x20] sm:$0xff] %vm849_vm3, %v762_v11  ;;  %1338 = vrot.lane.b32.xlu0 %v5688_v54, %s5177_s22 }
 0x1a2   : > { %994 = vrot.lane.b32.xlu1 %v5593_v3, %s5175_s20 }
 0x1a3   : > { %v969_v10 = vpop.permute.xlu0 %968 }
 0x1a4   : > { %v764_v16 = vpop.permute.xlu1 %763  ;;  %1054 = vst.msk [vmem:[#allocation3 + $0x58] sm:$0xff] %vm1042_vm4, %v969_v10 }
 0x1a5   : > { %855 = vst.msk [vmem:[#allocation3 + $0x28] sm:$0xff] %vm849_vm3, %v764_v16  ;;  %1342 = vrot.lane.b32.xlu0 %v5702_v59, %s5177_s22  ;;  %v7530_v16 = vld [vmem:[#allocation15_spill] sm:$0xff] }
 0x1a6   : > { %1048 = vst.msk [vmem:[#allocation3 + $0x28] sm:$0xff] %vm1042_vm4, %v957_v62  ;;  %998 = vrot.lane.b32.xlu1 %v5615_v63, %s5175_s20 }
 0x1a7   : > { %v973_v35 = vpop.permute.xlu0 %972 }
 0x1a8   : > { %v766_v41 = vpop.permute.xlu1 %765  ;;  %1056 = vst.msk [vmem:[#allocation3 + $0x68] sm:$0xff] %vm1042_vm4, %v973_v35  ;;  %v7531_v35 = vld [vmem:[#allocation18_spill] sm:$0xff] }
 0x1a9   : > { %856 = vst.msk [vmem:[#allocation3 + $0x30] sm:$0xff] %vm849_vm3, %v766_v41  ;;  %1346 = vrot.lane.b32.xlu0 %v5716_v47, %s5177_s22 }
 0x1aa   : > { %1002 = vrot.lane.b32.xlu1 %v5637_v61, %s5175_s20 }
 0x1ab   : > { %v977_v33 = vpop.permute.xlu0 %976 }
 0x1ac   : > { %v768_v54 = vpop.permute.xlu1 %767  ;;  %1058 = vst.msk [vmem:[#allocation3 + $0x78] sm:$0xff] %vm1042_vm4, %v977_v33 }
 0x1ad   : > { %857 = vst.msk [vmem:[#allocation3 + $0x38] sm:$0xff] %vm849_vm3, %v768_v54  ;;  %1350 = vrot.lane.b32.xlu0 %v5487_v60, %s5177_s22 }
 0x1ae   : > { %1050 = vst.msk [vmem:[#allocation3 + $0x38] sm:$0xff] %vm1042_vm4, %v961_v53  ;;  %1006 = vrot.lane.b32.xlu1 %v5896_v50, %s5175_s20  ;;  %v7529_v53 = vld [vmem:[#allocation13_spill] sm:$0xff] }
 0x1af   : > { %v981_v39 = vpop.permute.xlu0 %980 }
 0x1b0   : > { %v770_v59 = vpop.permute.xlu1 %769  ;;  %1060 = vst.msk [vmem:[#allocation3 + $0x88] sm:$0xff] %vm1042_vm4, %v981_v39 }
 0x1b1   : > { %858 = vst.msk [vmem:[#allocation3 + $0x40] sm:$0xff] %vm849_vm3, %v770_v59  ;;  %1354 = vrot.lane.b32.xlu0 %v5500_v0, %s5177_s22 }
 0x1b2   : > { %1139 = vrot.lane.b32.xlu1 %v5343_v12, %s5176_s21 }
 0x1b3   : > { %v985_v13 = vpop.permute.xlu0 %984 }
 0x1b4   : > { %v772_v47 = vpop.permute.xlu1 %771  ;;  %1062 = vst.msk [vmem:[#allocation3 + $0x98] sm:$0xff] %vm1042_vm4, %v985_v13 }
 0x1b5   : > { %859 = vst.msk [vmem:[#allocation3 + $0x48] sm:$0xff] %vm849_vm3, %v772_v47  ;;  %1358 = vrot.lane.b32.xlu0 %v5513_v4, %s5177_s22 }
 0x1b6   : > { %1052 = vst.msk [vmem:[#allocation3 + $0x48] sm:$0xff] %vm1042_vm4, %v965_v23  ;;  %1143 = vrot.lane.b32.xlu1 %v5361_v18, %s5176_s21 }
 0x1b7   : > { %v989_v45 = vpop.permute.xlu0 %988 }
 0x1b8   : > { %v774_v60 = vpop.permute.xlu1 %773  ;;  %1064 = vst.msk [vmem:[#allocation3 + $0xa8] sm:$0xff] %vm1042_vm4, %v989_v45 }
 0x1b9   : > { %860 = vst.msk [vmem:[#allocation3 + $0x50] sm:$0xff] %vm849_vm3, %v774_v60  ;;  %1362 = vrot.lane.b32.xlu0 %v5526_v8, %s5177_s22  ;;  %v5998_v60 = vld [vmem:[#allocation2 + $0x181] sm:$0xff] }
 0x1ba   : > { %1147 = vrot.lane.b32.xlu1 %v5379_v24, %s5176_s21 }
 0x1bb   : > { %v993_v0 = vpop.permute.xlu0 %992 }
 0x1bc   : > { %v778_v12 = vpop.permute.xlu1 %777  ;;  %1066 = vst.msk [vmem:[#allocation3 + $0xb8] sm:$0xff] %vm1042_vm4, %v993_v0 }
 0x1bd   : > { %862 = vst.msk [vmem:[#allocation3 + $0x60] sm:$0xff] %vm849_vm3, %v778_v12  ;;  %1366 = vrot.lane.b32.xlu0 %v5539_v14, %s5177_s22 }
 0x1be   : > { %1151 = vrot.lane.b32.xlu1 %v5397_v30, %s5176_s21 }
 0x1bf   : > { %v997_v4 = vpop.permute.xlu0 %996 }
 0x1c0   : > { %v782_v18 = vpop.permute.xlu1 %781  ;;  %1068 = vst.msk [vmem:[#allocation3 + $0xc8] sm:$0xff] %vm1042_vm4, %v997_v4 }
 0x1c1   : > { %864 = vst.msk [vmem:[#allocation3 + $0x70] sm:$0xff] %vm849_vm3, %v782_v18  ;;  %1370 = vrot.lane.b32.xlu0 %v5552_v26, %s5177_s22  ;;  %v7522_v26 = vld [vmem:[#allocation16_spill] sm:$0xff]  ;;  %v7536_v18 = vld [vmem:[#allocation9_spill] sm:$0xff] }
 0x1c2   : > { %1155 = vrot.lane.b32.xlu1 %v5415_v36, %s5176_s21  ;;  %v7521_v36 = vld [vmem:[#allocation7_spill] sm:$0xff] }
 0x1c3   : > { %v1001_v8 = vpop.permute.xlu0 %1000 }
 0x1c4   : > { %v786_v24 = vpop.permute.xlu1 %785  ;;  %1070 = vst.msk [vmem:[#allocation3 + $0xd8] sm:$0xff] %vm1042_vm4, %v1001_v8 }
 0x1c5   : > { %866 = vst.msk [vmem:[#allocation3 + $0x80] sm:$0xff] %vm849_vm3, %v786_v24  ;;  %1374 = vrot.lane.b32.xlu0 %v5565_v38, %s5177_s22  ;;  %v7524_v38 = vld [vmem:[#allocation19_spill] sm:$0xff] }
 0x1c6   : > { %1159 = vrot.lane.b32.xlu1 %v5433_v42, %s5176_s21  ;;  %v7523_v42 = vld [vmem:[#allocation8_spill] sm:$0xff] }
 0x1c7   : > { %v1005_v14 = vpop.permute.xlu0 %1004 }
 0x1c8   : > { %v790_v30 = vpop.permute.xlu1 %789  ;;  %1072 = vst.msk [vmem:[#allocation3 + $0xe8] sm:$0xff] %vm1042_vm4, %v1005_v14  ;;  %v7538_v14 = vld [vmem:[#allocation30_spill] sm:$0xff] }
 0x1c9   : > { %868 = vst.msk [vmem:[#allocation3 + $0x90] sm:$0xff] %vm849_vm3, %v790_v30  ;;  %1378 = vrot.lane.b32.xlu0 %v7522_v26, %s5177_s22 }
 0x1ca   : > { %1163 = vrot.lane.b32.xlu1 %v7521_v36, %s5176_s21  ;;  %v7539_v36 = vld [vmem:[#allocation12_spill] sm:$0xff] }
 0x1cb   : > { %v1009_v25 = vpop.permute.xlu0 %1008 }
 0x1cc   : > { %v794_v19 = vpop.permute.xlu1 %793  ;;  %1074 = vst.msk [vmem:[#allocation3 + $0xf8] sm:$0xff] %vm1042_vm4, %v1009_v25 }
 0x1cd   : > { %870 = vst.msk [vmem:[#allocation3 + $0xa0] sm:$0xff] %vm849_vm3, %v794_v19  ;;  %1382 = vrot.lane.b32.xlu0 %v7524_v38, %s5177_s22  ;;  %v7541_v38 = vld [vmem:[#allocation17_spill] sm:$0xff] }
 0x1ce   : > { %1167 = vrot.lane.b32.xlu1 %v7523_v42, %s5176_s21 }
 0x1cf   : > { %v1142_v31 = vpop.permute.xlu0 %1141 }
 0x1d0   : > { %v798_v51 = vpop.permute.xlu1 %797  ;;  %1237 = vst.msk [vmem:[#allocation3 + $0x8] sm:$0xff] %vm1235_vm5, %v1142_v31 }
 0x1d1   : > { %872 = vst.msk [vmem:[#allocation3 + $0xb0] sm:$0xff] %vm849_vm3, %v798_v51  ;;  %1386 = vrot.lane.b32.xlu0 %v7526_v57, %s5177_s22 }
 0x1d2   : > { %1171 = vrot.lane.b32.xlu1 %v7525_v37, %s5176_s21  ;;  %v7543_v37 = vld [vmem:[#allocation20_spill] sm:$0xff] }
 0x1d3   : > { %v1146_v1 = vpop.permute.xlu0 %1145 }
 0x1d4   : > { %v802_v43 = vpop.permute.xlu1 %801  ;;  %1239 = vst.msk [vmem:[#allocation3 + $0x18] sm:$0xff] %vm1235_vm5, %v1146_v1 }
 0x1d5   : > { %874 = vst.msk [vmem:[#allocation3 + $0xc0] sm:$0xff] %vm849_vm3, %v802_v43  ;;  %1390 = vrot.lane.b32.xlu0 %v7528_v9, %s5177_s22  ;;  %v7545_v9 = vld [vmem:[#allocation32_spill] sm:$0xff] }
 0x1d6   : > { %1175 = vrot.lane.b32.xlu1 %v7527_v49, %s5176_s21 }
 0x1d7   : > { %v1150_v62 = vpop.permute.xlu0 %1149 }
 0x1d8   : > { %v806_v29 = vpop.permute.xlu1 %805  ;;  %1241 = vst.msk [vmem:[#allocation3 + $0x28] sm:$0xff] %vm1235_vm5, %v1150_v62 }
 0x1d9   : > { %876 = vst.msk [vmem:[#allocation3 + $0xd0] sm:$0xff] %vm849_vm3, %v806_v29  ;;  %1394 = vrot.lane.b32.xlu0 %v5966_v17, %s5177_s22  ;;  %v7546_v29 = vld [vmem:[#allocation26_spill] sm:$0xff] }
 0x1da   : > { %1179 = vrot.lane.b32.xlu1 %v7529_v53, %s5176_s21 }
 0x1db   : > { %v1154_v23 = vpop.permute.xlu0 %1153 }
 0x1dc   : > { %v810_v11 = vpop.permute.xlu1 %809  ;;  %1243 = vst.msk [vmem:[#allocation3 + $0x38] sm:$0xff] %vm1235_vm5, %v1154_v23 }
 0x1dd   : > { %878 = vst.msk [vmem:[#allocation3 + $0xe0] sm:$0xff] %vm849_vm3, %v810_v11  ;;  %1528 = vrot.lane.b32.xlu0 %v5372_v22, %s5178_s23  ;;  %v7532_v22 = vld [vmem:[#allocation21_spill] sm:$0xff] }
 0x1de   : > { %1183 = vrot.lane.b32.xlu1 %v7530_v16, %s5176_s21  ;;  %v1493_v11 = vld [vmem:[#allocation2 + $0x1a0] sm:$0xff] }
 0x1df   : > { %v1158_v41 = vpop.permute.xlu0 %1157 }
 0x1e0   : > { %v814_v10 = vpop.permute.xlu1 %813  ;;  %1245 = vst.msk [vmem:[#allocation3 + $0x48] sm:$0xff] %vm1235_vm5, %v1158_v41 }
 0x1e1   : > { %880 = vst.msk [vmem:[#allocation3 + $0xf0] sm:$0xff] %vm849_vm3, %v814_v10  ;;  %1532 = vrot.lane.b32.xlu0 %v5390_v28, %s5178_s23  ;;  %v7533_v28 = vld [vmem:[#allocation24_spill] sm:$0xff] }
 0x1e2   : > { %1187 = vrot.lane.b32.xlu1 %v7531_v35, %s5176_s21 }
 0x1e3   : > { %v1162_v33 = vpop.permute.xlu0 %1161 }
 0x1e4   : > { %v947_v54 = vpop.permute.xlu1 %946  ;;  %1247 = vst.msk [vmem:[#allocation3 + $0x58] sm:$0xff] %vm1235_vm5, %v1162_v33 }
 0x1e5   : > { %1043 = vst.msk [vmem:[#allocation3] sm:$0xff] %vm1042_vm4, %v947_v54  ;;  %1536 = vrot.lane.b32.xlu0 %v5408_v34, %s5178_s23 }
 0x1e6   : > { %1191 = vrot.lane.b32.xlu1 %v7532_v22, %s5176_s21 }
 0x1e7   : > { %v1166_v39 = vpop.permute.xlu0 %1165 }
 0x1e8   : > { %v951_v59 = vpop.permute.xlu1 %950  ;;  %1249 = vst.msk [vmem:[#allocation3 + $0x68] sm:$0xff] %vm1235_vm5, %v1166_v39 }
 0x1e9   : > { %1045 = vst.msk [vmem:[#allocation3 + $0x10] sm:$0xff] %vm1042_vm4, %v951_v59  ;;  %1540 = vrot.lane.b32.xlu0 %v5426_v40, %s5178_s23  ;;  %v7534_v40 = vld [vmem:[#allocation27_spill] sm:$0xff] }
 0x1ea   : > { %1195 = vrot.lane.b32.xlu1 %v7533_v28, %s5176_s21 }
 0x1eb   : > { %v1170_v13 = vpop.permute.xlu0 %1169 }
 0x1ec   : > { %v955_v47 = vpop.permute.xlu1 %954  ;;  %1251 = vst.msk [vmem:[#allocation3 + $0x78] sm:$0xff] %vm1235_vm5, %v1170_v13  ;;  %v1664_v13 = vld [vmem:[#allocation2 + $0x99] sm:$0xff] }
 0x1ed   : > { %1047 = vst.msk [vmem:[#allocation3 + $0x20] sm:$0xff] %vm1042_vm4, %v955_v47  ;;  %1544 = vrot.lane.b32.xlu0 %v5444_v46, %s5178_s23  ;;  %v7535_v46 = vld [vmem:[#allocation28_spill] sm:$0xff] }
 0x1ee   : > { %1199 = vrot.lane.b32.xlu1 %v5998_v60, %s5176_s21 }
 0x1ef   : > { %v1174_v45 = vpop.permute.xlu0 %1173 }
 0x1f0   : > { %v959_v34 = vpop.permute.xlu1 %958  ;;  %1253 = vst.msk [vmem:[#allocation3 + $0x88] sm:$0xff] %vm1235_vm5, %v1174_v45 }
 0x1f1   : > { %1049 = vst.msk [vmem:[#allocation3 + $0x30] sm:$0xff] %vm1042_vm4, %v959_v34  ;;  %1548 = vrot.lane.b32.xlu0 %v5462_v52, %s5178_s23  ;;  %v7537_v52 = vld [vmem:[#allocation29_spill] sm:$0xff] }
 0x1f2   : > { %1332 = vrot.lane.b32.xlu1 %v7534_v40, %s5177_s22  ;;  %v1666_v40 = vld [vmem:[#allocation2 + $0xb1] sm:$0xff] }
 0x1f3   : > { %v1178_v0 = vpop.permute.xlu0 %1177 }
 0x1f4   : > { %v963_v12 = vpop.permute.xlu1 %962  ;;  %1255 = vst.msk [vmem:[#allocation3 + $0x98] sm:$0xff] %vm1235_vm5, %v1178_v0 }
 0x1f5   : > { %1051 = vst.msk [vmem:[#allocation3 + $0x40] sm:$0xff] %vm1042_vm4, %v963_v12  ;;  %1552 = vrot.lane.b32.xlu0 %v7536_v18, %s5178_s23  ;;  %v1668_v18 = vld [vmem:[#allocation2 + $0xc9] sm:$0xff] }
 0x1f6   : > { %1336 = vrot.lane.b32.xlu1 %v7535_v46, %s5177_s22  ;;  %v1464_v46 = vld [vmem:[#allocation2 + $0x48] sm:$0xff] }
 0x1f7   : > { %v1182_v24 = vpop.permute.xlu0 %1181 }
 0x1f8   : > { %v967_v4 = vpop.permute.xlu1 %966  ;;  %1257 = vst.msk [vmem:[#allocation3 + $0xa8] sm:$0xff] %vm1235_vm5, %v1182_v24 }
 0x1f9   : > { %1053 = vst.msk [vmem:[#allocation3 + $0x50] sm:$0xff] %vm1042_vm4, %v967_v4  ;;  %1556 = vrot.lane.b32.xlu0 %v5504_v2, %s5178_s23  ;;  %v7540_v2 = vld [vmem:[#allocation14_spill] sm:$0xff] }
 0x1fa   : > { %1340 = vrot.lane.b32.xlu1 %v7537_v52, %s5177_s22  ;;  %v1466_v52 = vld [vmem:[#allocation2 + $0x60] sm:$0xff] }
 0x1fb   : > { %v1186_v30 = vpop.permute.xlu0 %1185 }
 0x1fc   : > { %v971_v8 = vpop.permute.xlu1 %970  ;;  %1259 = vst.msk [vmem:[#allocation3 + $0xb8] sm:$0xff] %vm1235_vm5, %v1186_v30 }
 0x1fd   : > { %1055 = vst.msk [vmem:[#allocation3 + $0x60] sm:$0xff] %vm1042_vm4, %v971_v8  ;;  %1560 = vrot.lane.b32.xlu0 %v7539_v36, %s5178_s23  ;;  %v1670_v8 = vld [vmem:[#allocation2 + $0xe1] sm:$0xff]  ;;  %v1468_v36 = vld [vmem:[#allocation2 + $0x78] sm:$0xff] }
 0x1fe   : > { %1344 = vrot.lane.b32.xlu1 %v7538_v14, %s5177_s22 }
 0x1ff   : > { %v1190_v19 = vpop.permute.xlu0 %1189 }
 0x200   : > { %v975_v26 = vpop.permute.xlu1 %974  ;;  %1261 = vst.msk [vmem:[#allocation3 + $0xc8] sm:$0xff] %vm1235_vm5, %v1190_v19 }
 0x201   : > { %1057 = vst.msk [vmem:[#allocation3 + $0x70] sm:$0xff] %vm1042_vm4, %v975_v26  ;;  %1564 = vrot.lane.b32.xlu0 %v7540_v2, %s5178_s23  ;;  %v1849_v26 = vld [vmem:[#allocation2 + $0x3a] sm:$0xff] }
 0x202   : > { %1348 = vrot.lane.b32.xlu1 %v5723_v58, %s5177_s22  ;;  %v7542_v58 = vld [vmem:[#allocation31_spill] sm:$0xff] }
 0x203   : > { %v1194_v42 = vpop.permute.xlu0 %1193 }
 0x204   : > { %v979_v25 = vpop.permute.xlu1 %978  ;;  %1263 = vst.msk [vmem:[#allocation3 + $0xd8] sm:$0xff] %vm1235_vm5, %v1194_v42  ;;  %v1851_v42 = vld [vmem:[#allocation2 + $0x52] sm:$0xff] }
 0x205   : > { %1059 = vst.msk [vmem:[#allocation3 + $0x80] sm:$0xff] %vm1042_vm4, %v979_v25  ;;  %1568 = vrot.lane.b32.xlu0 %v7541_v38, %s5178_s23  ;;  %v1470_v25 = vld [vmem:[#allocation2 + $0x90] sm:$0xff] }
 0x206   : > { %1352 = vrot.lane.b32.xlu1 %v5730_v48, %s5177_s22  ;;  %v7544_v48 = vld [vmem:[#allocation23_spill] sm:$0xff] }
 0x207   : > { %v1198_v31 = vpop.permute.xlu0 %1197 }
 0x208   : > { %v983_v51 = vpop.permute.xlu1 %982  ;;  %1265 = vst.msk [vmem:[#allocation3 + $0xe8] sm:$0xff] %vm1235_vm5, %v1198_v31  ;;  %v1472_v31 = vld [vmem:[#allocation2 + $0xa8] sm:$0xff] }
 0x209   : > { %1061 = vst.msk [vmem:[#allocation3 + $0x90] sm:$0xff] %vm1042_vm4, %v983_v51  ;;  %1572 = vrot.lane.b32.xlu0 %v7543_v37, %s5178_s23 }
 0x20a   : > { %1356 = vrot.lane.b32.xlu1 %v7542_v58, %s5177_s22  ;;  %v1853_v58 = vld [vmem:[#allocation2 + $0x6a] sm:$0xff] }
 0x20b   : > { %v1202_v43 = vpop.permute.xlu0 %1201 }
 0x20c   : > { %v987_v57 = vpop.permute.xlu1 %986  ;;  %1267 = vst.msk [vmem:[#allocation3 + $0xf8] sm:$0xff] %vm1235_vm5, %v1202_v43  ;;  %v1474_v43 = vld [vmem:[#allocation2 + $0xc0] sm:$0xff] }
 0x20d   : > { %1063 = vst.msk [vmem:[#allocation3 + $0xa0] sm:$0xff] %vm1042_vm4, %v987_v57  ;;  %1576 = vrot.lane.b32.xlu0 %v7544_v48, %s5178_s23  ;;  %v1855_v48 = vld [vmem:[#allocation2 + $0x82] sm:$0xff] }
 0x20e   : > { %1360 = vrot.lane.b32.xlu1 %v5744_v32, %s5177_s22  ;;  %v7547_v32 = vld [vmem:[#allocation33_spill] sm:$0xff] }
 0x20f   : > { %v1335_v49 = vpop.permute.xlu0 %1334 }
 0x210   : > { %v991_v1 = vpop.permute.xlu1 %990  ;;  %1430 = vst.msk [vmem:[#allocation3 + $0x8] sm:$0xff] %vm1428_vm6, %v1335_v49 }
 0x211   : > { %1065 = vst.msk [vmem:[#allocation3 + $0xb0] sm:$0xff] %vm1042_vm4, %v991_v1  ;;  %1580 = vrot.lane.b32.xlu0 %v7546_v29, %s5178_s23  ;;  %v1857_v29 = vld [vmem:[#allocation2 + $0x9a] sm:$0xff] }
 0x212   : > { %1364 = vrot.lane.b32.xlu1 %v7545_v9, %s5177_s22  ;;  %v1476_v9 = vld [vmem:[#allocation2 + $0xd8] sm:$0xff] }
 0x213   : > { %v1339_v53 = vpop.permute.xlu0 %1338 }
 0x214   : > { %v995_v62 = vpop.permute.xlu1 %994  ;;  %1432 = vst.msk [vmem:[#allocation3 + $0x18] sm:$0xff] %vm1428_vm6, %v1339_v53 }
 0x215   : > { %1067 = vst.msk [vmem:[#allocation3 + $0xc0] sm:$0xff] %vm1042_vm4, %v995_v62  ;;  %1584 = vrot.lane.b32.xlu0 %v7547_v32, %s5178_s23  ;;  %v1859_v32 = vld [vmem:[#allocation2 + $0xb2] sm:$0xff] }
 0x216   : > { %1368 = vrot.lane.b32.xlu1 %v5761_v5, %s5177_s22  ;;  %v1656_v5 = vld [vmem:[#allocation2 + $0x39] sm:$0xff] }
 0x217   : > { %v1343_v16 = vpop.permute.xlu0 %1342 }
 0x218   : > { %v999_v23 = vpop.permute.xlu1 %998  ;;  %1434 = vst.msk [vmem:[#allocation3 + $0x28] sm:$0xff] %vm1428_vm6, %v1343_v16  ;;  %v1861_v16 = vld [vmem:[#allocation2 + $0xca] sm:$0xff] }
 0x219   : > { %1069 = vst.msk [vmem:[#allocation3 + $0xd0] sm:$0xff] %vm1042_vm4, %v999_v23  ;;  %1588 = vrot.lane.b32.xlu0 %v1493_v11, %s5178_s23 }
 0x21a   : > { %1372 = vrot.lane.b32.xlu1 %v5769_v56, %s5177_s22  ;;  %v1658_v56 = vld [vmem:[#allocation2 + $0x51] sm:$0xff] }
 0x21b   : > { %v1347_v41 = vpop.permute.xlu0 %1346 }
 0x21c   : > { %v1003_v10 = vpop.permute.xlu1 %1002  ;;  %1436 = vst.msk [vmem:[#allocation3 + $0x38] sm:$0xff] %vm1428_vm6, %v1347_v41 }
 0x21d   : > { %1071 = vst.msk [vmem:[#allocation3 + $0xe0] sm:$0xff] %vm1042_vm4, %v1003_v10  ;;  %1721 = vrot.lane.b32.xlu0 %v1656_v5, %s5179_s29 }
 0x21e   : > { %1376 = vrot.lane.b32.xlu1 %v5777_v7, %s5177_s22  ;;  %v1660_v7 = vld [vmem:[#allocation2 + $0x69] sm:$0xff] }
 0x21f   : > { %v1351_v54 = vpop.permute.xlu0 %1350 }
 0x220   : > { %v1007_v35 = vpop.permute.xlu1 %1006  ;;  %1438 = vst.msk [vmem:[#allocation3 + $0x48] sm:$0xff] %vm1428_vm6, %v1351_v54 }
 0x221   : > { %1073 = vst.msk [vmem:[#allocation3 + $0xf0] sm:$0xff] %vm1042_vm4, %v1007_v35  ;;  %1725 = vrot.lane.b32.xlu0 %v1658_v56, %s5179_s29 }
 0x222   : > { %1380 = vrot.lane.b32.xlu1 %v5785_v15, %s5177_s22  ;;  %v1662_v15 = vld [vmem:[#allocation2 + $0x81] sm:$0xff] }
 0x223   : > { %v1355_v22 = vpop.permute.xlu0 %1354 }
 0x224   : > { %v1140_v33 = vpop.permute.xlu1 %1139  ;;  %1440 = vst.msk [vmem:[#allocation3 + $0x58] sm:$0xff] %vm1428_vm6, %v1355_v22 }
 0x225   : > { %1236 = vst.msk [vmem:[#allocation3] sm:$0xff] %vm1235_vm5, %v1140_v33  ;;  %1729 = vrot.lane.b32.xlu0 %v1660_v7, %s5179_s29 }
 0x226   : > { %1384 = vrot.lane.b32.xlu1 %v5793_v21, %s5177_s22  ;;  %v6091_v21 = vld [vmem:[#allocation2 + $0x182] sm:$0xff] }
 0x227   : > { %v1359_v39 = vpop.permute.xlu0 %1358 }
 0x228   : > { %v1144_v59 = vpop.permute.xlu1 %1143  ;;  %1442 = vst.msk [vmem:[#allocation3 + $0x68] sm:$0xff] %vm1428_vm6, %v1359_v39  ;;  %v1492_v39 = vld [vmem:[#allocation2 + $0x198] sm:$0xff] }
 0x229   : > { %1238 = vst.msk [vmem:[#allocation3 + $0x10] sm:$0xff] %vm1235_vm5, %v1144_v59  ;;  %1733 = vrot.lane.b32.xlu0 %v1662_v15, %s5179_s29 }
 0x22a   : > { %1388 = vrot.lane.b32.xlu1 %v5801_v27, %s5177_s22  ;;  %v1462_v27 = vld [vmem:[#allocation2 + $0x30] sm:$0xff] }
 0x22b   : > { %v1363_v47 = vpop.permute.xlu0 %1362 }
 0x22c   : > { %v1148_v28 = vpop.permute.xlu1 %1147  ;;  %1444 = vst.msk [vmem:[#allocation3 + $0x78] sm:$0xff] %vm1428_vm6, %v1363_v47 }
 0x22d   : > { %1240 = vst.msk [vmem:[#allocation3 + $0x20] sm:$0xff] %vm1235_vm5, %v1148_v28  ;;  %1737 = vrot.lane.b32.xlu0 %v1664_v13, %s5179_s29 }
 0x22e   : > { %1392 = vrot.lane.b32.xlu1 %v6091_v21, %s5177_s22 }
 0x22f   : > { %v1367_v45 = vpop.permute.xlu0 %1366 }
 0x230   : > { %v1152_v34 = vpop.permute.xlu1 %1151  ;;  %1446 = vst.msk [vmem:[#allocation3 + $0x88] sm:$0xff] %vm1428_vm6, %v1367_v45 }
 0x231   : > { %1242 = vst.msk [vmem:[#allocation3 + $0x30] sm:$0xff] %vm1235_vm5, %v1152_v34  ;;  %1741 = vrot.lane.b32.xlu0 %v1666_v40, %s5179_s29  ;;  %v1869_v34 = vld [vmem:[#allocation2 + $0x12a] sm:$0xff] }
 0x232   : > { %1526 = vrot.lane.b32.xlu1 %v1462_v27, %s5178_s23  ;;  %v1657_v40 = vld [vmem:[#allocation2 + $0x49] sm:$0xff] }
 0x233   : > { %v1371_v0 = vpop.permute.xlu0 %1370 }
 0x234   : > { %v1156_v12 = vpop.permute.xlu1 %1155  ;;  %1448 = vst.msk [vmem:[#allocation3 + $0x98] sm:$0xff] %vm1428_vm6, %v1371_v0 }
 0x235   : > { %1244 = vst.msk [vmem:[#allocation3 + $0x40] sm:$0xff] %vm1235_vm5, %v1156_v12  ;;  %1745 = vrot.lane.b32.xlu0 %v1668_v18, %s5179_s29  ;;  %v1678_v12 = vld [vmem:[#allocation2 + $0x141] sm:$0xff] }
 0x236   : > { %1530 = vrot.lane.b32.xlu1 %v1464_v46, %s5178_s23  ;;  %v1659_v18 = vld [vmem:[#allocation2 + $0x61] sm:$0xff] }
 0x237   : > { %v1375_v24 = vpop.permute.xlu0 %1374 }
 0x238   : > { %v1160_v4 = vpop.permute.xlu1 %1159  ;;  %1450 = vst.msk [vmem:[#allocation3 + $0xa8] sm:$0xff] %vm1428_vm6, %v1375_v24  ;;  %v2073_v24 = vld [vmem:[%s7458_s1] sm:$0xff] }
 0x239   : > { %1246 = vst.msk [vmem:[#allocation3 + $0x50] sm:$0xff] %vm1235_vm5, %v1160_v4  ;;  %1749 = vrot.lane.b32.xlu0 %v1670_v8, %s5179_s29  ;;  %v1871_v4 = vld [vmem:[#allocation2 + $0x142] sm:$0xff] }
 0x23a   : > { %1534 = vrot.lane.b32.xlu1 %v1466_v52, %s5178_s23  ;;  %v2074_v52 = vld [vmem:[%s7458_s1 + $0x8] sm:$0xff] }
 0x23b   : > { %v1379_v14 = vpop.permute.xlu0 %1378  ;;  %v5028_v8 = vpack.c.bf16 %v2074_v52, %v2073_v24 }
 0x23c   : > { %v1164_v30 = vpop.permute.xlu1 %1163  ;;  %1452 = vst.msk [vmem:[#allocation3 + $0xb8] sm:$0xff] %vm1428_vm6, %v1379_v14 }
 0x23d   : > { %1248 = vst.msk [vmem:[#allocation3 + $0x60] sm:$0xff] %vm1235_vm5, %v1164_v30  ;;  %1914 = vrot.lane.b32.xlu0 %v1849_v26, %s5180_s8  ;;  %5029 = vmatprep.subr.bf16.mxu0 %v5028_v8  ;;  %v1680_v26 = vld [vmem:[#allocation2 + $0x159] sm:$0xff] }
 0x23e   : > { %1538 = vrot.lane.b32.xlu1 %v1468_v36, %s5178_s23  ;;  %v1661_v36 = vld [vmem:[#allocation2 + $0x79] sm:$0xff]  ;;  %5031 = vmatpush3.bf16.msra.mxu0 %v5028_v8  ;;  %v1673_v8 = vld [vmem:[#allocation2 + $0x109] sm:$0xff] }
 0x23f   : > { %v1383_v2 = vpop.permute.xlu0 %1382 }
 0x240   : > { %v1168_v19 = vpop.permute.xlu1 %1167  ;;  %1454 = vst.msk [vmem:[#allocation3 + $0xc8] sm:$0xff] %vm1428_vm6, %v1383_v2  ;;  %v2076_v2 = vld [vmem:[%s7458_s1 + $0x18] sm:$0xff] }
 0x241   : > { %1250 = vst.msk [vmem:[#allocation3 + $0x70] sm:$0xff] %vm1235_vm5, %v1168_v19  ;;  %1918 = vrot.lane.b32.xlu0 %v1851_v42, %s5180_s8  ;;  %v2075_v19 = vld [vmem:[%s7458_s1 + $0x10] sm:$0xff] }
 0x242   : > { %1542 = vrot.lane.b32.xlu1 %v1470_v25, %s5178_s23  ;;  %v5032_v25 = vpack.c.bf16 %v2076_v2, %v2075_v19  ;;  %v1675_v2 = vld [vmem:[#allocation2 + $0x121] sm:$0xff] }
 0x243   : > { %v1387_v51 = vpop.permute.xlu0 %1386 }
 0x244   : > { %v1172_v38 = vpop.permute.xlu1 %1171  ;;  %1456 = vst.msk [vmem:[#allocation3 + $0xd8] sm:$0xff] %vm1428_vm6, %v1387_v51  ;;  %v1663_v51 = vld [vmem:[#allocation2 + $0x91] sm:$0xff]  ;;  %5033 = vmatprep.subr.bf16.mxu0 %v5032_v25 }
 0x245   : > { %1252 = vst.msk [vmem:[#allocation3 + $0x80] sm:$0xff] %vm1235_vm5, %v1172_v38  ;;  %1922 = vrot.lane.b32.xlu0 %v1853_v58, %s5180_s8  ;;  %5035 = vmatpush3.bf16.msra.mxu0 %v5032_v25  ;;  %v2077_v58 = vld [vmem:[%s7458_s1 + $0x20] sm:$0xff] }
 0x246   : > { %1546 = vrot.lane.b32.xlu1 %v1472_v31, %s5178_s23  ;;  %v1873_v31 = vld [vmem:[#allocation2 + $0x15a] sm:$0xff] }
 0x247   : > { %v1391_v57 = vpop.permute.xlu0 %1390 }
 0x248   : > { %v1176_v37 = vpop.permute.xlu1 %1175  ;;  %1458 = vst.msk [vmem:[#allocation3 + $0xe8] sm:$0xff] %vm1428_vm6, %v1391_v57 }
 0x249   : > { %1254 = vst.msk [vmem:[#allocation3 + $0x90] sm:$0xff] %vm1235_vm5, %v1176_v37  ;;  %1926 = vrot.lane.b32.xlu0 %v1855_v48, %s5180_s8  ;;  %v2078_v37 = vld [vmem:[%s7458_s1 + $0x28] sm:$0xff] }
 0x24a   : > { %1550 = vrot.lane.b32.xlu1 %v1474_v43, %s5178_s23  ;;  %v5036_v57 = vpack.c.bf16 %v2078_v37, %v2077_v58  ;;  %v1677_v58 = vld [vmem:[#allocation2 + $0x139] sm:$0xff] }
 0x24b   : > { %v1395_v49 = vpop.permute.xlu0 %1394 }
 0x24c   : > { %v1180_v1 = vpop.permute.xlu1 %1179  ;;  %1460 = vst.msk [vmem:[#allocation3 + $0xf8] sm:$0xff] %vm1428_vm6, %v1395_v49  ;;  %5037 = vmatprep.subr.bf16.mxu0 %v5036_v57  ;;  %v1682_v49 = vld [vmem:[#allocation2 + $0x171] sm:$0xff] }
 0x24d   : > { %1256 = vst.msk [vmem:[#allocation3 + $0xa0] sm:$0xff] %vm1235_vm5, %v1180_v1  ;;  %1930 = vrot.lane.b32.xlu0 %v1857_v29, %s5180_s8  ;;  %v1665_v1 = vld [vmem:[#allocation2 + $0xa9] sm:$0xff]  ;;  %5039 = vmatpush3.bf16.msra.mxu0 %v5036_v57  ;;  %v2080_v29 = vld [vmem:[%s7458_s1 + $0x38] sm:$0xff] }
 0x24e   : > { %1554 = vrot.lane.b32.xlu1 %v1476_v9, %s5178_s23  ;;  %v2079_v9 = vld [vmem:[%s7458_s1 + $0x30] sm:$0xff] }
 0x24f   : > { %v1529_v53 = vpop.permute.xlu0 %1528 }
 0x250   : > { %v1184_v62 = vpop.permute.xlu1 %1183  ;;  %1624 = vst.msk [vmem:[#allocation3 + $0x8] sm:$0xff] %vm1622_vm7, %v1529_v53 }
 0x251   : > { %1258 = vst.msk [vmem:[#allocation3 + $0xb0] sm:$0xff] %vm1235_vm5, %v1184_v62  ;;  %1934 = vrot.lane.b32.xlu0 %v1859_v32, %s5180_s8  ;;  %v5040_v62 = vpack.c.bf16 %v2080_v29, %v2079_v9 }
 0x252   : > { %1558 = vrot.lane.b32.xlu1 %v5517_v6, %s5178_s23  ;;  %v1863_v6 = vld [vmem:[#allocation2 + $0xe2] sm:$0xff] }
 0x253   : > { %v1533_v23 = vpop.permute.xlu0 %1532  ;;  %5041 = vmatprep.subr.bf16.mxu0 %v5040_v62 }
 0x254   : > { %v1188_v11 = vpop.permute.xlu1 %1187  ;;  %1626 = vst.msk [vmem:[#allocation3 + $0x18] sm:$0xff] %vm1622_vm7, %v1533_v23  ;;  %v1875_v23 = vld [vmem:[#allocation2 + $0x172] sm:$0xff]  ;;  %5043 = vmatpush3.bf16.msra.mxu0 %v5040_v62 }
 0x255   : > { %1260 = vst.msk [vmem:[#allocation3 + $0xc0] sm:$0xff] %vm1235_vm5, %v1188_v11  ;;  %1938 = vrot.lane.b32.xlu0 %v1861_v16, %s5180_s8  ;;  %v1667_v11 = vld [vmem:[#allocation2 + $0xc1] sm:$0xff]  ;;  %v1872_v62 = vld [vmem:[#allocation2 + $0x152] sm:$0xff] }
 0x256   : > { %1562 = vrot.lane.b32.xlu1 %v5543_v20, %s5178_s23  ;;  %v1672_v20 = vld [vmem:[#allocation2 + $0xf9] sm:$0xff] }
 0x257   : > { %v1537_v41 = vpop.permute.xlu0 %1536  ;;  %v2081_v16 = vld [vmem:[%s7458_s1 + $0x40] sm:$0xff] }
 0x258   : > { %v1192_v10 = vpop.permute.xlu1 %1191  ;;  %1628 = vst.msk [vmem:[#allocation3 + $0x28] sm:$0xff] %vm1622_vm7, %v1537_v41  ;;  %4912 = vmatprep.subr.mxu0 %v2081_v16 }
 0x259   : > { %1262 = vst.msk [vmem:[#allocation3 + $0xd0] sm:$0xff] %vm1235_vm5, %v1192_v10  ;;  %1942 = vrot.lane.b32.xlu0 %v1863_v6, %s5180_s8  ;;  %v1669_v6 = vld [vmem:[#allocation2 + $0xd9] sm:$0xff]  ;;  %4913 = vmatpush3.msra.mxu0 %v2081_v16 }
 0x25a   : > { %1566 = vrot.lane.b32.xlu1 %v5569_v44, %s5178_s23  ;;  %v1865_v44 = vld [vmem:[#allocation2 + $0xfa] sm:$0xff] }
 0x25b   : > { %v1541_v35 = vpop.permute.xlu0 %1540 }
 0x25c   : > { %v1196_v5 = vpop.permute.xlu1 %1195  ;;  %1630 = vst.msk [vmem:[#allocation3 + $0x38] sm:$0xff] %vm1622_vm7, %v1541_v35 }
 0x25d   : > { %1264 = vst.msk [vmem:[#allocation3 + $0xe0] sm:$0xff] %vm1235_vm5, %v1196_v5  ;;  %1753 = vrot.lane.b32.xlu0 %v1672_v20, %s5179_s29  ;;  %v1848_v20 = vld [vmem:[#allocation2 + $0x32] sm:$0xff] }
 0x25e   : > { %1570 = vrot.lane.b32.xlu1 %v5593_v3, %s5178_s23  ;;  %v1674_v3 = vld [vmem:[#allocation2 + $0x111] sm:$0xff] }
 0x25f   : > { %v1545_v56 = vpop.permute.xlu0 %1544 }
 0x260   : > { %v1200_v54 = vpop.permute.xlu1 %1199  ;;  %1632 = vst.msk [vmem:[#allocation3 + $0x48] sm:$0xff] %vm1622_vm7, %v1545_v56 }
 0x261   : > { %1266 = vst.msk [vmem:[#allocation3 + $0xf0] sm:$0xff] %vm1235_vm5, %v1200_v54  ;;  %1946 = vrot.lane.b32.xlu0 %v1865_v44, %s5180_s8 }
 0x262   : > { %1574 = vrot.lane.b32.xlu1 %v5615_v63, %s5178_s23  ;;  %v1867_v63 = vld [vmem:[#allocation2 + $0x112] sm:$0xff] }
 0x263   : > { %v1549_v22 = vpop.permute.xlu0 %1548 }
 0x264   : > { %v1333_v33 = vpop.permute.xlu1 %1332  ;;  %1634 = vst.msk [vmem:[#allocation3 + $0x58] sm:$0xff] %vm1622_vm7, %v1549_v22  ;;  %v1852_v22 = vld [vmem:[#allocation2 + $0x62] sm:$0xff] }
 0x265   : > { %1429 = vst.msk [vmem:[#allocation3] sm:$0xff] %vm1428_vm6, %v1333_v33  ;;  %1757 = vrot.lane.b32.xlu0 %v1674_v3, %s5179_s29 }
 0x266   : > { %1578 = vrot.lane.b32.xlu1 %v5637_v61, %s5178_s23  ;;  %v1676_v61 = vld [vmem:[#allocation2 + $0x129] sm:$0xff] }
 0x267   : > { %v1553_v59 = vpop.permute.xlu0 %1552 }
 0x268   : > { %v1337_v7 = vpop.permute.xlu1 %1336  ;;  %1636 = vst.msk [vmem:[#allocation3 + $0x68] sm:$0xff] %vm1622_vm7, %v1553_v59 }
 0x269   : > { %1431 = vst.msk [vmem:[#allocation3 + $0x10] sm:$0xff] %vm1428_vm6, %v1337_v7  ;;  %1950 = vrot.lane.b32.xlu0 %v1867_v63, %s5180_s8  ;;  %v1854_v7 = vld [vmem:[#allocation2 + $0x7a] sm:$0xff] }
 0x26a   : > { %1582 = vrot.lane.b32.xlu1 %v5896_v50, %s5178_s23  ;;  %v1655_v50 = vld [vmem:[#allocation2 + $0x31] sm:$0xff] }
 0x26b   : > { %v1557_v28 = vpop.permute.xlu0 %1556 }
 0x26c   : > { %v1341_v15 = vpop.permute.xlu1 %1340  ;;  %1638 = vst.msk [vmem:[#allocation3 + $0x78] sm:$0xff] %vm1622_vm7, %v1557_v28 }
 0x26d   : > { %1433 = vst.msk [vmem:[#allocation3 + $0x20] sm:$0xff] %vm1428_vm6, %v1341_v15  ;;  %1761 = vrot.lane.b32.xlu0 %v1676_v61, %s5179_s29  ;;  %v1858_v61 = vld [vmem:[#allocation2 + $0xaa] sm:$0xff] }
 0x26e   : > { %1586 = vrot.lane.b32.xlu1 %v1492_v39, %s5178_s23  ;;  %v1856_v39 = vld [vmem:[#allocation2 + $0x92] sm:$0xff] }
 0x26f   : > { %v1561_v13 = vpop.permute.xlu0 %1560 }
 0x270   : > { %v1345_v47 = vpop.permute.xlu1 %1344  ;;  %1640 = vst.msk [vmem:[#allocation3 + $0x88] sm:$0xff] %vm1622_vm7, %v1561_v13 }
 0x271   : > { %1435 = vst.msk [vmem:[#allocation3 + $0x30] sm:$0xff] %vm1428_vm6, %v1345_v47  ;;  %1954 = vrot.lane.b32.xlu0 %v1869_v34, %s5180_s8 }
 0x272   : > { %1719 = vrot.lane.b32.xlu1 %v1655_v50, %s5179_s29  ;;  %v1860_v50 = vld [vmem:[#allocation2 + $0xc2] sm:$0xff] }
 0x273   : > { %v1565_v27 = vpop.permute.xlu0 %1564 }
 0x274   : > { %v1349_v45 = vpop.permute.xlu1 %1348  ;;  %1642 = vst.msk [vmem:[#allocation3 + $0x98] sm:$0xff] %vm1622_vm7, %v1565_v27  ;;  %v1862_v27 = vld [vmem:[#allocation2 + $0xda] sm:$0xff] }
 0x275   : > { %1437 = vst.msk [vmem:[#allocation3 + $0x40] sm:$0xff] %vm1428_vm6, %v1349_v45  ;;  %1765 = vrot.lane.b32.xlu0 %v1678_v12, %s5179_s29 }
 0x276   : > { %1723 = vrot.lane.b32.xlu1 %v1657_v40, %s5179_s29 }
 0x277   : > { %v1569_v46 = vpop.permute.xlu0 %1568 }
 0x278   : > { %v1353_v0 = vpop.permute.xlu1 %1352  ;;  %1644 = vst.msk [vmem:[#allocation3 + $0xa8] sm:$0xff] %vm1622_vm7, %v1569_v46 }
 0x279   : > { %1439 = vst.msk [vmem:[#allocation3 + $0x50] sm:$0xff] %vm1428_vm6, %v1353_v0  ;;  %1958 = vrot.lane.b32.xlu0 %v1871_v4, %s5180_s8  ;;  %v1671_v0 = vld [vmem:[#allocation2 + $0xf1] sm:$0xff] }
 0x27a   : > { %1727 = vrot.lane.b32.xlu1 %v1659_v18, %s5179_s29  ;;  %v1864_v4 = vld [vmem:[#allocation2 + $0xf2] sm:$0xff] }
 0x27b   : > { %v1573_v14 = vpop.permute.xlu0 %1572 }
 0x27c   : > { %v1357_v30 = vpop.permute.xlu1 %1356  ;;  %1646 = vst.msk [vmem:[#allocation3 + $0xb8] sm:$0xff] %vm1622_vm7, %v1573_v14 }
 0x27d   : > { %1441 = vst.msk [vmem:[#allocation3 + $0x60] sm:$0xff] %vm1428_vm6, %v1357_v30  ;;  %1769 = vrot.lane.b32.xlu0 %v1680_v26, %s5179_s29 }
 0x27e   : > { %1731 = vrot.lane.b32.xlu1 %v1661_v36, %s5179_s29  ;;  %v1866_v36 = vld [vmem:[#allocation2 + $0x10a] sm:$0xff] }
 0x27f   : > { %v1577_v38 = vpop.permute.xlu0 %1576 }
 0x280   : > { %v1361_v42 = vpop.permute.xlu1 %1360  ;;  %1648 = vst.msk [vmem:[#allocation3 + $0xc8] sm:$0xff] %vm1622_vm7, %v1577_v38  ;;  %v1868_v38 = vld [vmem:[#allocation2 + $0x122] sm:$0xff] }
 0x281   : > { %1443 = vst.msk [vmem:[#allocation3 + $0x70] sm:$0xff] %vm1428_vm6, %v1361_v42  ;;  %1962 = vrot.lane.b32.xlu0 %v1873_v31, %s5180_s8 }
 0x282   : > { %1735 = vrot.lane.b32.xlu1 %v1663_v51, %s5179_s29 }
 0x283   : > { %v1581_v48 = vpop.permute.xlu0 %1580 }
 0x284   : > { %v1365_v43 = vpop.permute.xlu1 %1364  ;;  %1650 = vst.msk [vmem:[#allocation3 + $0xd8] sm:$0xff] %vm1622_vm7, %v1581_v48 }
 0x285   : > { %1445 = vst.msk [vmem:[#allocation3 + $0x80] sm:$0xff] %vm1428_vm6, %v1365_v43  ;;  %1773 = vrot.lane.b32.xlu0 %v1682_v49, %s5179_s29  ;;  %v1870_v43 = vld [vmem:[#allocation2 + $0x13a] sm:$0xff]  ;;  %v1679_v49 = vld [vmem:[#allocation2 + $0x151] sm:$0xff] }
 0x286   : > { %1739 = vrot.lane.b32.xlu1 %v1665_v1, %s5179_s29 }
 0x287   : > { %v1585_v32 = vpop.permute.xlu0 %1584 }
 0x288   : > { %v1369_v53 = vpop.permute.xlu1 %1368  ;;  %1652 = vst.msk [vmem:[#allocation3 + $0xe8] sm:$0xff] %vm1622_vm7, %v1585_v32 }
 0x289   : > { %1447 = vst.msk [vmem:[#allocation3 + $0x90] sm:$0xff] %vm1428_vm6, %v1369_v53  ;;  %1966 = vrot.lane.b32.xlu0 %v1875_v23, %s5180_s8 }
 0x28a   : > { %1743 = vrot.lane.b32.xlu1 %v1667_v11, %s5179_s29  ;;  %v1681_v11 = vld [vmem:[#allocation2 + $0x169] sm:$0xff] }
 0x28b   : > { %v1589_v41 = vpop.permute.xlu0 %1588 }
 0x28c   : > { %v1373_v10 = vpop.permute.xlu1 %1372  ;;  %1654 = vst.msk [vmem:[#allocation3 + $0xf8] sm:$0xff] %vm1622_vm7, %v1589_v41 }
 0x28d   : > { %1449 = vst.msk [vmem:[#allocation3 + $0xa0] sm:$0xff] %vm1428_vm6, %v1373_v10  ;;  %1777 = vrot.lane.b32.xlu0 %v5863_v55, %s5179_s29  ;;  %v1850_v55 = vld [vmem:[#allocation2 + $0x4a] sm:$0xff] }
 0x28e   : > { %1747 = vrot.lane.b32.xlu1 %v1669_v6, %s5179_s29  ;;  %v1874_v10 = vld [vmem:[#allocation2 + $0x16a] sm:$0xff] }
 0x28f   : > { %v1722_v35 = vpop.permute.xlu0 %1721 }
 0x290   : > { %v1377_v5 = vpop.permute.xlu1 %1376  ;;  %1817 = vst.msk [vmem:[#allocation3 + $0x8] sm:$0xff] %vm1815_vm8, %v1722_v35  ;;  %v1879_v35 = vld [vmem:[#allocation2 + $0x1a2] sm:$0xff] }
 0x291   : > { %1451 = vst.msk [vmem:[#allocation3 + $0xb0] sm:$0xff] %vm1428_vm6, %v1377_v5  ;;  %1970 = vrot.lane.b32.xlu0 %v5966_v17, %s5180_s8  ;;  %v1686_v5 = vld [vmem:[#allocation2 + $0x1a1] sm:$0xff] }
 0x292   : > { %1912 = vrot.lane.b32.xlu1 %v1848_v20, %s5180_s8 }
 0x293   : > { %v1726_v56 = vpop.permute.xlu0 %1725 }
 0x294   : > { %v1381_v54 = vpop.permute.xlu1 %1380  ;;  %1819 = vst.msk [vmem:[#allocation3 + $0x18] sm:$0xff] %vm1815_vm8, %v1726_v56  ;;  %v1685_v56 = vld [vmem:[#allocation2 + $0x199] sm:$0xff] }
 0x295   : > { %1453 = vst.msk [vmem:[#allocation3 + $0xc0] sm:$0xff] %vm1428_vm6, %v1381_v54  ;;  %1781 = vrot.lane.b32.xlu0 %v1686_v5, %s5179_s29 }
 0x296   : > { %1916 = vrot.lane.b32.xlu1 %v1850_v55, %s5180_s8 }
 0x297   : > { %v1730_v33 = vpop.permute.xlu0 %1729 }
 0x298   : > { %v1385_v44 = vpop.permute.xlu1 %1384  ;;  %1821 = vst.msk [vmem:[#allocation3 + $0x28] sm:$0xff] %vm1815_vm8, %v1730_v33 }
 0x299   : > { %1455 = vst.msk [vmem:[#allocation3 + $0xd0] sm:$0xff] %vm1428_vm6, %v1385_v44  ;;  %1974 = vrot.lane.b32.xlu0 %v1879_v35, %s5180_s8 }
 0x29a   : > { %1920 = vrot.lane.b32.xlu1 %v1852_v22, %s5180_s8 }
 0x29b   : > { %v1734_v17 = vpop.permute.xlu0 %1733 }
 0x29c   : > { %v1389_v3 = vpop.permute.xlu1 %1388  ;;  %1823 = vst.msk [vmem:[#allocation3 + $0x38] sm:$0xff] %vm1815_vm8, %v1734_v17 }
 0x29d   : > { %1457 = vst.msk [vmem:[#allocation3 + $0xe0] sm:$0xff] %vm1428_vm6, %v1389_v3 }
 0x29e   : > { %1924 = vrot.lane.b32.xlu1 %v1854_v7, %s5180_s8 }
 0x29f   : > { %v1738_v63 = vpop.permute.xlu0 %1737 }
 0x2a0   : > { %v1393_v59 = vpop.permute.xlu1 %1392  ;;  %1825 = vst.msk [vmem:[#allocation3 + $0x48] sm:$0xff] %vm1815_vm8, %v1738_v63 }
 0x2a1   : > { %1459 = vst.msk [vmem:[#allocation3 + $0xf0] sm:$0xff] %vm1428_vm6, %v1393_v59 }
 0x2a2   : > { %1928 = vrot.lane.b32.xlu1 %v1856_v39, %s5180_s8 }
 0x2a3   : > { %v1742_v28 = vpop.permute.xlu0 %1741 }
 0x2a4   : > { %v1527_v15 = vpop.permute.xlu1 %1526  ;;  %1827 = vst.msk [vmem:[#allocation3 + $0x58] sm:$0xff] %vm1815_vm8, %v1742_v28 }
 0x2a5   : > { %1623 = vst.msk [vmem:[#allocation3] sm:$0xff] %vm1622_vm7, %v1527_v15 }
 0x2a6   : > { %1932 = vrot.lane.b32.xlu1 %v1858_v61, %s5180_s8 }
 0x2a7   : > { %v1746_v13 = vpop.permute.xlu0 %1745 }
 0x2a8   : > { %v1531_v47 = vpop.permute.xlu1 %1530  ;;  %1829 = vst.msk [vmem:[#allocation3 + $0x68] sm:$0xff] %vm1815_vm8, %v1746_v13 }
 0x2a9   : > { %1625 = vst.msk [vmem:[#allocation3 + $0x10] sm:$0xff] %vm1622_vm7, %v1531_v47 }
 0x2aa   : > { %1936 = vrot.lane.b32.xlu1 %v1860_v50, %s5180_s8 }
 0x2ab   : > { %v1750_v45 = vpop.permute.xlu0 %1749 }
 0x2ac   : > { %v1535_v34 = vpop.permute.xlu1 %1534  ;;  %1831 = vst.msk [vmem:[#allocation3 + $0x78] sm:$0xff] %vm1815_vm8, %v1750_v45 }
 0x2ad   : > { %1627 = vst.msk [vmem:[#allocation3 + $0x20] sm:$0xff] %vm1622_vm7, %v1535_v34 }
 0x2ae   : > { %1940 = vrot.lane.b32.xlu1 %v1862_v27, %s5180_s8 }
 0x2af   : > { %v1915_v12 = vpop.permute.xlu0 %1914 }
 0x2b0   : > { %v1539_v40 = vpop.permute.xlu1 %1538  ;;  %2010 = vst.msk [vmem:[#allocation3 + $0x8] sm:$0xff] %vm2008_vm9, %v1915_v12 }
 0x2b1   : > { %1629 = vst.msk [vmem:[#allocation3 + $0x30] sm:$0xff] %vm1622_vm7, %v1539_v40 }
 0x2b2   : > { %1751 = vrot.lane.b32.xlu1 %v1671_v0, %s5179_s29 }
 0x2b3   : > { %v1919_v18 = vpop.permute.xlu0 %1918 }
 0x2b4   : > { %v1543_v46 = vpop.permute.xlu1 %1542  ;;  %2012 = vst.msk [vmem:[#allocation3 + $0x18] sm:$0xff] %vm2008_vm9, %v1919_v18 }
 0x2b5   : > { %1631 = vst.msk [vmem:[#allocation3 + $0x40] sm:$0xff] %vm1622_vm7, %v1543_v46 }
 0x2b6   : > { %1944 = vrot.lane.b32.xlu1 %v1864_v4, %s5180_s8 }
 0x2b7   : > { %v1923_v52 = vpop.permute.xlu0 %1922  ;;  %v2042_v27 = vld [vmem:[#allocation3 + $0x8] sm:$0xff] }
 0x2b8   : > { %v1547_v24 = vpop.permute.xlu1 %1546  ;;  %2014 = vst.msk [vmem:[#allocation3 + $0x28] sm:$0xff] %vm2008_vm9, %v1923_v52 }
 0x2b9   : > { %1633 = vst.msk [vmem:[#allocation3 + $0x50] sm:$0xff] %vm1622_vm7, %v1547_v24 }
 0x2ba   : > { %1755 = vrot.lane.b32.xlu1 %v1673_v8, %s5179_s29 }
 0x2bb   : > { %v1927_v14 = vpop.permute.xlu0 %1926  ;;  %v2044_v0 = vld [vmem:[#allocation3 + $0x18] sm:$0xff] }
 0x2bc   : > { %v1551_v30 = vpop.permute.xlu1 %1550  ;;  %2016 = vst.msk [vmem:[#allocation3 + $0x38] sm:$0xff] %vm2008_vm9, %v1927_v14 }
 0x2bd   : > { %1635 = vst.msk [vmem:[#allocation3 + $0x60] sm:$0xff] %vm1622_vm7, %v1551_v30 }
 0x2be   : > { %1948 = vrot.lane.b32.xlu1 %v1866_v36, %s5180_s8 }
 0x2bf   : > { %v1931_v19 = vpop.permute.xlu0 %1930  ;;  %v2046_v4 = vld [vmem:[#allocation3 + $0x28] sm:$0xff] }
 0x2c0   : > { %v1555_v26 = vpop.permute.xlu1 %1554  ;;  %2018 = vst.msk [vmem:[#allocation3 + $0x48] sm:$0xff] %vm2008_vm9, %v1931_v19 }
 0x2c1   : > { %1637 = vst.msk [vmem:[#allocation3 + $0x70] sm:$0xff] %vm1622_vm7, %v1555_v26 }
 0x2c2   : > { %1759 = vrot.lane.b32.xlu1 %v1675_v2, %s5179_s29 }
 0x2c3   : > { %v1935_v42 = vpop.permute.xlu0 %1934  ;;  %v2048_v8 = vld [vmem:[#allocation3 + $0x38] sm:$0xff] }
 0x2c4   : > { %v1559_v25 = vpop.permute.xlu1 %1558  ;;  %2020 = vst.msk [vmem:[#allocation3 + $0x58] sm:$0xff] %vm2008_vm9, %v1935_v42 }
 0x2c5   : > { %1639 = vst.msk [vmem:[#allocation3 + $0x80] sm:$0xff] %vm1622_vm7, %v1559_v25 }
 0x2c6   : > { %1952 = vrot.lane.b32.xlu1 %v1868_v38, %s5180_s8 }
 0x2c7   : > { %v1939_v31 = vpop.permute.xlu0 %1938  ;;  %v2050_v36 = vld [vmem:[#allocation3 + $0x48] sm:$0xff] }
 0x2c8   : > { %v1563_v51 = vpop.permute.xlu1 %1562  ;;  %2022 = vst.msk [vmem:[#allocation3 + $0x68] sm:$0xff] %vm2008_vm9, %v1939_v31 }
 0x2c9   : > { %1641 = vst.msk [vmem:[#allocation3 + $0x90] sm:$0xff] %vm1622_vm7, %v1563_v51 }
 0x2ca   : > { %1763 = vrot.lane.b32.xlu1 %v1677_v58, %s5179_s29 }
 0x2cb   : > { %v1943_v57 = vpop.permute.xlu0 %1942  ;;  %v2052_v2 = vld [vmem:[#allocation3 + $0x58] sm:$0xff] }
 0x2cc   : > { %v1567_v37 = vpop.permute.xlu1 %1566  ;;  %2024 = vst.msk [vmem:[#allocation3 + $0x78] sm:$0xff] %vm2008_vm9, %v1943_v57 }
 0x2cd   : > { %1643 = vst.msk [vmem:[#allocation3 + $0xa0] sm:$0xff] %vm1622_vm7, %v1567_v37 }
 0x2ce   : > { %1956 = vrot.lane.b32.xlu1 %v1870_v43, %s5180_s8 }
 0x2cf   : > { %v1754_v1 = vpop.permute.xlu0 %1753  ;;  %v2054_v38 = vld [vmem:[#allocation3 + $0x68] sm:$0xff] }
 0x2d0   : > { %v1571_v48 = vpop.permute.xlu1 %1570  ;;  %1833 = vst.msk [vmem:[#allocation3 + $0x88] sm:$0xff] %vm1815_vm8, %v1754_v1 }
 0x2d1   : > { %1645 = vst.msk [vmem:[#allocation3 + $0xb0] sm:$0xff] %vm1622_vm7, %v1571_v48 }
 0x2d2   : > { %1767 = vrot.lane.b32.xlu1 %v1679_v49, %s5179_s29 }
 0x2d3   : > { %v1947_v29 = vpop.permute.xlu0 %1946  ;;  %v2056_v58 = vld [vmem:[#allocation3 + $0x78] sm:$0xff] }
 0x2d4   : > { %v1575_v9 = vpop.permute.xlu1 %1574  ;;  %2026 = vst.msk [vmem:[#allocation3 + $0x88] sm:$0xff] %vm2008_vm9, %v1947_v29 }
 0x2d5   : > { %1647 = vst.msk [vmem:[#allocation3 + $0xc0] sm:$0xff] %vm1622_vm7, %v1575_v9 }
 0x2d6   : > { %1960 = vrot.lane.b32.xlu1 %v1872_v62, %s5180_s8 }
 0x2d7   : > { %v1758_v32 = vpop.permute.xlu0 %1757 }
 0x2d8   : > { %v1579_v53 = vpop.permute.xlu1 %1578  ;;  %1835 = vst.msk [vmem:[#allocation3 + $0x98] sm:$0xff] %vm1815_vm8, %v1758_v32 }
 0x2d9   : > { %1649 = vst.msk [vmem:[#allocation3 + $0xd0] sm:$0xff] %vm1622_vm7, %v1579_v53 }
 0x2da   : > { %1771 = vrot.lane.b32.xlu1 %v1681_v11, %s5179_s29 }
 0x2db   : > { %v1951_v16 = vpop.permute.xlu0 %1950  ;;  %v2058_v48 = vld [vmem:[#allocation3 + $0x88] sm:$0xff] }
 0x2dc   : > { %v1583_v23 = vpop.permute.xlu1 %1582  ;;  %2028 = vst.msk [vmem:[#allocation3 + $0x98] sm:$0xff] %vm2008_vm9, %v1951_v16 }
 0x2dd   : > { %1651 = vst.msk [vmem:[#allocation3 + $0xe0] sm:$0xff] %vm1622_vm7, %v1583_v23 }
 0x2de   : > { %1964 = vrot.lane.b32.xlu1 %v1874_v10, %s5180_s8 }
 0x2df   : > { %v1762_v6 = vpop.permute.xlu0 %1761 }
 0x2e0   : > { %v1587_v41 = vpop.permute.xlu1 %1586  ;;  %1837 = vst.msk [vmem:[#allocation3 + $0xa8] sm:$0xff] %vm1815_vm8, %v1762_v6 }
 0x2e1   : > { %1653 = vst.msk [vmem:[#allocation3 + $0xf0] sm:$0xff] %vm1622_vm7, %v1587_v41 }
 0x2e2   : > { %1775 = vrot.lane.b32.xlu1 %v5998_v60, %s5179_s29  ;;  %v1878_v60 = vld [vmem:[#allocation2 + $0x19a] sm:$0xff] }
 0x2e3   : > { %v1955_v54 = vpop.permute.xlu0 %1954  ;;  %v2060_v29 = vld [vmem:[#allocation3 + $0x98] sm:$0xff] }
 0x2e4   : > { %v1720_v20 = vpop.permute.xlu1 %1719  ;;  %2030 = vst.msk [vmem:[#allocation3 + $0xa8] sm:$0xff] %vm2008_vm9, %v1955_v54 }
 0x2e5   : > { %1816 = vst.msk [vmem:[#allocation3] sm:$0xff] %vm1815_vm8, %v1720_v20 }
 0x2e6   : > { %1968 = vrot.lane.b32.xlu1 %v6091_v21, %s5180_s8 }
 0x2e7   : > { %v1766_v44 = vpop.permute.xlu0 %1765 }
 0x2e8   : > { %v1724_v55 = vpop.permute.xlu1 %1723  ;;  %1839 = vst.msk [vmem:[#allocation3 + $0xb8] sm:$0xff] %vm1815_vm8, %v1766_v44 }
 0x2e9   : > { %1818 = vst.msk [vmem:[#allocation3 + $0x10] sm:$0xff] %vm1815_vm8, %v1724_v55 }
 0x2ea   : > { %1779 = vrot.lane.b32.xlu1 %v1685_v56, %s5179_s29 }
 0x2eb   : > { %v1959_v22 = vpop.permute.xlu0 %1958  ;;  %v2062_v11 = vld [vmem:[#allocation3 + $0xa8] sm:$0xff] }
 0x2ec   : > { %v1728_v33 = vpop.permute.xlu1 %1727  ;;  %2032 = vst.msk [vmem:[#allocation3 + $0xb8] sm:$0xff] %vm2008_vm9, %v1959_v22 }
 0x2ed   : > { %1820 = vst.msk [vmem:[#allocation3 + $0x20] sm:$0xff] %vm1815_vm8, %v1728_v33 }
 0x2ee   : > { %1972 = vrot.lane.b32.xlu1 %v1878_v60, %s5180_s8 }
 0x2ef   : > { %v1770_v3 = vpop.permute.xlu0 %1769 }
 0x2f0   : > { %v1732_v21 = vpop.permute.xlu1 %1731  ;;  %1841 = vst.msk [vmem:[#allocation3 + $0xc8] sm:$0xff] %vm1815_vm8, %v1770_v3 }
 0x2f1   : > { %1822 = vst.msk [vmem:[#allocation3 + $0x30] sm:$0xff] %vm1815_vm8, %v1732_v21 }
 0x2f3   : > { %v1963_v7 = vpop.permute.xlu0 %1962  ;;  %v2064_v41 = vld [vmem:[#allocation3 + $0xb8] sm:$0xff] }
 0x2f4   : > { %v1736_v17 = vpop.permute.xlu1 %1735  ;;  %2034 = vst.msk [vmem:[#allocation3 + $0xc8] sm:$0xff] %vm2008_vm9, %v1963_v7 }
 0x2f5   : > { %1824 = vst.msk [vmem:[#allocation3 + $0x40] sm:$0xff] %vm1815_vm8, %v1736_v17 }
 0x2f7   : > { %v1774_v63 = vpop.permute.xlu0 %1773 }
 0x2f8   : > { %v1740_v59 = vpop.permute.xlu1 %1739  ;;  %1843 = vst.msk [vmem:[#allocation3 + $0xd8] sm:$0xff] %vm1815_vm8, %v1774_v63  ;;  %v2611_v63 = vld [vmem:[#allocation2 + $0x9] sm:$0xff] }
 0x2f9   : > { %1826 = vst.msk [vmem:[#allocation3 + $0x50] sm:$0xff] %vm1815_vm8, %v1740_v59  ;;  %2676 = vrot.lane.b32.xlu0 %v2611_v63, %s5173_s18 }
 0x2fb   : > { %v1967_v15 = vpop.permute.xlu0 %1966  ;;  %v2066_v20 = vld [vmem:[#allocation3 + $0xc8] sm:$0xff] }
 0x2fc   : > { %v1744_v39 = vpop.permute.xlu1 %1743  ;;  %2036 = vst.msk [vmem:[#allocation3 + $0xd8] sm:$0xff] %vm2008_vm9, %v1967_v15  ;;  %v2547_v15 = vld [vmem:[#allocation2 + $0x8] sm:$0xff] }
 0x2fd   : > { %1828 = vst.msk [vmem:[#allocation3 + $0x60] sm:$0xff] %vm1815_vm8, %v1744_v39  ;;  %v2610_v39 = vld [vmem:[#allocation2 + $0x1] sm:$0xff] }
 0x2fe   : > { %2674 = vrot.lane.b32.xlu1 %v2610_v39, %s5173_s18  ;;  %2579 = vst.msk [vmem:[#allocation3 + $0x8] sm:$0xff] %vm277_vm0, %v2547_v15 }
 0x2ff   : > { %v1778_v61 = vpop.permute.xlu0 %1777 }
 0x300   : > { %v1748_v28 = vpop.permute.xlu1 %1747  ;;  %1845 = vst.msk [vmem:[#allocation3 + $0xe8] sm:$0xff] %vm1815_vm8, %v1778_v61  ;;  %v6381_v61 = vld [vmem:[%s7460_s3] ss:$0 sm:$0xff] }
 0x301   : > { %1830 = vst.msk [vmem:[#allocation3 + $0x70] sm:$0xff] %vm1815_vm8, %v1748_v28  ;;  %v2546_v28 = vld [vmem:[#allocation2] sm:$0xff] }
 0x303   : > { %v1971_v13 = vpop.permute.xlu0 %1970  ;;  %v2068_v33 = vld [vmem:[#allocation3 + $0xd8] sm:$0xff] }
 0x304   : > { %v1913_v47 = vpop.permute.xlu1 %1912  ;;  %2038 = vst.msk [vmem:[#allocation3 + $0xe8] sm:$0xff] %vm2008_vm9, %v1971_v13 }
 0x305   : > { %2009 = vst.msk [vmem:[#allocation3] sm:$0xff] %vm2008_vm9, %v1913_v47 }
 0x307   : > { %v1782_v56 = vpop.permute.xlu0 %1781 }
 0x308   : > { %v1917_v50 = vpop.permute.xlu1 %1916  ;;  %1847 = vst.msk [vmem:[#allocation3 + $0xf8] sm:$0xff] %vm1815_vm8, %v1782_v56 }
 0x309   : > { %2011 = vst.msk [vmem:[#allocation3 + $0x10] sm:$0xff] %vm2008_vm9, %v1917_v50  ;;  %v6386_v50 = vld [vmem:[%s7461_s4] ss:$0 sm:$0xff] }
 0x30b   : > { %v1975_v60 = vpop.permute.xlu0 %1974  ;;  %v2070_v17 = vld [vmem:[#allocation3 + $0xe8] sm:$0xff] }
 0x30c   : > { %v1921_v34 = vpop.permute.xlu1 %1920  ;;  %v2041_v45 = vld [vmem:[#allocation3] sm:$0xff]  ;;  %2040 = vst.msk [vmem:[#allocation3 + $0xf8] sm:$0xff] %vm2008_vm9, %v1975_v60 }
 0x30d   : > { %2013 = vst.msk [vmem:[#allocation3 + $0x20] sm:$0xff] %vm2008_vm9, %v1921_v34  ;;  %4914 = vmatprep.mubr.msk.f32.mxu0 %vm2082_vm10, %v2041_v45 }
 0x30e   : > { %4915 = vmatmul.mubr.msk.f32.vlgmr.msra.gmra.mrb[0].mxu0 %vm2082_vm10, %v2042_v27  ;;  %2578 = vst.msk [vmem:[#allocation3] sm:$0xff] %vm277_vm0, %v2546_v28 }
 0x310   : > { %v1925_v40 = vpop.permute.xlu1 %1924  ;;  %v2043_v12 = vld [vmem:[#allocation3 + $0x10] sm:$0xff] }
 0x311   : > { %2015 = vst.msk [vmem:[#allocation3 + $0x30] sm:$0xff] %vm2008_vm9, %v1925_v40  ;;  %4917 = vmatprep.mubr.msk.f32.mxu0 %vm2082_vm10, %v2043_v12 }
 0x312   : > { %4918 = vmatmul.mubr.msk.f32.gmra.mrb[2].mxu0 %vm2082_vm10, %v2044_v0 }
 0x313   : > { %v2072_v7 = vld [vmem:[#allocation3 + $0xf8] sm:$0xff] }
 0x314   : > { %v1929_v46 = vpop.permute.xlu1 %1928  ;;  %v2045_v18 = vld [vmem:[#allocation3 + $0x20] sm:$0xff] }
 0x315   : > { %2017 = vst.msk [vmem:[#allocation3 + $0x40] sm:$0xff] %vm2008_vm9, %v1929_v46  ;;  %4920 = vmatprep.mubr.msk.f32.mxu0 %vm2082_vm10, %v2045_v18 }
 0x316   : > { %4921 = vmatmul.mubr.msk.f32.gmra.mrb[4].mxu0 %vm2082_vm10, %v2046_v4 }
 0x318   : > { %v1933_v24 = vpop.permute.xlu1 %1932  ;;  %v2047_v52 = vld [vmem:[#allocation3 + $0x30] sm:$0xff] }
 0x319   : > { %2019 = vst.msk [vmem:[#allocation3 + $0x50] sm:$0xff] %vm2008_vm9, %v1933_v24  ;;  %4923 = vmatprep.mubr.msk.f32.mxu0 %vm2082_vm10, %v2047_v52 }
 0x31a   : > { %4924 = vmatmul.mubr.msk.f32.gmra.mrb[6].mxu0 %vm2082_vm10, %v2048_v8 }
 0x31c   : > { %v1937_v30 = vpop.permute.xlu1 %1936  ;;  %v2049_v14 = vld [vmem:[#allocation3 + $0x40] sm:$0xff] }
 0x31d   : > { %2021 = vst.msk [vmem:[#allocation3 + $0x60] sm:$0xff] %vm2008_vm9, %v1937_v30  ;;  %4926 = vmatprep.mubr.msk.f32.mxu0 %vm2082_vm10, %v2049_v14 }
 0x31e   : > { %4927 = vmatmul.mubr.msk.f32.gmra.mrb[8].mxu0 %vm2082_vm10, %v2050_v36 }
 0x320   : > { %v1941_v26 = vpop.permute.xlu1 %1940  ;;  %v2051_v19 = vld [vmem:[#allocation3 + $0x50] sm:$0xff] }
 0x321   : > { %2023 = vst.msk [vmem:[#allocation3 + $0x70] sm:$0xff] %vm2008_vm9, %v1941_v26  ;;  %4929 = vmatprep.mubr.msk.f32.mxu0 %vm2082_vm10, %v2051_v19 }
 0x322   : > { %4930 = vmatmul.mubr.msk.f32.gmra.mrb[10].mxu0 %vm2082_vm10, %v2052_v2 }
 0x324   : > { %v1752_v25 = vpop.permute.xlu1 %1751  ;;  %v2053_v42 = vld [vmem:[#allocation3 + $0x60] sm:$0xff] }
 0x325   : > { %1832 = vst.msk [vmem:[#allocation3 + $0x80] sm:$0xff] %vm1815_vm8, %v1752_v25  ;;  %4932 = vmatprep.mubr.msk.f32.mxu0 %vm2082_vm10, %v2053_v42 }
 0x326   : > { %4933 = vmatmul.mubr.msk.f32.gmra.mrb[12].mxu0 %vm2082_vm10, %v2054_v38 }
 0x328   : > { %v1945_v51 = vpop.permute.xlu1 %1944  ;;  %v2055_v31 = vld [vmem:[#allocation3 + $0x70] sm:$0xff] }
 0x329   : > { %2025 = vst.msk [vmem:[#allocation3 + $0x80] sm:$0xff] %vm2008_vm9, %v1945_v51  ;;  %4935 = vmatprep.mubr.msk.f32.mxu0 %vm2082_vm10, %v2055_v31 }
 0x32a   : > { %4936 = vmatmul.mubr.msk.f32.gmra.mrb[14].mxu0 %vm2082_vm10, %v2056_v58 }
 0x32c   : > { %v1756_v37 = vpop.permute.xlu1 %1755 }
 0x32d   : > { %1834 = vst.msk [vmem:[#allocation3 + $0x90] sm:$0xff] %vm1815_vm8, %v1756_v37 }
 0x330   : > { %v1949_v57 = vpop.permute.xlu1 %1948  ;;  %v2057_v43 = vld [vmem:[#allocation3 + $0x80] sm:$0xff] }
 0x331   : > { %2027 = vst.msk [vmem:[#allocation3 + $0x90] sm:$0xff] %vm2008_vm9, %v1949_v57  ;;  %4938 = vmatprep.mubr.msk.f32.mxu0 %vm2082_vm10, %v2057_v43 }
 0x332   : > { %4939 = vmatmul.mubr.msk.f32.gmra.mrb[16].mxu0 %vm2082_vm10, %v2058_v48 }
 0x334   : > { %v1760_v1 = vpop.permute.xlu1 %1759 }
 0x335   : > { %1836 = vst.msk [vmem:[#allocation3 + $0xa0] sm:$0xff] %vm1815_vm8, %v1760_v1 }
 0x338   : > { %v1953_v49 = vpop.permute.xlu1 %1952  ;;  %v2059_v9 = vld [vmem:[#allocation3 + $0x90] sm:$0xff] }
 0x339   : > { %2029 = vst.msk [vmem:[#allocation3 + $0xa0] sm:$0xff] %vm2008_vm9, %v1953_v49  ;;  %4941 = vmatprep.mubr.msk.f32.mxu0 %vm2082_vm10, %v2059_v9 }
 0x33a   : > { %4942 = vmatmul.mubr.msk.f32.gmra.mrb[18].mxu0 %vm2082_vm10, %v2060_v29 }
 0x33c   : > { %v1764_v62 = vpop.permute.xlu1 %1763 }
 0x33d   : > { %1838 = vst.msk [vmem:[#allocation3 + $0xb0] sm:$0xff] %vm1815_vm8, %v1764_v62 }
 0x340   : > { %v1957_v53 = vpop.permute.xlu1 %1956  ;;  %v2061_v32 = vld [vmem:[#allocation3 + $0xa0] sm:$0xff] }
 0x341   : > { %2031 = vst.msk [vmem:[#allocation3 + $0xb0] sm:$0xff] %vm2008_vm9, %v1957_v53  ;;  %4944 = vmatprep.mubr.msk.f32.mxu0 %vm2082_vm10, %v2061_v32 }
 0x342   : > { %4945 = vmatmul.mubr.msk.f32.gmra.mrb[20].mxu0 %vm2082_vm10, %v2062_v11 }
 0x344   : > { %v1768_v23 = vpop.permute.xlu1 %1767 }
 0x345   : > { %1840 = vst.msk [vmem:[#allocation3 + $0xc0] sm:$0xff] %vm1815_vm8, %v1768_v23 }
 0x348   : > { %v1961_v16 = vpop.permute.xlu1 %1960  ;;  %v2063_v10 = vld [vmem:[#allocation3 + $0xb0] sm:$0xff] }
 0x349   : > { %2033 = vst.msk [vmem:[#allocation3 + $0xc0] sm:$0xff] %vm2008_vm9, %v1961_v16  ;;  %4947 = vmatprep.mubr.msk.f32.mxu0 %vm2082_vm10, %v2063_v10 }
 0x34a   : > { %4948 = vmatmul.mubr.msk.f32.gmra.mrb[22].mxu0 %vm2082_vm10, %v2064_v41 }
 0x34c   : > { %v1772_v6 = vpop.permute.xlu1 %1771 }
 0x34d   : > { %1842 = vst.msk [vmem:[#allocation3 + $0xd0] sm:$0xff] %vm1815_vm8, %v1772_v6 }
 0x350   : > { %v1965_v5 = vpop.permute.xlu1 %1964  ;;  %v2065_v35 = vld [vmem:[#allocation3 + $0xc0] sm:$0xff] }
 0x351   : > { %2035 = vst.msk [vmem:[#allocation3 + $0xd0] sm:$0xff] %vm2008_vm9, %v1965_v5  ;;  %4950 = vmatprep.mubr.msk.f32.mxu0 %vm2082_vm10, %v2065_v35 }
 0x352   : > { %4951 = vmatmul.mubr.msk.f32.gmra.mrb[24].mxu0 %vm2082_vm10, %v2066_v20 }
 0x354   : > { %v1776_v54 = vpop.permute.xlu1 %1775 }
 0x355   : > { %1844 = vst.msk [vmem:[#allocation3 + $0xe0] sm:$0xff] %vm1815_vm8, %v1776_v54 }
 0x358   : > { %v1969_v55 = vpop.permute.xlu1 %1968  ;;  %v2067_v44 = vld [vmem:[#allocation3 + $0xd0] sm:$0xff] }
 0x359   : > { %2037 = vst.msk [vmem:[#allocation3 + $0xe0] sm:$0xff] %vm2008_vm9, %v1969_v55  ;;  %4953 = vmatprep.mubr.msk.f32.mxu0 %vm2082_vm10, %v2067_v44 }
 0x35a   : > { %4954 = vmatmul.mubr.msk.f32.gmra.mrb[26].mxu0 %vm2082_vm10, %v2068_v33 }
 0x35c   : > { %v1780_v22 = vpop.permute.xlu1 %1779 }
 0x35d   : > { %1846 = vst.msk [vmem:[#allocation3 + $0xf0] sm:$0xff] %vm1815_vm8, %v1780_v22 }
 0x360   : > { %v2069_v21 = vld [vmem:[#allocation3 + $0xe0] sm:$0xff]  ;;  %v1973_v3 = vpop.permute.xlu1 %1972 }
 0x361   : > { %4956 = vmatprep.mubr.msk.f32.mxu0 %vm2082_vm10, %v2069_v21  ;;  %2039 = vst.msk [vmem:[#allocation3 + $0xf0] sm:$0xff] %vm2008_vm9, %v1973_v3 }
 0x362   : > { %4957 = vmatmul.mubr.msk.f32.gmra.mrb[28].mxu0 %vm2082_vm10, %v2070_v17 }
 0x368   : > { %v2071_v59 = vld [vmem:[#allocation3 + $0xf0] sm:$0xff] }
 0x369   : > { %4959 = vmatprep.mubr.msk.f32.mxu0 %vm2082_vm10, %v2071_v59 }
 0x36a   : > { %4960 = vmatmul.mubr.msk.f32.gmra.mrb[30].mxu0 %vm2082_vm10, %v2072_v7 }
 0x36b   : > { %v2677_v47 = vpop.permute.xlu0 %2676 }
 0x36c   : > { %2771 = vst.msk [vmem:[#allocation3 + $0x8] sm:$0xff] %vm656_vm2, %v2677_v47 }
 0x370   : > { %v2675_v34 = vpop.permute.xlu1 %2674 }
 0x371   : > { %2770 = vst.msk [vmem:[#allocation3] sm:$0xff] %vm656_vm2, %v2675_v34 }
 0x3e1   : > { %v4916_v13 = vpop.f32.mrb[0].mxu0 }
 0x3e2   : > { %v2412_v45 = vmul.f32 %v4916_v13, %v6381_v61  ;;  %v2245_v27 = vpop.f32.mrb[1].mxu0 }
 0x3e3   : > { %v2411_v40 = vmul.f32 %v6381_v61, %v2245_v27 }
 0x3e4   : > { %v2451_v12 = vadd.f32 %v6386_v50, %v2412_v45 }
 0x3e5   : > { %v2450_v0 = vadd.f32 %v6386_v50, %v2411_v40  ;;  %v4919_v46 = vpop.f32.mrb[2].mxu0 }
 0x3e6   : > { %v2483_v18 = vmax.f32 %v2451_v12, 0.0  ;;  %v2414_v4 = vmul.f32 %v4919_v46, %v6381_v61  ;;  %v2255_v24 = vpop.f32.mrb[3].mxu0 }
 0x3e7   : > { %v2482_v52 = vmax.f32 %v2450_v0, 0.0  ;;  %v2413_v8 = vmul.f32 %v6381_v61, %v2255_v24 }
 0x3e8   : > { %2515 = vst.msk [vmem:[#allocation2 + $0x21] sm:$0xff] %vm277_vm0, %v2483_v18  ;;  %v2453_v30 = vadd.f32 %v6386_v50, %v2414_v4 }
 0x3e9   : > { %2514 = vst.msk [vmem:[#allocation2 + $0x19] sm:$0xff] %vm277_vm0, %v2482_v52  ;;  %v2452_v14 = vadd.f32 %v6386_v50, %v2413_v8  ;;  %v4922_v36 = vpop.f32.mrb[4].mxu0 }
 0x3ea   : > { %v2485_v26 = vmax.f32 %v2453_v30, 0.0  ;;  %v2416_v19 = vmul.f32 %v4922_v36, %v6381_v61  ;;  %v2265_v2 = vpop.f32.mrb[5].mxu0 }
 0x3eb   : > { %v2484_v25 = vmax.f32 %v2452_v14, 0.0  ;;  %v2415_v42 = vmul.f32 %v6381_v61, %v2265_v2 }
 0x3ec   : > { %2517 = vst.msk [vmem:[#allocation2 + $0x39] sm:$0xff] %vm277_vm0, %v2485_v26  ;;  %v2455_v38 = vadd.f32 %v6386_v50, %v2416_v19 }
 0x3ed   : > { %2516 = vst.msk [vmem:[#allocation2 + $0x31] sm:$0xff] %vm277_vm0, %v2484_v25  ;;  %v2454_v51 = vadd.f32 %v6386_v50, %v2415_v42  ;;  %v4925_v31 = vpop.f32.mrb[6].mxu0 }
 0x3ee   : > { %v2487_v58 = vmax.f32 %v2455_v38, 0.0  ;;  %v2418_v37 = vmul.f32 %v4925_v31, %v6381_v61  ;;  %v2275_v57 = vpop.f32.mrb[7].mxu0 }
 0x3ef   : > { %v2486_v43 = vmax.f32 %v2454_v51, 0.0  ;;  %v2417_v48 = vmul.f32 %v6381_v61, %v2275_v57  ;;  %v6408_v1 = vld [vmem:[#allocation2 + $0x21] sm:$0xff] }
 0x3f0   : > { %2519 = vst.msk [vmem:[#allocation2 + $0x51] sm:$0xff] %vm277_vm0, %v2487_v58  ;;  %v2457_v49 = vadd.f32 %v6386_v50, %v2418_v37  ;;  %2680 = vrot.lane.b32.xlu0 %v6408_v1, %s5173_s18  ;;  %v6414_v9 = vld [vmem:[#allocation2 + $0x19] sm:$0xff] }
 0x3f1   : > { %v6416_v29 = vld [vmem:[#allocation2 + $0x20] sm:$0xff]  ;;  %2518 = vst.msk [vmem:[#allocation2 + $0x49] sm:$0xff] %vm277_vm0, %v2486_v43  ;;  %v2456_v62 = vadd.f32 %v6386_v50, %v2417_v48  ;;  %2678 = vrot.lane.b32.xlu1 %v6414_v9, %s5173_s18  ;;  %v4928_v53 = vpop.f32.mrb[8].mxu0  ;;  %v6424_v32 = vld [vmem:[#allocation2 + $0x18] sm:$0xff] }
 0x3f2   : > { %2581 = vst.msk [vmem:[#allocation3 + $0x18] sm:$0xff] %vm277_vm0, %v6416_v29  ;;  %v2489_v11 = vmax.f32 %v2457_v49, 0.0  ;;  %v2420_v23 = vmul.f32 %v4928_v53, %v6381_v61  ;;  %v2285_v16 = vpop.f32.mrb[9].mxu0  ;;  %2580 = vst.msk [vmem:[#allocation3 + $0x10] sm:$0xff] %vm277_vm0, %v6424_v32 }
 0x3f3   : > { %v2488_v10 = vmax.f32 %v2456_v62, 0.0  ;;  %v2419_v41 = vmul.f32 %v6381_v61, %v2285_v16  ;;  %v6430_v6 = vld [vmem:[#allocation2 + $0x39] sm:$0xff] }
 0x3f4   : > { %2521 = vst.msk [vmem:[#allocation2 + $0x69] sm:$0xff] %vm277_vm0, %v2489_v11  ;;  %v2459_v5 = vadd.f32 %v6386_v50, %v2420_v23  ;;  %2684 = vrot.lane.b32.xlu0 %v6430_v6, %s5173_s18  ;;  %v6436_v35 = vld [vmem:[#allocation2 + $0x31] sm:$0xff] }
 0x3f5   : > { %v6438_v20 = vld [vmem:[#allocation2 + $0x38] sm:$0xff]  ;;  %2520 = vst.msk [vmem:[#allocation2 + $0x61] sm:$0xff] %vm277_vm0, %v2488_v10  ;;  %v2458_v54 = vadd.f32 %v6386_v50, %v2419_v41  ;;  %2682 = vrot.lane.b32.xlu1 %v6436_v35, %s5173_s18  ;;  %v4931_v56 = vpop.f32.mrb[10].mxu0  ;;  %v6446_v55 = vld [vmem:[#allocation2 + $0x30] sm:$0xff] }
 0x3f6   : > { %2583 = vst.msk [vmem:[#allocation3 + $0x28] sm:$0xff] %vm277_vm0, %v6438_v20  ;;  %v2491_v44 = vmax.f32 %v2459_v5, 0.0  ;;  %v2422_v60 = vmul.f32 %v4931_v56, %v6381_v61  ;;  %v2295_v33 = vpop.f32.mrb[11].mxu0  ;;  %2582 = vst.msk [vmem:[#allocation3 + $0x20] sm:$0xff] %vm277_vm0, %v6446_v55 }
 0x3f7   : > { %v2490_v22 = vmax.f32 %v2458_v54, 0.0  ;;  %v2421_v21 = vmul.f32 %v6381_v61, %v2295_v33  ;;  %v6452_v3 = vld [vmem:[#allocation2 + $0x51] sm:$0xff] }
 0x3f8   : > { %2523 = vst.msk [vmem:[#allocation2 + $0x81] sm:$0xff] %vm277_vm0, %v2491_v44  ;;  %v2461_v17 = vadd.f32 %v6386_v50, %v2422_v60  ;;  %2688 = vrot.lane.b32.xlu0 %v6452_v3, %s5173_s18  ;;  %v6458_v7 = vld [vmem:[#allocation2 + $0x49] sm:$0xff] }
 0x3f9   : > { %v6460_v59 = vld [vmem:[#allocation2 + $0x50] sm:$0xff]  ;;  %2522 = vst.msk [vmem:[#allocation2 + $0x79] sm:$0xff] %vm277_vm0, %v2490_v22  ;;  %v2460_v63 = vadd.f32 %v6386_v50, %v2421_v21  ;;  %2686 = vrot.lane.b32.xlu1 %v6458_v7, %s5173_s18  ;;  %v4934_v39 = vpop.f32.mrb[12].mxu0  ;;  %v6468_v15 = vld [vmem:[#allocation2 + $0x48] sm:$0xff] }
 0x3fa   : > { %2585 = vst.msk [vmem:[#allocation3 + $0x38] sm:$0xff] %vm277_vm0, %v6460_v59  ;;  %v2493_v28 = vmax.f32 %v2461_v17, 0.0  ;;  %v2424_v47 = vmul.f32 %v4934_v39, %v6381_v61  ;;  %v2305_v13 = vpop.f32.mrb[13].mxu0  ;;  %2584 = vst.msk [vmem:[#allocation3 + $0x30] sm:$0xff] %vm277_vm0, %v6468_v15 }
 0x3fb   : > { %v2492_v34 = vmax.f32 %v2460_v63, 0.0  ;;  %v2423_v45 = vmul.f32 %v6381_v61, %v2305_v13  ;;  %v2619_v27 = vld [vmem:[#allocation2 + $0x69] sm:$0xff] }
 0x3fc   : > { %2525 = vst.msk [vmem:[#allocation2 + $0x99] sm:$0xff] %vm277_vm0, %v2493_v28  ;;  %v2463_v40 = vadd.f32 %v6386_v50, %v2424_v47  ;;  %2692 = vrot.lane.b32.xlu0 %v2619_v27, %s5173_s18  ;;  %v6477_v12 = vld [vmem:[#allocation2 + $0x61] sm:$0xff] }
 0x3fd   : > { %v6479_v0 = vld [vmem:[#allocation2 + $0x68] sm:$0xff]  ;;  %2524 = vst.msk [vmem:[#allocation2 + $0x91] sm:$0xff] %vm277_vm0, %v2492_v34  ;;  %v2462_v46 = vadd.f32 %v6386_v50, %v2423_v45  ;;  %2690 = vrot.lane.b32.xlu1 %v6477_v12, %s5173_s18  ;;  %v4937_v18 = vpop.f32.mrb[14].mxu0  ;;  %v6487_v4 = vld [vmem:[#allocation2 + $0x60] sm:$0xff] }
 0x3fe   : > { %2587 = vst.msk [vmem:[#allocation3 + $0x48] sm:$0xff] %vm277_vm0, %v6479_v0  ;;  %v2495_v24 = vmax.f32 %v2463_v40, 0.0  ;;  %v2426_v52 = vmul.f32 %v4937_v18, %v6381_v61  ;;  %v2315_v8 = vpop.f32.mrb[15].mxu0  ;;  %2586 = vst.msk [vmem:[#allocation3 + $0x40] sm:$0xff] %vm277_vm0, %v6487_v4 }
 0x3ff   : > { %v2494_v30 = vmax.f32 %v2462_v46, 0.0  ;;  %v2425_v14 = vmul.f32 %v6381_v61, %v2315_v8  ;;  %v2621_v36 = vld [vmem:[#allocation2 + $0x81] sm:$0xff] }
 0x400   : > { %2527 = vst.msk [vmem:[#allocation2 + $0xb1] sm:$0xff] %vm277_vm0, %v2495_v24  ;;  %v2465_v26 = vadd.f32 %v6386_v50, %v2426_v52  ;;  %2696 = vrot.lane.b32.xlu0 %v2621_v36, %s5173_s18  ;;  %v2620_v19 = vld [vmem:[#allocation2 + $0x79] sm:$0xff] }
 0x401   : > { %v6496_v2 = vld [vmem:[#allocation2 + $0x80] sm:$0xff]  ;;  %2526 = vst.msk [vmem:[#allocation2 + $0xa9] sm:$0xff] %vm277_vm0, %v2494_v30  ;;  %v2464_v25 = vadd.f32 %v6386_v50, %v2425_v14  ;;  %2694 = vrot.lane.b32.xlu1 %v2620_v19, %s5173_s18  ;;  %v6503_v42 = vld [vmem:[#allocation2 + $0x78] sm:$0xff] }
 0x402   : > { %2589 = vst.msk [vmem:[#allocation3 + $0x58] sm:$0xff] %vm277_vm0, %v6496_v2  ;;  %v2497_v38 = vmax.f32 %v2465_v26, 0.0  ;;  %2588 = vst.msk [vmem:[#allocation3 + $0x50] sm:$0xff] %vm277_vm0, %v6503_v42 }
 0x403   : > { %v2496_v51 = vmax.f32 %v2464_v25, 0.0  ;;  %v2623_v31 = vld [vmem:[#allocation2 + $0x99] sm:$0xff] }
 0x404   : > { %2529 = vst.msk [vmem:[#allocation2 + $0xc9] sm:$0xff] %vm277_vm0, %v2497_v38  ;;  %2700 = vrot.lane.b32.xlu0 %v2623_v31, %s5173_s18  ;;  %v2622_v58 = vld [vmem:[#allocation2 + $0x91] sm:$0xff] }
 0x405   : > { %v6509_v37 = vld [vmem:[#allocation2 + $0x98] sm:$0xff]  ;;  %2528 = vst.msk [vmem:[#allocation2 + $0xc1] sm:$0xff] %vm277_vm0, %v2496_v51  ;;  %2698 = vrot.lane.b32.xlu1 %v2622_v58, %s5173_s18  ;;  %v4940_v57 = vpop.f32.mrb[16].mxu0  ;;  %v6515_v43 = vld [vmem:[#allocation2 + $0x90] sm:$0xff] }
 0x406   : > { %2591 = vst.msk [vmem:[#allocation3 + $0x68] sm:$0xff] %vm277_vm0, %v6509_v37  ;;  %v2428_v48 = vmul.f32 %v4940_v57, %v6381_v61  ;;  %v2325_v49 = vpop.f32.mrb[17].mxu0  ;;  %2590 = vst.msk [vmem:[#allocation3 + $0x60] sm:$0xff] %vm277_vm0, %v6515_v43 }
 0x407   : > { %v2427_v62 = vmul.f32 %v6381_v61, %v2325_v49  ;;  %v2625_v53 = vld [vmem:[#allocation2 + $0xb1] sm:$0xff] }
 0x408   : > { %v2467_v11 = vadd.f32 %v6386_v50, %v2428_v48  ;;  %2704 = vrot.lane.b32.xlu0 %v2625_v53, %s5173_s18  ;;  %v2624_v23 = vld [vmem:[#allocation2 + $0xa9] sm:$0xff] }
 0x409   : > { %v6523_v16 = vld [vmem:[#allocation2 + $0xb0] sm:$0xff]  ;;  %v2466_v10 = vadd.f32 %v6386_v50, %v2427_v62  ;;  %2702 = vrot.lane.b32.xlu1 %v2624_v23, %s5173_s18  ;;  %v6529_v41 = vld [vmem:[#allocation2 + $0xa8] sm:$0xff] }
 0x40a   : > { %2593 = vst.msk [vmem:[#allocation3 + $0x78] sm:$0xff] %vm277_vm0, %v6523_v16  ;;  %v2499_v5 = vmax.f32 %v2467_v11, 0.0  ;;  %2592 = vst.msk [vmem:[#allocation3 + $0x70] sm:$0xff] %vm277_vm0, %v6529_v41 }
 0x40b   : > { %v2498_v54 = vmax.f32 %v2466_v10, 0.0  ;;  %v2627_v56 = vld [vmem:[#allocation2 + $0xc9] sm:$0xff] }
 0x40c   : > { %2531 = vst.msk [vmem:[#allocation2 + $0xe1] sm:$0xff] %vm277_vm0, %v2499_v5  ;;  %2708 = vrot.lane.b32.xlu0 %v2627_v56, %s5173_s18  ;;  %v2626_v44 = vld [vmem:[#allocation2 + $0xc1] sm:$0xff] }
 0x40d   : > { %v6535_v60 = vld [vmem:[#allocation2 + $0xc8] sm:$0xff]  ;;  %2530 = vst.msk [vmem:[#allocation2 + $0xd9] sm:$0xff] %vm277_vm0, %v2498_v54  ;;  %2706 = vrot.lane.b32.xlu1 %v2626_v44, %s5173_s18  ;;  %v4943_v33 = vpop.f32.mrb[18].mxu0  ;;  %v6541_v22 = vld [vmem:[#allocation2 + $0xc0] sm:$0xff] }
 0x40e   : > { %2595 = vst.msk [vmem:[#allocation3 + $0x88] sm:$0xff] %vm277_vm0, %v6535_v60  ;;  %v2430_v21 = vmul.f32 %v4943_v33, %v6381_v61  ;;  %v2335_v17 = vpop.f32.mrb[19].mxu0  ;;  %2594 = vst.msk [vmem:[#allocation3 + $0x80] sm:$0xff] %vm277_vm0, %v6541_v22 }
 0x40f   : > { %v2429_v63 = vmul.f32 %v6381_v61, %v2335_v17 }
 0x410   : > { %v2469_v39 = vadd.f32 %v6386_v50, %v2430_v21 }
 0x411   : > { %v2468_v28 = vadd.f32 %v6386_v50, %v2429_v63 }
 0x412   : > { %v2501_v47 = vmax.f32 %v2469_v39, 0.0 }
 0x413   : > { %v2500_v13 = vmax.f32 %v2468_v28, 0.0  ;;  %v2629_v34 = vld [vmem:[#allocation2 + $0xe1] sm:$0xff] }
 0x414   : > { %2533 = vst.msk [vmem:[#allocation2 + $0xf9] sm:$0xff] %vm277_vm0, %v2501_v47  ;;  %2712 = vrot.lane.b32.xlu0 %v2629_v34, %s5173_s18  ;;  %v2628_v45 = vld [vmem:[#allocation2 + $0xd9] sm:$0xff] }
 0x415   : > { %v6551_v27 = vld [vmem:[#allocation2 + $0xe0] sm:$0xff]  ;;  %2532 = vst.msk [vmem:[#allocation2 + $0xf1] sm:$0xff] %vm277_vm0, %v2500_v13  ;;  %2710 = vrot.lane.b32.xlu1 %v2628_v45, %s5173_s18  ;;  %v4946_v40 = vpop.f32.mrb[20].mxu0  ;;  %v6557_v46 = vld [vmem:[#allocation2 + $0xd8] sm:$0xff] }
 0x416   : > { %2597 = vst.msk [vmem:[#allocation3 + $0x98] sm:$0xff] %vm277_vm0, %v6551_v27  ;;  %v2432_v18 = vmul.f32 %v4946_v40, %v6381_v61  ;;  %v2345_v24 = vpop.f32.mrb[21].mxu0  ;;  %2596 = vst.msk [vmem:[#allocation3 + $0x90] sm:$0xff] %vm277_vm0, %v6557_v46 }
 0x417   : > { %v2431_v52 = vmul.f32 %v6381_v61, %v2345_v24 }
 0x418   : > { %v2471_v8 = vadd.f32 %v6386_v50, %v2432_v18 }
 0x419   : > { %v2470_v30 = vadd.f32 %v6386_v50, %v2431_v52 }
 0x41a   : > { %v2503_v14 = vmax.f32 %v2471_v8, 0.0 }
 0x41b   : > { %v2502_v36 = vmax.f32 %v2470_v30, 0.0  ;;  %v2631_v26 = vld [vmem:[#allocation2 + $0xf9] sm:$0xff] }
 0x41c   : > { %2535 = vst.msk [vmem:[#allocation2 + $0x111] sm:$0xff] %vm277_vm0, %v2503_v14  ;;  %2716 = vrot.lane.b32.xlu0 %v2631_v26, %s5173_s18  ;;  %v2630_v19 = vld [vmem:[#allocation2 + $0xf1] sm:$0xff] }
 0x41d   : > { %v6567_v25 = vld [vmem:[#allocation2 + $0xf8] sm:$0xff]  ;;  %2534 = vst.msk [vmem:[#allocation2 + $0x109] sm:$0xff] %vm277_vm0, %v2502_v36  ;;  %2714 = vrot.lane.b32.xlu1 %v2630_v19, %s5173_s18  ;;  %v4949_v38 = vpop.f32.mrb[22].mxu0  ;;  %v6573_v51 = vld [vmem:[#allocation2 + $0xf0] sm:$0xff] }
 0x41e   : > { %2599 = vst.msk [vmem:[#allocation3 + $0xa8] sm:$0xff] %vm277_vm0, %v6567_v25  ;;  %v2434_v31 = vmul.f32 %v4949_v38, %v6381_v61  ;;  %v2355_v58 = vpop.f32.mrb[23].mxu0  ;;  %2598 = vst.msk [vmem:[#allocation3 + $0xa0] sm:$0xff] %vm277_vm0, %v6573_v51 }
 0x41f   : > { %v2433_v57 = vmul.f32 %v6381_v61, %v2355_v58 }
 0x420   : > { %v2473_v48 = vadd.f32 %v6386_v50, %v2434_v31 }
 0x421   : > { %v2472_v49 = vadd.f32 %v6386_v50, %v2433_v57 }
 0x422   : > { %v2505_v62 = vmax.f32 %v2473_v48, 0.0 }
 0x423   : > { %v2504_v53 = vmax.f32 %v2472_v49, 0.0  ;;  %v2633_v11 = vld [vmem:[#allocation2 + $0x111] sm:$0xff] }
 0x424   : > { %2537 = vst.msk [vmem:[#allocation2 + $0x129] sm:$0xff] %vm277_vm0, %v2505_v62  ;;  %2720 = vrot.lane.b32.xlu0 %v2633_v11, %s5173_s18  ;;  %v2632_v23 = vld [vmem:[#allocation2 + $0x109] sm:$0xff] }
 0x425   : > { %v6583_v10 = vld [vmem:[#allocation2 + $0x110] sm:$0xff]  ;;  %2536 = vst.msk [vmem:[#allocation2 + $0x121] sm:$0xff] %vm277_vm0, %v2504_v53  ;;  %2718 = vrot.lane.b32.xlu1 %v2632_v23, %s5173_s18  ;;  %v4952_v5 = vpop.f32.mrb[24].mxu0  ;;  %v6589_v54 = vld [vmem:[#allocation2 + $0x108] sm:$0xff] }
 0x426   : > { %2601 = vst.msk [vmem:[#allocation3 + $0xb8] sm:$0xff] %vm277_vm0, %v6583_v10  ;;  %v2436_v56 = vmul.f32 %v4952_v5, %v6381_v61  ;;  %v2365_v44 = vpop.f32.mrb[25].mxu0  ;;  %2600 = vst.msk [vmem:[#allocation3 + $0xb0] sm:$0xff] %vm277_vm0, %v6589_v54 }
 0x427   : > { %v2435_v33 = vmul.f32 %v6381_v61, %v2365_v44 }
 0x428   : > { %v2475_v21 = vadd.f32 %v6386_v50, %v2436_v56 }
 0x429   : > { %v2474_v17 = vadd.f32 %v6386_v50, %v2435_v33 }
 0x42a   : > { %v2507_v63 = vmax.f32 %v2475_v21, 0.0 }
 0x42b   : > { %v2506_v39 = vmax.f32 %v2474_v17, 0.0  ;;  %v2635_v28 = vld [vmem:[#allocation2 + $0x129] sm:$0xff] }
 0x42c   : > { %2539 = vst.msk [vmem:[#allocation2 + $0x141] sm:$0xff] %vm277_vm0, %v2507_v63  ;;  %2724 = vrot.lane.b32.xlu0 %v2635_v28, %s5173_s18  ;;  %v2634_v47 = vld [vmem:[#allocation2 + $0x121] sm:$0xff] }
 0x42d   : > { %v6599_v13 = vld [vmem:[#allocation2 + $0x128] sm:$0xff]  ;;  %2538 = vst.msk [vmem:[#allocation2 + $0x139] sm:$0xff] %vm277_vm0, %v2506_v39  ;;  %2722 = vrot.lane.b32.xlu1 %v2634_v47, %s5173_s18  ;;  %v4955_v34 = vpop.f32.mrb[26].mxu0  ;;  %v6605_v45 = vld [vmem:[#allocation2 + $0x120] sm:$0xff] }
 0x42e   : > { %2603 = vst.msk [vmem:[#allocation3 + $0xc8] sm:$0xff] %vm277_vm0, %v6599_v13  ;;  %v2438_v40 = vmul.f32 %v4955_v34, %v6381_v61  ;;  %v2375_v18 = vpop.f32.mrb[27].mxu0  ;;  %2602 = vst.msk [vmem:[#allocation3 + $0xc0] sm:$0xff] %vm277_vm0, %v6605_v45 }
 0x42f   : > { %v2437_v24 = vmul.f32 %v6381_v61, %v2375_v18 }
 0x430   : > { %v2477_v52 = vadd.f32 %v6386_v50, %v2438_v40 }
 0x431   : > { %v2476_v8 = vadd.f32 %v6386_v50, %v2437_v24 }
 0x432   : > { %v2509_v30 = vmax.f32 %v2477_v52, 0.0  ;;  %v2803_v52 = vld [vmem:[#allocation2 + $0xa] sm:$0xff] }
 0x433   : > { %v2508_v14 = vmax.f32 %v2476_v8, 0.0  ;;  %v2637_v36 = vld [vmem:[#allocation2 + $0x141] sm:$0xff] }
 0x434   : > { %2541 = vst.msk [vmem:[#allocation2 + $0x159] sm:$0xff] %vm277_vm0, %v2509_v30  ;;  %2728 = vrot.lane.b32.xlu0 %v2637_v36, %s5173_s18  ;;  %v2636_v26 = vld [vmem:[#allocation2 + $0x139] sm:$0xff]  ;;  %v6659_v8 = vld [vmem:[#allocation2 + $0x22] sm:$0xff] }
 0x435   : > { %v6615_v19 = vld [vmem:[#allocation2 + $0x140] sm:$0xff]  ;;  %2540 = vst.msk [vmem:[#allocation2 + $0x151] sm:$0xff] %vm277_vm0, %v2508_v14  ;;  %2726 = vrot.lane.b32.xlu1 %v2636_v26, %s5173_s18  ;;  %v4958_v38 = vpop.f32.mrb[28].mxu0  ;;  %v6621_v31 = vld [vmem:[#allocation2 + $0x138] sm:$0xff] }
 0x436   : > { %2605 = vst.msk [vmem:[#allocation3 + $0xd8] sm:$0xff] %vm277_vm0, %v6615_v19  ;;  %v2440_v58 = vmul.f32 %v4958_v38, %v6381_v61  ;;  %v2385_v57 = vpop.f32.mrb[29].mxu0  ;;  %2604 = vst.msk [vmem:[#allocation3 + $0xd0] sm:$0xff] %vm277_vm0, %v6621_v31  ;;  %v6663_v30 = vld [vmem:[#allocation2 + $0x1a] sm:$0xff]  ;;  %v6671_v36 = vld [vmem:[#allocation2 + $0x32] sm:$0xff] }
 0x437   : > { %v2439_v48 = vmul.f32 %v6381_v61, %v2385_v57  ;;  %v6667_v14 = vld [vmem:[#allocation2 + $0x3a] sm:$0xff]  ;;  %v6675_v26 = vld [vmem:[#allocation2 + $0x52] sm:$0xff]  ;;  %v6679_v38 = vld [vmem:[#allocation2 + $0x4a] sm:$0xff] }
 0x438   : > { %v2479_v49 = vadd.f32 %v6386_v50, %v2440_v58  ;;  %v6683_v58 = vld [vmem:[#allocation2 + $0x6a] sm:$0xff]  ;;  %v6687_v57 = vld [vmem:[#allocation2 + $0x62] sm:$0xff] }
 0x439   : > { %v2478_v62 = vadd.f32 %v6386_v50, %v2439_v48  ;;  %v6691_v48 = vld [vmem:[#allocation2 + $0x82] sm:$0xff] }
 0x43a   : > { %v2511_v53 = vmax.f32 %v2479_v49, 0.0  ;;  %v6695_v49 = vld [vmem:[#allocation2 + $0x7a] sm:$0xff] }
 0x43b   : > { %v2510_v11 = vmax.f32 %v2478_v62, 0.0  ;;  %v2639_v23 = vld [vmem:[#allocation2 + $0x159] sm:$0xff] }
 0x43c   : > { %2543 = vst.msk [vmem:[#allocation2 + $0x171] sm:$0xff] %vm277_vm0, %v2511_v53  ;;  %2732 = vrot.lane.b32.xlu0 %v2639_v23, %s5173_s18  ;;  %v2638_v5 = vld [vmem:[#allocation2 + $0x151] sm:$0xff]  ;;  %v6699_v62 = vld [vmem:[#allocation2 + $0x9a] sm:$0xff] }
 0x43d   : > { %v6631_v56 = vld [vmem:[#allocation2 + $0x158] sm:$0xff]  ;;  %2542 = vst.msk [vmem:[#allocation2 + $0x169] sm:$0xff] %vm277_vm0, %v2510_v11  ;;  %2730 = vrot.lane.b32.xlu1 %v2638_v5, %s5173_s18  ;;  %v6637_v44 = vld [vmem:[#allocation2 + $0x150] sm:$0xff]  ;;  %v4961_v33 = vpop.f32.mrb[30].mxu0 }
 0x43e   : > { %2607 = vst.msk [vmem:[#allocation3 + $0xe8] sm:$0xff] %vm277_vm0, %v6631_v56  ;;  %2606 = vst.msk [vmem:[#allocation3 + $0xe0] sm:$0xff] %vm277_vm0, %v6637_v44  ;;  %v2442_v21 = vmul.f32 %v4961_v33, %v6381_v61  ;;  %v2395_v17 = vpop.f32.mrb[31].mxu0  ;;  %v6703_v53 = vld [vmem:[#allocation2 + $0x92] sm:$0xff]  ;;  %v6713_v33 = vld [vmem:[#allocation2 + $0xaa] sm:$0xff] }
 0x43f   : > { %v2441_v63 = vmul.f32 %v6381_v61, %v2395_v17  ;;  %v6708_v5 = vld [vmem:[#allocation2 + $0xb2] sm:$0xff] }
 0x440   : > { %v2481_v39 = vadd.f32 %v6386_v50, %v2442_v21 }
 0x441   : > { %v2480_v28 = vadd.f32 %v6386_v50, %v2441_v63  ;;  %v2802_v50 = vld [vmem:[#allocation2 + $0x2] sm:$0xff]  ;;  %v2819_v63 = vld [vmem:[#allocation2 + $0xca] sm:$0xff] }
 0x442   : > { %v2513_v47 = vmax.f32 %v2481_v39, 0.0  ;;  %v6720_v39 = vld [vmem:[#allocation2 + $0xc2] sm:$0xff] }
 0x443   : > { %v2641_v34 = vld [vmem:[#allocation2 + $0x171] sm:$0xff]  ;;  %v2512_v40 = vmax.f32 %v2480_v28, 0.0 }
 0x444   : > { %2736 = vrot.lane.b32.xlu0 %v2641_v34, %s5173_s18  ;;  %v2640_v18 = vld [vmem:[#allocation2 + $0x169] sm:$0xff]  ;;  %2545 = vst.msk [vmem:[#allocation2 + $0x189] sm:$0xff] %vm277_vm0, %v2513_v47 }
 0x445   : > { %v6647_v24 = vld [vmem:[#allocation2 + $0x170] sm:$0xff]  ;;  %2734 = vrot.lane.b32.xlu1 %v2640_v18, %s5173_s18  ;;  %2544 = vst.msk [vmem:[#allocation2 + $0x181] sm:$0xff] %vm277_vm0, %v2512_v40  ;;  %v6653_v61 = vld [vmem:[#allocation2 + $0x168] sm:$0xff]  ;;  %v2820_v40 = vld [vmem:[#allocation2 + $0xda] sm:$0xff] }
 0x446   : > { %2609 = vst.msk [vmem:[#allocation3 + $0xf8] sm:$0xff] %vm277_vm0, %v6647_v24  ;;  %2608 = vst.msk [vmem:[#allocation3 + $0xf0] sm:$0xff] %vm277_vm0, %v6653_v61  ;;  %v2821_v34 = vld [vmem:[#allocation2 + $0xe2] sm:$0xff] }
 0x448   : > { %2868 = vrot.lane.b32.xlu0 %v2803_v52, %s5174_s19 }
 0x449   : > { %2866 = vrot.lane.b32.xlu1 %v2802_v50, %s5174_s19  ;;  %v2823_v50 = vld [vmem:[#allocation2 + $0xfa] sm:$0xff] }
 0x44c   : > { %2872 = vrot.lane.b32.xlu0 %v6659_v8, %s5174_s19 }
 0x44d   : > { %2870 = vrot.lane.b32.xlu1 %v6663_v30, %s5174_s19 }
 0x450   : > { %2876 = vrot.lane.b32.xlu0 %v6667_v14, %s5174_s19 }
 0x451   : > { %2874 = vrot.lane.b32.xlu1 %v6671_v36, %s5174_s19 }
 0x454   : > { %2880 = vrot.lane.b32.xlu0 %v6675_v26, %s5174_s19 }
 0x455   : > { %2878 = vrot.lane.b32.xlu1 %v6679_v38, %s5174_s19 }
 0x458   : > { %2884 = vrot.lane.b32.xlu0 %v6683_v58, %s5174_s19 }
 0x459   : > { %2882 = vrot.lane.b32.xlu1 %v6687_v57, %s5174_s19 }
 0x45c   : > { %2888 = vrot.lane.b32.xlu0 %v6691_v48, %s5174_s19 }
 0x45d   : > { %2886 = vrot.lane.b32.xlu1 %v6695_v49, %s5174_s19 }
 0x460   : > { %2892 = vrot.lane.b32.xlu0 %v6699_v62, %s5174_s19 }
 0x461   : > { %2890 = vrot.lane.b32.xlu1 %v6703_v53, %s5174_s19 }
 0x462   : > { %v2681_v11 = vpop.permute.xlu0 %2680 }
 0x463   : > { %2773 = vst.msk [vmem:[#allocation3 + $0x18] sm:$0xff] %vm656_vm2, %v2681_v11  ;;  %v2679_v23 = vpop.permute.xlu1 %2678  ;;  %v2822_v11 = vld [vmem:[#allocation2 + $0xf2] sm:$0xff] }
 0x464   : > { %2772 = vst.msk [vmem:[#allocation3 + $0x10] sm:$0xff] %vm656_vm2, %v2679_v23  ;;  %2896 = vrot.lane.b32.xlu0 %v6708_v5, %s5174_s19 }
 0x465   : > { %2894 = vrot.lane.b32.xlu1 %v6713_v33, %s5174_s19 }
 0x466   : > { %v2685_v21 = vpop.permute.xlu0 %2684 }
 0x467   : > { %2775 = vst.msk [vmem:[#allocation3 + $0x28] sm:$0xff] %vm656_vm2, %v2685_v21  ;;  %v2683_v17 = vpop.permute.xlu1 %2682 }
 0x468   : > { %2774 = vst.msk [vmem:[#allocation3 + $0x20] sm:$0xff] %vm656_vm2, %v2683_v17  ;;  %2900 = vrot.lane.b32.xlu0 %v2819_v63, %s5174_s19  ;;  %v2825_v17 = vld [vmem:[#allocation2 + $0x112] sm:$0xff]  ;;  %v2824_v63 = vld [vmem:[#allocation2 + $0x10a] sm:$0xff] }
 0x469   : > { %2898 = vrot.lane.b32.xlu1 %v6720_v39, %s5174_s19 }
 0x46a   : > { %v2689_v28 = vpop.permute.xlu0 %2688 }
 0x46b   : > { %2777 = vst.msk [vmem:[#allocation3 + $0x38] sm:$0xff] %vm656_vm2, %v2689_v28  ;;  %v2687_v47 = vpop.permute.xlu1 %2686 }
 0x46c   : > { %2776 = vst.msk [vmem:[#allocation3 + $0x30] sm:$0xff] %vm656_vm2, %v2687_v47  ;;  %2904 = vrot.lane.b32.xlu0 %v2821_v34, %s5174_s19  ;;  %v2827_v34 = vld [vmem:[#allocation2 + $0x12a] sm:$0xff] }
 0x46d   : > { %2902 = vrot.lane.b32.xlu1 %v2820_v40, %s5174_s19  ;;  %v2826_v40 = vld [vmem:[#allocation2 + $0x122] sm:$0xff] }
 0x46e   : > { %v2693_v18 = vpop.permute.xlu0 %2692 }
 0x46f   : > { %2779 = vst.msk [vmem:[#allocation3 + $0x48] sm:$0xff] %vm656_vm2, %v2693_v18  ;;  %v2691_v52 = vpop.permute.xlu1 %2690 }
 0x470   : > { %2778 = vst.msk [vmem:[#allocation3 + $0x40] sm:$0xff] %vm656_vm2, %v2691_v52  ;;  %2908 = vrot.lane.b32.xlu0 %v2823_v50, %s5174_s19  ;;  %v2829_v50 = vld [vmem:[#allocation2 + $0x142] sm:$0xff] }
 0x471   : > { %2906 = vrot.lane.b32.xlu1 %v2822_v11, %s5174_s19  ;;  %v2828_v11 = vld [vmem:[#allocation2 + $0x13a] sm:$0xff] }
 0x472   : > { %v2697_v23 = vpop.permute.xlu0 %2696 }
 0x473   : > { %2781 = vst.msk [vmem:[#allocation3 + $0x58] sm:$0xff] %vm656_vm2, %v2697_v23  ;;  %v2695_v21 = vpop.permute.xlu1 %2694 }
 0x474   : > { %2780 = vst.msk [vmem:[#allocation3 + $0x50] sm:$0xff] %vm656_vm2, %v2695_v21  ;;  %2912 = vrot.lane.b32.xlu0 %v2825_v17, %s5174_s19  ;;  %v2831_v17 = vld [vmem:[#allocation2 + $0x15a] sm:$0xff] }
 0x475   : > { %2910 = vrot.lane.b32.xlu1 %v2824_v63, %s5174_s19  ;;  %v2830_v63 = vld [vmem:[#allocation2 + $0x152] sm:$0xff] }
 0x476   : > { %v2701_v28 = vpop.permute.xlu0 %2700 }
 0x477   : > { %2783 = vst.msk [vmem:[#allocation3 + $0x68] sm:$0xff] %vm656_vm2, %v2701_v28  ;;  %v2699_v47 = vpop.permute.xlu1 %2698  ;;  %v2833_v28 = vld [vmem:[#allocation2 + $0x172] sm:$0xff] }
 0x478   : > { %2782 = vst.msk [vmem:[#allocation3 + $0x60] sm:$0xff] %vm656_vm2, %v2699_v47  ;;  %2916 = vrot.lane.b32.xlu0 %v2827_v34, %s5174_s19  ;;  %v2832_v47 = vld [vmem:[#allocation2 + $0x16a] sm:$0xff] }
 0x479   : > { %2914 = vrot.lane.b32.xlu1 %v2826_v40, %s5174_s19 }
 0x47a   : > { %v2705_v18 = vpop.permute.xlu0 %2704 }
 0x47b   : > { %2785 = vst.msk [vmem:[#allocation3 + $0x78] sm:$0xff] %vm656_vm2, %v2705_v18  ;;  %v2703_v52 = vpop.permute.xlu1 %2702 }
 0x47c   : > { %2784 = vst.msk [vmem:[#allocation3 + $0x70] sm:$0xff] %vm656_vm2, %v2703_v52  ;;  %2920 = vrot.lane.b32.xlu0 %v2829_v50, %s5174_s19 }
 0x47d   : > { %2918 = vrot.lane.b32.xlu1 %v2828_v11, %s5174_s19 }
 0x47e   : > { %v2709_v23 = vpop.permute.xlu0 %2708 }
 0x47f   : > { %2787 = vst.msk [vmem:[#allocation3 + $0x88] sm:$0xff] %vm656_vm2, %v2709_v23  ;;  %v2707_v21 = vpop.permute.xlu1 %2706 }
 0x480   : > { %2786 = vst.msk [vmem:[#allocation3 + $0x80] sm:$0xff] %vm656_vm2, %v2707_v21  ;;  %2924 = vrot.lane.b32.xlu0 %v2831_v17, %s5174_s19 }
 0x481   : > { %2922 = vrot.lane.b32.xlu1 %v2830_v63, %s5174_s19 }
 0x484   : > { %2928 = vrot.lane.b32.xlu0 %v2833_v28, %s5174_s19 }
 0x485   : > { %2926 = vrot.lane.b32.xlu1 %v2832_v47, %s5174_s19 }
 0x486   : > { %v2713_v34 = vpop.permute.xlu0 %2712 }
 0x487   : > { %2789 = vst.msk [vmem:[#allocation3 + $0x98] sm:$0xff] %vm656_vm2, %v2713_v34  ;;  %v2711_v40 = vpop.permute.xlu1 %2710  ;;  %v3024_v34 = vld [vmem:[#allocation2 + $0x180] sm:$0xff] }
 0x488   : > { %2788 = vst.msk [vmem:[#allocation3 + $0x90] sm:$0xff] %vm656_vm2, %v2711_v40  ;;  %3060 = vrot.lane.b32.xlu0 %v6416_v29, %s5175_s20 }
 0x489   : > { %3058 = vrot.lane.b32.xlu1 %v6424_v32, %s5175_s20 }
 0x48c   : > { %3064 = vrot.lane.b32.xlu0 %v6438_v20, %s5175_s20 }
 0x48d   : > { %3062 = vrot.lane.b32.xlu1 %v6446_v55, %s5175_s20 }
 0x48e   : > { %v2717_v18 = vpop.permute.xlu0 %2716 }
 0x48f   : > { %2791 = vst.msk [vmem:[#allocation3 + $0xa8] sm:$0xff] %vm656_vm2, %v2717_v18  ;;  %v2715_v52 = vpop.permute.xlu1 %2714 }
 0x490   : > { %2790 = vst.msk [vmem:[#allocation3 + $0xa0] sm:$0xff] %vm656_vm2, %v2715_v52  ;;  %3068 = vrot.lane.b32.xlu0 %v6460_v59, %s5175_s20 }
 0x491   : > { %3066 = vrot.lane.b32.xlu1 %v6468_v15, %s5175_s20 }
 0x494   : > { %3072 = vrot.lane.b32.xlu0 %v6479_v0, %s5175_s20 }
 0x495   : > { %3070 = vrot.lane.b32.xlu1 %v6487_v4, %s5175_s20 }
 0x496   : > { %v2721_v29 = vpop.permute.xlu0 %2720 }
 0x497   : > { %2793 = vst.msk [vmem:[#allocation3 + $0xb8] sm:$0xff] %vm656_vm2, %v2721_v29  ;;  %v2719_v32 = vpop.permute.xlu1 %2718 }
 0x498   : > { %2792 = vst.msk [vmem:[#allocation3 + $0xb0] sm:$0xff] %vm656_vm2, %v2719_v32  ;;  %3076 = vrot.lane.b32.xlu0 %v6496_v2, %s5175_s20 }
 0x499   : > { %3074 = vrot.lane.b32.xlu1 %v6503_v42, %s5175_s20 }
 0x49c   : > { %3080 = vrot.lane.b32.xlu0 %v6509_v37, %s5175_s20 }
 0x49d   : > { %3078 = vrot.lane.b32.xlu1 %v6515_v43, %s5175_s20 }
 0x49e   : > { %v2725_v50 = vpop.permute.xlu0 %2724 }
 0x49f   : > { %2795 = vst.msk [vmem:[#allocation3 + $0xc8] sm:$0xff] %vm656_vm2, %v2725_v50  ;;  %v2723_v11 = vpop.permute.xlu1 %2722 }
 0x4a0   : > { %2794 = vst.msk [vmem:[#allocation3 + $0xc0] sm:$0xff] %vm656_vm2, %v2723_v11  ;;  %3084 = vrot.lane.b32.xlu0 %v6523_v16, %s5175_s20 }
 0x4a1   : > { %3082 = vrot.lane.b32.xlu1 %v6529_v41, %s5175_s20 }
 0x4a4   : > { %3088 = vrot.lane.b32.xlu0 %v6535_v60, %s5175_s20 }
 0x4a5   : > { %3086 = vrot.lane.b32.xlu1 %v6541_v22, %s5175_s20 }
 0x4a6   : > { %v2729_v23 = vpop.permute.xlu0 %2728 }
 0x4a7   : > { %2797 = vst.msk [vmem:[#allocation3 + $0xd8] sm:$0xff] %vm656_vm2, %v2729_v23  ;;  %v2727_v21 = vpop.permute.xlu1 %2726  ;;  %v4182_v23 = vld [vmem:[%s7459_s2 + $0x20] sm:$0xff] }
 0x4a8   : > { %2796 = vst.msk [vmem:[#allocation3 + $0xd0] sm:$0xff] %vm656_vm2, %v2727_v21  ;;  %3092 = vrot.lane.b32.xlu0 %v6551_v27, %s5175_s20  ;;  %v4183_v21 = vld [vmem:[%s7459_s2 + $0x28] sm:$0xff] }
 0x4a9   : > { %3090 = vrot.lane.b32.xlu1 %v6557_v46, %s5175_s20 }
 0x4ac   : > { %3096 = vrot.lane.b32.xlu0 %v6567_v25, %s5175_s20 }
 0x4ad   : > { %3094 = vrot.lane.b32.xlu1 %v6573_v51, %s5175_s20 }
 0x4ae   : > { %v2733_v17 = vpop.permute.xlu0 %2732 }
 0x4af   : > { %2799 = vst.msk [vmem:[#allocation3 + $0xe8] sm:$0xff] %vm656_vm2, %v2733_v17  ;;  %v2731_v63 = vpop.permute.xlu1 %2730 }
 0x4b0   : > { %2798 = vst.msk [vmem:[#allocation3 + $0xe0] sm:$0xff] %vm656_vm2, %v2731_v63  ;;  %3100 = vrot.lane.b32.xlu0 %v6583_v10, %s5175_s20  ;;  %v5052_v63 = vpack.c.bf16 %v4183_v21, %v4182_v23 }
 0x4b1   : > { %3098 = vrot.lane.b32.xlu1 %v6589_v54, %s5175_s20 }
 0x4b4   : > { %3104 = vrot.lane.b32.xlu0 %v6599_v13, %s5175_s20 }
 0x4b5   : > { %3102 = vrot.lane.b32.xlu1 %v6605_v45, %s5175_s20 }
 0x4b6   : > { %v2737_v28 = vpop.permute.xlu0 %2736 }
 0x4b7   : > { %2801 = vst.msk [vmem:[#allocation3 + $0xf8] sm:$0xff] %vm656_vm2, %v2737_v28  ;;  %v2735_v47 = vpop.permute.xlu1 %2734 }
 0x4b8   : > { %2800 = vst.msk [vmem:[#allocation3 + $0xf0] sm:$0xff] %vm656_vm2, %v2735_v47  ;;  %3108 = vrot.lane.b32.xlu0 %v6615_v19, %s5175_s20  ;;  %v3025_v19 = vld [vmem:[#allocation2 + $0x188] sm:$0xff] }
 0x4b9   : > { %3106 = vrot.lane.b32.xlu1 %v6621_v31, %s5175_s20 }
 0x4ba   : > { %v2869_v10 = vpop.permute.xlu0 %2868 }
 0x4bb   : > { %2963 = vst.msk [vmem:[#allocation3 + $0x8] sm:$0xff] %vm849_vm3, %v2869_v10  ;;  %v2867_v54 = vpop.permute.xlu1 %2866 }
 0x4bc   : > { %2962 = vst.msk [vmem:[#allocation3] sm:$0xff] %vm849_vm3, %v2867_v54  ;;  %3112 = vrot.lane.b32.xlu0 %v6631_v56, %s5175_s20 }
 0x4bd   : > { %3110 = vrot.lane.b32.xlu1 %v6637_v44, %s5175_s20 }
 0x4be   : > { %v2873_v13 = vpop.permute.xlu0 %2872 }
 0x4bf   : > { %2965 = vst.msk [vmem:[#allocation3 + $0x18] sm:$0xff] %vm849_vm3, %v2873_v13  ;;  %v2871_v45 = vpop.permute.xlu1 %2870 }
 0x4c0   : > { %2964 = vst.msk [vmem:[#allocation3 + $0x10] sm:$0xff] %vm849_vm3, %v2871_v45  ;;  %3116 = vrot.lane.b32.xlu0 %v6647_v24, %s5175_s20  ;;  %v4178_v24 = vld [vmem:[%s7459_s2] sm:$0xff] }
 0x4c1   : > { %3114 = vrot.lane.b32.xlu1 %v6653_v61, %s5175_s20  ;;  %v4179_v61 = vld [vmem:[%s7459_s2 + $0x8] sm:$0xff] }
 0x4c2   : > { %v2877_v31 = vpop.permute.xlu0 %2876  ;;  %v5044_v52 = vpack.c.bf16 %v4179_v61, %v4178_v24 }
 0x4c3   : > { %2967 = vst.msk [vmem:[#allocation3 + $0x28] sm:$0xff] %vm849_vm3, %v2877_v31  ;;  %v2875_v56 = vpop.permute.xlu1 %2874 }
 0x4c4   : > { %2966 = vst.msk [vmem:[#allocation3 + $0x20] sm:$0xff] %vm849_vm3, %v2875_v56  ;;  %3120 = vrot.lane.b32.xlu0 %v3025_v19, %s5175_s20  ;;  %5045 = vmatprep.subr.bf16.mxu1 %v5044_v52 }
 0x4c5   : > { %3118 = vrot.lane.b32.xlu1 %v3024_v34, %s5175_s20  ;;  %5047 = vmatpush3.bf16.msra.mxu1 %v5044_v52  ;;  %s4813_s20 = sshll.u32 %s5243_s28, 8  ;;  %s5181_s28 = smov [#allocation4]  }
 0x4c6   : > { %v2881_v44 = vpop.permute.xlu0 %2880  ;;  %s7412_s18 = scalar_lea.hbm %s7464_s7, %s4813_s20 }
 0x4c7   : > { %2969 = vst.msk [vmem:[#allocation3 + $0x38] sm:$0xff] %vm849_vm3, %v2881_v44  ;;  %v2879_v40 = vpop.permute.xlu1 %2878 }
 0x4c8   : > { %2968 = vst.msk [vmem:[#allocation3 + $0x30] sm:$0xff] %vm849_vm3, %v2879_v40  ;;  %3252 = vrot.lane.b32.xlu0 %v6408_v1, %s5176_s21  ;;  %v4180_v1 = vld [vmem:[%s7459_s2 + $0x10] sm:$0xff] }
 0x4c9   : > { %3250 = vrot.lane.b32.xlu1 %v6414_v9, %s5176_s21  ;;  %v4181_v9 = vld [vmem:[%s7459_s2 + $0x18] sm:$0xff] }
 0x4ca   : > { %v2885_v18 = vpop.permute.xlu0 %2884  ;;  %v5048_v50 = vpack.c.bf16 %v4181_v9, %v4180_v1 }
 0x4cb   : > { %2971 = vst.msk [vmem:[#allocation3 + $0x48] sm:$0xff] %vm849_vm3, %v2885_v18  ;;  %v2883_v29 = vpop.permute.xlu1 %2882 }
 0x4cc   : > { %2970 = vst.msk [vmem:[#allocation3 + $0x40] sm:$0xff] %vm849_vm3, %v2883_v29  ;;  %3256 = vrot.lane.b32.xlu0 %v6430_v6, %s5176_s21  ;;  %5049 = vmatprep.subr.bf16.mxu1 %v5048_v50 }
 0x4cd   : > { %3254 = vrot.lane.b32.xlu1 %v6436_v35, %s5176_s21  ;;  %5051 = vmatpush3.bf16.msra.mxu1 %v5048_v50 }
 0x4ce   : > { %v2889_v32 = vpop.permute.xlu0 %2888  ;;  %5053 = vmatprep.subr.bf16.mxu1 %v5052_v63 }
 0x4cf   : > { %2973 = vst.msk [vmem:[#allocation3 + $0x58] sm:$0xff] %vm849_vm3, %v2889_v32  ;;  %v2887_v11 = vpop.permute.xlu1 %2886  ;;  %v3194_v32 = vld [vmem:[#allocation2 + $0x79] sm:$0xff] }
 0x4d0   : > { %2972 = vst.msk [vmem:[#allocation3 + $0x50] sm:$0xff] %vm849_vm3, %v2887_v11  ;;  %3444 = vrot.lane.b32.xlu0 %v6659_v8, %s5177_s22  ;;  %v4184_v8 = vld [vmem:[%s7459_s2 + $0x30] sm:$0xff] }
 0x4d1   : > { %3442 = vrot.lane.b32.xlu1 %v6663_v30, %s5177_s22  ;;  %5055 = vmatpush3.bf16.msra.mxu1 %v5052_v63  ;;  %v4185_v30 = vld [vmem:[%s7459_s2 + $0x38] sm:$0xff] }
 0x4d2   : > { %v2893_v17 = vpop.permute.xlu0 %2892  ;;  %v5056_v10 = vpack.c.bf16 %v4185_v30, %v4184_v8  ;;  %v3196_v8 = vld [vmem:[#allocation2 + $0x91] sm:$0xff] }
 0x4d3   : > { %2975 = vst.msk [vmem:[#allocation3 + $0x68] sm:$0xff] %vm849_vm3, %v2893_v17  ;;  %v2891_v28 = vpop.permute.xlu1 %2890 }
 0x4d4   : > { %2974 = vst.msk [vmem:[#allocation3 + $0x60] sm:$0xff] %vm849_vm3, %v2891_v28  ;;  %3636 = vrot.lane.b32.xlu0 %v6438_v20, %s5178_s23  ;;  %5057 = vmatprep.subr.bf16.mxu1 %v5056_v10  ;;  %v4186_v20 = vld [vmem:[%s7459_s2 + $0x40] sm:$0xff] }
 0x4d5   : > { %3634 = vrot.lane.b32.xlu1 %v6446_v55, %s5178_s23  ;;  %5059 = vmatpush3.bf16.msra.mxu1 %v5056_v10 }
 0x4d6   : > { %v2897_v47 = vpop.permute.xlu0 %2896  ;;  %4978 = vmatprep.subr.mxu1 %v4186_v20 }
 0x4d7   : > { %2977 = vst.msk [vmem:[#allocation3 + $0x78] sm:$0xff] %vm849_vm3, %v2897_v47  ;;  %v2895_v54 = vpop.permute.xlu1 %2894 }
 0x4d8   : > { %2976 = vst.msk [vmem:[#allocation3 + $0x70] sm:$0xff] %vm849_vm3, %v2895_v54  ;;  %3828 = vrot.lane.b32.xlu0 %v6430_v6, %s5179_s29 }
 0x4d9   : > { %3826 = vrot.lane.b32.xlu1 %v6436_v35, %s5179_s29  ;;  %4979 = vmatpush3.msra.mxu1 %v4186_v20 }
 0x4da   : > { %v2901_v55 = vpop.permute.xlu0 %2900 }
 0x4db   : > { %2979 = vst.msk [vmem:[#allocation3 + $0x88] sm:$0xff] %vm849_vm3, %v2901_v55  ;;  %v2899_v13 = vpop.permute.xlu1 %2898 }
 0x4dc   : > { %2978 = vst.msk [vmem:[#allocation3 + $0x80] sm:$0xff] %vm849_vm3, %v2899_v13  ;;  %3446 = vrot.lane.b32.xlu0 %v6671_v36, %s5177_s22 }
 0x4dd   : > { %4018 = vrot.lane.b32.xlu1 %v6671_v36, %s5180_s8 }
 0x4de   : > { %v2905_v6 = vpop.permute.xlu0 %2904 }
 0x4df   : > { %2981 = vst.msk [vmem:[#allocation3 + $0x98] sm:$0xff] %vm849_vm3, %v2905_v6  ;;  %v2903_v35 = vpop.permute.xlu1 %2902  ;;  %v3198_v6 = vld [vmem:[#allocation2 + $0xa9] sm:$0xff] }
 0x4e0   : > { %2980 = vst.msk [vmem:[#allocation3 + $0x90] sm:$0xff] %vm849_vm3, %v2903_v35  ;;  %3448 = vrot.lane.b32.xlu0 %v6667_v14, %s5177_s22 }
 0x4e1   : > { %4020 = vrot.lane.b32.xlu1 %v6667_v14, %s5180_s8 }
 0x4e2   : > { %v2909_v45 = vpop.permute.xlu0 %2908 }
 0x4e3   : > { %2983 = vst.msk [vmem:[#allocation3 + $0xa8] sm:$0xff] %vm849_vm3, %v2909_v45  ;;  %v2907_v19 = vpop.permute.xlu1 %2906 }
 0x4e4   : > { %2982 = vst.msk [vmem:[#allocation3 + $0xa0] sm:$0xff] %vm849_vm3, %v2907_v19  ;;  %3640 = vrot.lane.b32.xlu0 %v6460_v59, %s5178_s23 }
 0x4e5   : > { %3638 = vrot.lane.b32.xlu1 %v6468_v15, %s5178_s23 }
 0x4e6   : > { %v2913_v36 = vpop.permute.xlu0 %2912 }
 0x4e7   : > { %2985 = vst.msk [vmem:[#allocation3 + $0xb8] sm:$0xff] %vm849_vm3, %v2913_v36  ;;  %v2911_v31 = vpop.permute.xlu1 %2910 }
 0x4e8   : > { %2984 = vst.msk [vmem:[#allocation3 + $0xb0] sm:$0xff] %vm849_vm3, %v2911_v31  ;;  %3258 = vrot.lane.b32.xlu0 %v6458_v7, %s5176_s21 }
 0x4e9   : > { %3830 = vrot.lane.b32.xlu1 %v6458_v7, %s5179_s29 }
 0x4ea   : > { %v2917_v14 = vpop.permute.xlu0 %2916 }
 0x4eb   : > { %2987 = vst.msk [vmem:[#allocation3 + $0xc8] sm:$0xff] %vm849_vm3, %v2917_v14  ;;  %v2915_v34 = vpop.permute.xlu1 %2914 }
 0x4ec   : > { %2986 = vst.msk [vmem:[#allocation3 + $0xc0] sm:$0xff] %vm849_vm3, %v2915_v34  ;;  %4022 = vrot.lane.b32.xlu0 %v6679_v38, %s5180_s8 }
 0x4ed   : > { %3832 = vrot.lane.b32.xlu1 %v6452_v3, %s5179_s29 }
 0x4ee   : > { %v2921_v59 = vpop.permute.xlu0 %2920 }
 0x4ef   : > { %2989 = vst.msk [vmem:[#allocation3 + $0xd8] sm:$0xff] %vm849_vm3, %v2921_v59  ;;  %v2919_v15 = vpop.permute.xlu1 %2918  ;;  %v3200_v59 = vld [vmem:[#allocation2 + $0xc1] sm:$0xff] }
 0x4f0   : > { %2988 = vst.msk [vmem:[#allocation3 + $0xd0] sm:$0xff] %vm849_vm3, %v2919_v15  ;;  %3450 = vrot.lane.b32.xlu0 %v6679_v38, %s5177_s22 }
 0x4f1   : > { %3260 = vrot.lane.b32.xlu1 %v6452_v3, %s5176_s21 }
 0x4f2   : > { %v2925_v7 = vpop.permute.xlu0 %2924 }
 0x4f3   : > { %2991 = vst.msk [vmem:[#allocation3 + $0xe8] sm:$0xff] %vm849_vm3, %v2925_v7  ;;  %v2923_v56 = vpop.permute.xlu1 %2922 }
 0x4f4   : > { %2990 = vst.msk [vmem:[#allocation3 + $0xe0] sm:$0xff] %vm849_vm3, %v2923_v56  ;;  %3452 = vrot.lane.b32.xlu0 %v6675_v26, %s5177_s22  ;;  %v3392_v56 = vld [vmem:[#allocation2 + $0xc2] sm:$0xff] }
 0x4f5   : > { %4024 = vrot.lane.b32.xlu1 %v6675_v26, %s5180_s8  ;;  %v3766_v26 = vld [vmem:[#allocation2 + $0x61] sm:$0xff] }
 0x4f6   : > { %v2929_v44 = vpop.permute.xlu0 %2928 }
 0x4f7   : > { %2993 = vst.msk [vmem:[#allocation3 + $0xf8] sm:$0xff] %vm849_vm3, %v2929_v44  ;;  %v2927_v40 = vpop.permute.xlu1 %2926 }
 0x4f8   : > { %2992 = vst.msk [vmem:[#allocation3 + $0xf0] sm:$0xff] %vm849_vm3, %v2927_v40  ;;  %3644 = vrot.lane.b32.xlu0 %v6479_v0, %s5178_s23  ;;  %v3767_v0 = vld [vmem:[#allocation2 + $0x69] sm:$0xff] }
 0x4f9   : > { %3642 = vrot.lane.b32.xlu1 %v6487_v4, %s5178_s23 }
 0x4fa   : > { %v3061_v3 = vpop.permute.xlu0 %3060 }
 0x4fb   : > { %3155 = vst.msk [vmem:[#allocation3 + $0x8] sm:$0xff] %vm1042_vm4, %v3061_v3  ;;  %v3059_v38 = vpop.permute.xlu1 %3058 }
 0x4fc   : > { %3154 = vst.msk [vmem:[#allocation3] sm:$0xff] %vm1042_vm4, %v3059_v38  ;;  %3262 = vrot.lane.b32.xlu0 %v6477_v12, %s5176_s21 }
 0x4fd   : > { %3834 = vrot.lane.b32.xlu1 %v3766_v26, %s5179_s29 }
 0x4fe   : > { %v3065_v24 = vpop.permute.xlu0 %3064 }
 0x4ff   : > { %3157 = vst.msk [vmem:[#allocation3 + $0x18] sm:$0xff] %vm1042_vm4, %v3065_v24  ;;  %v3063_v61 = vpop.permute.xlu1 %3062 }
 0x500   : > { %3156 = vst.msk [vmem:[#allocation3 + $0x10] sm:$0xff] %vm1042_vm4, %v3063_v61  ;;  %4026 = vrot.lane.b32.xlu0 %v6687_v57, %s5180_s8 }
 0x501   : > { %3836 = vrot.lane.b32.xlu1 %v3767_v0, %s5179_s29 }
 0x502   : > { %v3069_v4 = vpop.permute.xlu0 %3068 }
 0x503   : > { %3159 = vst.msk [vmem:[#allocation3 + $0x28] sm:$0xff] %vm1042_vm4, %v3069_v4  ;;  %v3067_v18 = vpop.permute.xlu1 %3066  ;;  %v3202_v4 = vld [vmem:[#allocation2 + $0xd9] sm:$0xff] }
 0x504   : > { %3158 = vst.msk [vmem:[#allocation3 + $0x20] sm:$0xff] %vm1042_vm4, %v3067_v18  ;;  %3454 = vrot.lane.b32.xlu0 %v6687_v57, %s5177_s22 }
 0x505   : > { %3264 = vrot.lane.b32.xlu1 %v3767_v0, %s5176_s21 }
 0x506   : > { %v3073_v12 = vpop.permute.xlu0 %3072 }
 0x507   : > { %3161 = vst.msk [vmem:[#allocation3 + $0x38] sm:$0xff] %vm1042_vm4, %v3073_v12  ;;  %v3071_v52 = vpop.permute.xlu1 %3070  ;;  %v3968_v12 = vld [vmem:[#allocation2 + $0xda] sm:$0xff] }
 0x508   : > { %3160 = vst.msk [vmem:[#allocation3 + $0x30] sm:$0xff] %vm1042_vm4, %v3071_v52  ;;  %3456 = vrot.lane.b32.xlu0 %v6683_v58, %s5177_s22 }
 0x509   : > { %4028 = vrot.lane.b32.xlu1 %v6683_v58, %s5180_s8 }
 0x50a   : > { %v3077_v29 = vpop.permute.xlu0 %3076 }
 0x50b   : > { %3163 = vst.msk [vmem:[#allocation3 + $0x48] sm:$0xff] %vm1042_vm4, %v3077_v29  ;;  %v3075_v1 = vpop.permute.xlu1 %3074 }
 0x50c   : > { %3162 = vst.msk [vmem:[#allocation3 + $0x40] sm:$0xff] %vm1042_vm4, %v3075_v1  ;;  %3648 = vrot.lane.b32.xlu0 %v6496_v2, %s5178_s23  ;;  %v3769_v2 = vld [vmem:[#allocation2 + $0x81] sm:$0xff] }
 0x50d   : > { %3646 = vrot.lane.b32.xlu1 %v6503_v42, %s5178_s23 }
 0x50e   : > { %v3081_v57 = vpop.permute.xlu0 %3080 }
 0x50f   : > { %3165 = vst.msk [vmem:[#allocation3 + $0x58] sm:$0xff] %vm1042_vm4, %v3081_v57  ;;  %v3079_v9 = vpop.permute.xlu1 %3078 }
 0x510   : > { %3164 = vst.msk [vmem:[#allocation3 + $0x50] sm:$0xff] %vm1042_vm4, %v3079_v9  ;;  %3266 = vrot.lane.b32.xlu0 %v3194_v32, %s5176_s21 }
 0x511   : > { %3838 = vrot.lane.b32.xlu1 %v3194_v32, %s5179_s29  ;;  %v3395_v32 = vld [vmem:[#allocation2 + $0xe2] sm:$0xff] }
 0x512   : > { %v3085_v58 = vpop.permute.xlu0 %3084 }
 0x513   : > { %3167 = vst.msk [vmem:[#allocation3 + $0x68] sm:$0xff] %vm1042_vm4, %v3085_v58  ;;  %v3083_v50 = vpop.permute.xlu1 %3082 }
 0x514   : > { %3166 = vst.msk [vmem:[#allocation3 + $0x60] sm:$0xff] %vm1042_vm4, %v3083_v50  ;;  %4030 = vrot.lane.b32.xlu0 %v6695_v49, %s5180_s8 }
 0x515   : > { %3840 = vrot.lane.b32.xlu1 %v3769_v2, %s5179_s29 }
 0x516   : > { %v3089_v42 = vpop.permute.xlu0 %3088 }
 0x517   : > { %3169 = vst.msk [vmem:[#allocation3 + $0x78] sm:$0xff] %vm1042_vm4, %v3089_v42  ;;  %v3087_v11 = vpop.permute.xlu1 %3086 }
 0x518   : > { %3168 = vst.msk [vmem:[#allocation3 + $0x70] sm:$0xff] %vm1042_vm4, %v3087_v11  ;;  %3458 = vrot.lane.b32.xlu0 %v6695_v49, %s5177_s22 }
 0x519   : > { %3268 = vrot.lane.b32.xlu1 %v3769_v2, %s5176_s21 }
 0x51a   : > { %v3093_v23 = vpop.permute.xlu0 %3092 }
 0x51b   : > { %3171 = vst.msk [vmem:[#allocation3 + $0x88] sm:$0xff] %vm1042_vm4, %v3093_v23  ;;  %v3091_v21 = vpop.permute.xlu1 %3090  ;;  %v3204_v23 = vld [vmem:[#allocation2 + $0xf1] sm:$0xff] }
 0x51c   : > { %3170 = vst.msk [vmem:[#allocation3 + $0x80] sm:$0xff] %vm1042_vm4, %v3091_v21  ;;  %3460 = vrot.lane.b32.xlu0 %v6691_v48, %s5177_s22 }
 0x51d   : > { %4032 = vrot.lane.b32.xlu1 %v6691_v48, %s5180_s8 }
 0x51e   : > { %v3097_v17 = vpop.permute.xlu0 %3096 }
 0x51f   : > { %3173 = vst.msk [vmem:[#allocation3 + $0x98] sm:$0xff] %vm1042_vm4, %v3097_v17  ;;  %v3095_v63 = vpop.permute.xlu1 %3094  ;;  %v3970_v17 = vld [vmem:[#allocation2 + $0xf2] sm:$0xff] }
 0x520   : > { %3172 = vst.msk [vmem:[#allocation3 + $0x90] sm:$0xff] %vm1042_vm4, %v3095_v63  ;;  %3652 = vrot.lane.b32.xlu0 %v6509_v37, %s5178_s23  ;;  %v3771_v37 = vld [vmem:[#allocation2 + $0x99] sm:$0xff] }
 0x521   : > { %3650 = vrot.lane.b32.xlu1 %v6515_v43, %s5178_s23 }
 0x522   : > { %v3101_v49 = vpop.permute.xlu0 %3100 }
 0x523   : > { %3175 = vst.msk [vmem:[#allocation3 + $0xa8] sm:$0xff] %vm1042_vm4, %v3101_v49  ;;  %v3099_v28 = vpop.permute.xlu1 %3098 }
 0x524   : > { %3174 = vst.msk [vmem:[#allocation3 + $0xa0] sm:$0xff] %vm1042_vm4, %v3099_v28  ;;  %3270 = vrot.lane.b32.xlu0 %v3196_v8, %s5176_s21 }
 0x525   : > { %3842 = vrot.lane.b32.xlu1 %v3196_v8, %s5179_s29 }
 0x526   : > { %v3105_v48 = vpop.permute.xlu0 %3104 }
 0x527   : > { %3177 = vst.msk [vmem:[#allocation3 + $0xb8] sm:$0xff] %vm1042_vm4, %v3105_v48  ;;  %v3103_v30 = vpop.permute.xlu1 %3102 }
 0x528   : > { %3176 = vst.msk [vmem:[#allocation3 + $0xb0] sm:$0xff] %vm1042_vm4, %v3103_v30  ;;  %4034 = vrot.lane.b32.xlu0 %v6703_v53, %s5180_s8  ;;  %v3397_v30 = vld [vmem:[#allocation2 + $0xfa] sm:$0xff] }
 0x529   : > { %3844 = vrot.lane.b32.xlu1 %v3771_v37, %s5179_s29 }
 0x52a   : > { %v3109_v43 = vpop.permute.xlu0 %3108 }
 0x52b   : > { %3179 = vst.msk [vmem:[#allocation3 + $0xc8] sm:$0xff] %vm1042_vm4, %v3109_v43  ;;  %v3107_v47 = vpop.permute.xlu1 %3106 }
 0x52c   : > { %3178 = vst.msk [vmem:[#allocation3 + $0xc0] sm:$0xff] %vm1042_vm4, %v3107_v47  ;;  %3462 = vrot.lane.b32.xlu0 %v6703_v53, %s5177_s22  ;;  %v3589_v47 = vld [vmem:[#allocation2 + $0x110] sm:$0xff] }
 0x52d   : > { %3272 = vrot.lane.b32.xlu1 %v3771_v37, %s5176_s21 }
 0x52e   : > { %v3113_v10 = vpop.permute.xlu0 %3112 }
 0x52f   : > { %3181 = vst.msk [vmem:[#allocation3 + $0xd8] sm:$0xff] %vm1042_vm4, %v3113_v10  ;;  %v3111_v54 = vpop.permute.xlu1 %3110 }
 0x530   : > { %3180 = vst.msk [vmem:[#allocation3 + $0xd0] sm:$0xff] %vm1042_vm4, %v3111_v54  ;;  %3464 = vrot.lane.b32.xlu0 %v6699_v62, %s5177_s22  ;;  %v3588_v54 = vld [vmem:[#allocation2 + $0x108] sm:$0xff] }
 0x531   : > { %4036 = vrot.lane.b32.xlu1 %v6699_v62, %s5180_s8 }
 0x532   : > { %v3117_v20 = vpop.permute.xlu0 %3116 }
 0x533   : > { %3183 = vst.msk [vmem:[#allocation3 + $0xe8] sm:$0xff] %vm1042_vm4, %v3117_v20  ;;  %v3115_v55 = vpop.permute.xlu1 %3114 }
 0x534   : > { %3182 = vst.msk [vmem:[#allocation3 + $0xe0] sm:$0xff] %vm1042_vm4, %v3115_v55  ;;  %3656 = vrot.lane.b32.xlu0 %v6523_v16, %s5178_s23  ;;  %v3773_v16 = vld [vmem:[#allocation2 + $0xb1] sm:$0xff] }
 0x535   : > { %3654 = vrot.lane.b32.xlu1 %v6529_v41, %s5178_s23 }
 0x536   : > { %v3121_v53 = vpop.permute.xlu0 %3120 }
 0x537   : > { %3185 = vst.msk [vmem:[#allocation3 + $0xf8] sm:$0xff] %vm1042_vm4, %v3121_v53  ;;  %v3119_v13 = vpop.permute.xlu1 %3118  ;;  %v3206_v53 = vld [vmem:[#allocation2 + $0x109] sm:$0xff] }
 0x538   : > { %3184 = vst.msk [vmem:[#allocation3 + $0xf0] sm:$0xff] %vm1042_vm4, %v3119_v13  ;;  %3274 = vrot.lane.b32.xlu0 %v3198_v6, %s5176_s21 }
 0x539   : > { %3846 = vrot.lane.b32.xlu1 %v3198_v6, %s5179_s29 }
 0x53a   : > { %v3253_v62 = vpop.permute.xlu0 %3252 }
 0x53b   : > { %3347 = vst.msk [vmem:[#allocation3 + $0x8] sm:$0xff] %vm1235_vm5, %v3253_v62  ;;  %v3251_v35 = vpop.permute.xlu1 %3250  ;;  %v3972_v62 = vld [vmem:[#allocation2 + $0x10a] sm:$0xff] }
 0x53c   : > { %3346 = vst.msk [vmem:[#allocation3] sm:$0xff] %vm1235_vm5, %v3251_v35  ;;  %4038 = vrot.lane.b32.xlu0 %v6713_v33, %s5180_s8  ;;  %v3781_v35 = vld [vmem:[#allocation2 + $0x111] sm:$0xff] }
 0x53d   : > { %3848 = vrot.lane.b32.xlu1 %v3773_v16, %s5179_s29 }
 0x53e   : > { %v3257_v41 = vpop.permute.xlu0 %3256 }
 0x53f   : > { %3349 = vst.msk [vmem:[#allocation3 + $0x18] sm:$0xff] %vm1235_vm5, %v3257_v41  ;;  %v3255_v45 = vpop.permute.xlu1 %3254 }
 0x540   : > { %3348 = vst.msk [vmem:[#allocation3 + $0x10] sm:$0xff] %vm1235_vm5, %v3255_v45  ;;  %3466 = vrot.lane.b32.xlu0 %v6713_v33, %s5177_s22 }
 0x541   : > { %3276 = vrot.lane.b32.xlu1 %v3773_v16, %s5176_s21 }
 0x542   : > { %v3445_v19 = vpop.permute.xlu0 %3444 }
 0x543   : > { %3539 = vst.msk [vmem:[#allocation3 + $0x8] sm:$0xff] %vm1428_vm6, %v3445_v19  ;;  %v3443_v36 = vpop.permute.xlu1 %3442 }
 0x544   : > { %3538 = vst.msk [vmem:[#allocation3] sm:$0xff] %vm1428_vm6, %v3443_v36  ;;  %3468 = vrot.lane.b32.xlu0 %v6708_v5, %s5177_s22 }
 0x545   : > { %4040 = vrot.lane.b32.xlu1 %v6708_v5, %s5180_s8 }
 0x546   : > { %v3637_v31 = vpop.permute.xlu0 %3636 }
 0x547   : > { %3731 = vst.msk [vmem:[#allocation3 + $0x8] sm:$0xff] %vm1622_vm7, %v3637_v31  ;;  %v3635_v14 = vpop.permute.xlu1 %3634  ;;  %v3399_v31 = vld [vmem:[#allocation2 + $0x112] sm:$0xff] }
 0x548   : > { %3730 = vst.msk [vmem:[#allocation3] sm:$0xff] %vm1622_vm7, %v3635_v14  ;;  %3660 = vrot.lane.b32.xlu0 %v6535_v60, %s5178_s23  ;;  %v3775_v60 = vld [vmem:[#allocation2 + $0xc9] sm:$0xff] }
 0x549   : > { %3658 = vrot.lane.b32.xlu1 %v6541_v22, %s5178_s23 }
 0x54a   : > { %v3829_v33 = vpop.permute.xlu0 %3828 }
 0x54b   : > { %3923 = vst.msk [vmem:[#allocation3 + $0x8] sm:$0xff] %vm1815_vm8, %v3829_v33  ;;  %v3827_v34 = vpop.permute.xlu1 %3826 }
 0x54c   : > { %3922 = vst.msk [vmem:[#allocation3] sm:$0xff] %vm1815_vm8, %v3827_v34  ;;  %3278 = vrot.lane.b32.xlu0 %v3200_v59, %s5176_s21  ;;  %v3591_v34 = vld [vmem:[#allocation2 + $0x128] sm:$0xff] }
 0x54d   : > { %3850 = vrot.lane.b32.xlu1 %v3200_v59, %s5179_s29 }
 0x54e   : > { %v3447_v5 = vpop.permute.xlu0 %3446 }
 0x54f   : > { %3540 = vst.msk [vmem:[#allocation3 + $0x10] sm:$0xff] %vm1428_vm6, %v3447_v5  ;;  %v4019_v15 = vpop.permute.xlu1 %4018  ;;  %v3590_v5 = vld [vmem:[#allocation2 + $0x120] sm:$0xff] }
 0x550   : > { %4114 = vst.msk [vmem:[#allocation3] sm:$0xff] %vm2008_vm9, %v4019_v15  ;;  %4042 = vrot.lane.b32.xlu0 %v6720_v39, %s5180_s8  ;;  %v3393_v39 = vld [vmem:[#allocation2 + $0xca] sm:$0xff] }
 0x551   : > { %3852 = vrot.lane.b32.xlu1 %v3775_v60, %s5179_s29 }
 0x552   : > { %v3449_v22 = vpop.permute.xlu0 %3448 }
 0x553   : > { %3541 = vst.msk [vmem:[#allocation3 + $0x18] sm:$0xff] %vm1428_vm6, %v3449_v22  ;;  %v4021_v7 = vpop.permute.xlu1 %4020  ;;  %v3208_v22 = vld [vmem:[#allocation2 + $0x121] sm:$0xff] }
 0x554   : > { %4115 = vst.msk [vmem:[#allocation3 + $0x8] sm:$0xff] %vm2008_vm9, %v4021_v7  ;;  %3470 = vrot.lane.b32.xlu0 %v3392_v56, %s5177_s22 }
 0x555   : > { %3280 = vrot.lane.b32.xlu1 %v3775_v60, %s5176_s21 }
 0x556   : > { %v3641_v44 = vpop.permute.xlu0 %3640 }
 0x557   : > { %3733 = vst.msk [vmem:[#allocation3 + $0x18] sm:$0xff] %vm1622_vm7, %v3641_v44  ;;  %v3639_v40 = vpop.permute.xlu1 %3638  ;;  %v4146_v3 = vld [vmem:[#allocation3] sm:$0xff]  ;;  %v3974_v44 = vld [vmem:[#allocation2 + $0x122] sm:$0xff] }
 0x558   : > { %3732 = vst.msk [vmem:[#allocation3 + $0x10] sm:$0xff] %vm1622_vm7, %v3639_v40  ;;  %4980 = vmatprep.mubr.msk.f32.mxu1 %vm2082_vm10, %v4146_v3  ;;  %3472 = vrot.lane.b32.xlu0 %v3393_v39, %s5177_s22  ;;  %v3783_v40 = vld [vmem:[#allocation2 + $0x129] sm:$0xff] }
 0x559   : > { %4044 = vrot.lane.b32.xlu1 %v3393_v39, %s5180_s8 }
 0x55a   : > { %v3259_v38 = vpop.permute.xlu0 %3258 }
 0x55b   : > { %3350 = vst.msk [vmem:[#allocation3 + $0x20] sm:$0xff] %vm1235_vm5, %v3259_v38  ;;  %v3831_v26 = vpop.permute.xlu1 %3830  ;;  %v4147_v24 = vld [vmem:[#allocation3 + $0x8] sm:$0xff] }
 0x55c   : > { %3924 = vst.msk [vmem:[#allocation3 + $0x10] sm:$0xff] %vm1815_vm8, %v3831_v26  ;;  %3664 = vrot.lane.b32.xlu0 %v6551_v27, %s5178_s23  ;;  %4981 = vmatmul.mubr.msk.f32.vlgmr.msra.gmra.mrb[0].mxu1 %vm2082_vm10, %v4147_v24 }
 0x55d   : > { %3662 = vrot.lane.b32.xlu1 %v6557_v46, %s5178_s23  ;;  %v3777_v46 = vld [vmem:[#allocation2 + $0xe1] sm:$0xff] }
 0x55e   : > { %v4023_v61 = vpop.permute.xlu0 %4022 }
 0x55f   : > { %4116 = vst.msk [vmem:[#allocation3 + $0x10] sm:$0xff] %vm2008_vm9, %v4023_v61  ;;  %v3833_v0 = vpop.permute.xlu1 %3832  ;;  %v3401_v61 = vld [vmem:[#allocation2 + $0x12a] sm:$0xff] }
 0x560   : > { %3925 = vst.msk [vmem:[#allocation3 + $0x18] sm:$0xff] %vm1815_vm8, %v3833_v0  ;;  %3282 = vrot.lane.b32.xlu0 %v3202_v4, %s5176_s21 }
 0x561   : > { %3854 = vrot.lane.b32.xlu1 %v3202_v4, %s5179_s29 }
 0x562   : > { %v3451_v18 = vpop.permute.xlu0 %3450 }
 0x563   : > { %3542 = vst.msk [vmem:[#allocation3 + $0x20] sm:$0xff] %vm1428_vm6, %v3451_v18  ;;  %v3261_v27 = vpop.permute.xlu1 %3260  ;;  %v3593_v18 = vld [vmem:[#allocation2 + $0x140] sm:$0xff] }
 0x564   : > { %3351 = vst.msk [vmem:[#allocation3 + $0x28] sm:$0xff] %vm1235_vm5, %v3261_v27  ;;  %4046 = vrot.lane.b32.xlu0 %v3968_v12, %s5180_s8 }
 0x565   : > { %3856 = vrot.lane.b32.xlu1 %v3777_v46, %s5179_s29 }
 0x566   : > { %v3453_v52 = vpop.permute.xlu0 %3452  ;;  %v4148_v29 = vld [vmem:[#allocation3 + $0x10] sm:$0xff] }
 0x567   : > { %3543 = vst.msk [vmem:[#allocation3 + $0x28] sm:$0xff] %vm1428_vm6, %v3453_v52  ;;  %v4025_v1 = vpop.permute.xlu1 %4024  ;;  %4983 = vmatprep.mubr.msk.f32.mxu1 %vm2082_vm10, %v4148_v29  ;;  %v3210_v29 = vld [vmem:[#allocation2 + $0x139] sm:$0xff] }
 0x568   : > { %4117 = vst.msk [vmem:[#allocation3 + $0x18] sm:$0xff] %vm2008_vm9, %v4025_v1  ;;  %3474 = vrot.lane.b32.xlu0 %v3968_v12, %s5177_s22  ;;  %v3592_v12 = vld [vmem:[#allocation2 + $0x138] sm:$0xff] }
 0x569   : > { %3284 = vrot.lane.b32.xlu1 %v3777_v46, %s5176_s21 }
 0x56a   : > { %v3645_v57 = vpop.permute.xlu0 %3644 }
 0x56b   : > { %3735 = vst.msk [vmem:[#allocation3 + $0x28] sm:$0xff] %vm1622_vm7, %v3645_v57  ;;  %v3643_v9 = vpop.permute.xlu1 %3642 }
 0x56c   : > { %3734 = vst.msk [vmem:[#allocation3 + $0x20] sm:$0xff] %vm1622_vm7, %v3643_v9  ;;  %3476 = vrot.lane.b32.xlu0 %v3395_v32, %s5177_s22  ;;  %v3976_v9 = vld [vmem:[#allocation2 + $0x13a] sm:$0xff] }
 0x56d   : > { %4048 = vrot.lane.b32.xlu1 %v3395_v32, %s5180_s8  ;;  %v3785_v32 = vld [vmem:[#allocation2 + $0x141] sm:$0xff] }
 0x56e   : > { %v3263_v58 = vpop.permute.xlu0 %3262 }
 0x56f   : > { %3352 = vst.msk [vmem:[#allocation3 + $0x30] sm:$0xff] %vm1235_vm5, %v3263_v58  ;;  %v3835_v50 = vpop.permute.xlu1 %3834  ;;  %v4149_v2 = vld [vmem:[#allocation3 + $0x18] sm:$0xff] }
 0x570   : > { %3926 = vst.msk [vmem:[#allocation3 + $0x20] sm:$0xff] %vm1815_vm8, %v3835_v50  ;;  %3668 = vrot.lane.b32.xlu0 %v6567_v25, %s5178_s23  ;;  %4984 = vmatmul.mubr.msk.f32.gmra.mrb[2].mxu1 %vm2082_vm10, %v4149_v2 }
 0x571   : > { %3666 = vrot.lane.b32.xlu1 %v6573_v51, %s5178_s23  ;;  %v3779_v51 = vld [vmem:[#allocation2 + $0xf9] sm:$0xff] }
 0x572   : > { %v4027_v42 = vpop.permute.xlu0 %4026 }
 0x573   : > { %4118 = vst.msk [vmem:[#allocation3 + $0x20] sm:$0xff] %vm2008_vm9, %v4027_v42  ;;  %v3837_v11 = vpop.permute.xlu1 %3836 }
 0x574   : > { %3927 = vst.msk [vmem:[#allocation3 + $0x28] sm:$0xff] %vm1815_vm8, %v3837_v11  ;;  %3286 = vrot.lane.b32.xlu0 %v3204_v23, %s5176_s21 }
 0x575   : > { %3858 = vrot.lane.b32.xlu1 %v3204_v23, %s5179_s29  ;;  %v3403_v23 = vld [vmem:[#allocation2 + $0x142] sm:$0xff] }
 0x576   : > { %v3455_v21 = vpop.permute.xlu0 %3454 }
 0x577   : > { %3544 = vst.msk [vmem:[#allocation3 + $0x30] sm:$0xff] %vm1428_vm6, %v3455_v21  ;;  %v3265_v25 = vpop.permute.xlu1 %3264 }
 0x578   : > { %3353 = vst.msk [vmem:[#allocation3 + $0x38] sm:$0xff] %vm1235_vm5, %v3265_v25  ;;  %4050 = vrot.lane.b32.xlu0 %v3970_v17, %s5180_s8 }
 0x579   : > { %3860 = vrot.lane.b32.xlu1 %v3779_v51, %s5179_s29 }
 0x57a   : > { %v3457_v63 = vpop.permute.xlu0 %3456  ;;  %v4150_v49 = vld [vmem:[#allocation3 + $0x20] sm:$0xff] }
 0x57b   : > { %3545 = vst.msk [vmem:[#allocation3 + $0x38] sm:$0xff] %vm1428_vm6, %v3457_v63  ;;  %v4029_v28 = vpop.permute.xlu1 %4028  ;;  %4986 = vmatprep.mubr.msk.f32.mxu1 %vm2082_vm10, %v4150_v49  ;;  %v3594_v63 = vld [vmem:[#allocation2 + $0x150] sm:$0xff] }
 0x57c   : > { %4119 = vst.msk [vmem:[#allocation3 + $0x28] sm:$0xff] %vm2008_vm9, %v4029_v28  ;;  %3478 = vrot.lane.b32.xlu0 %v3970_v17, %s5177_s22  ;;  %v3595_v17 = vld [vmem:[#allocation2 + $0x158] sm:$0xff] }
 0x57d   : > { %3288 = vrot.lane.b32.xlu1 %v3779_v51, %s5176_s21 }
 0x57e   : > { %v3649_v8 = vpop.permute.xlu0 %3648 }
 0x57f   : > { %3737 = vst.msk [vmem:[#allocation3 + $0x38] sm:$0xff] %vm1622_vm7, %v3649_v8  ;;  %v3647_v48 = vpop.permute.xlu1 %3646  ;;  %v3212_v8 = vld [vmem:[#allocation2 + $0x151] sm:$0xff] }
 0x580   : > { %3736 = vst.msk [vmem:[#allocation3 + $0x30] sm:$0xff] %vm1622_vm7, %v3647_v48  ;;  %3480 = vrot.lane.b32.xlu0 %v3397_v30, %s5177_s22 }
 0x581   : > { %4052 = vrot.lane.b32.xlu1 %v3397_v30, %s5180_s8 }
 0x582   : > { %v3267_v37 = vpop.permute.xlu0 %3266 }
 0x583   : > { %3354 = vst.msk [vmem:[#allocation3 + $0x40] sm:$0xff] %vm1235_vm5, %v3267_v37  ;;  %v3839_v43 = vpop.permute.xlu1 %3838  ;;  %v4151_v10 = vld [vmem:[#allocation3 + $0x28] sm:$0xff] }
 0x584   : > { %3928 = vst.msk [vmem:[#allocation3 + $0x30] sm:$0xff] %vm1815_vm8, %v3839_v43  ;;  %3672 = vrot.lane.b32.xlu0 %v3589_v47, %s5178_s23  ;;  %4987 = vmatmul.mubr.msk.f32.gmra.mrb[4].mxu1 %vm2082_vm10, %v4151_v10  ;;  %v3978_v37 = vld [vmem:[#allocation2 + $0x152] sm:$0xff] }
 0x585   : > { %3670 = vrot.lane.b32.xlu1 %v3588_v54, %s5178_s23  ;;  %v3787_v43 = vld [vmem:[#allocation2 + $0x159] sm:$0xff] }
 0x586   : > { %v4031_v20 = vpop.permute.xlu0 %4030 }
 0x587   : > { %4120 = vst.msk [vmem:[#allocation3 + $0x30] sm:$0xff] %vm2008_vm9, %v4031_v20  ;;  %v3841_v55 = vpop.permute.xlu1 %3840 }
 0x588   : > { %3929 = vst.msk [vmem:[#allocation3 + $0x38] sm:$0xff] %vm1815_vm8, %v3841_v55  ;;  %3290 = vrot.lane.b32.xlu0 %v3206_v53, %s5176_s21 }
 0x589   : > { %3862 = vrot.lane.b32.xlu1 %v3206_v53, %s5179_s29  ;;  %v3405_v53 = vld [vmem:[#allocation2 + $0x15a] sm:$0xff] }
 0x58a   : > { %v3459_v13 = vpop.permute.xlu0 %3458 }
 0x58b   : > { %3546 = vst.msk [vmem:[#allocation3 + $0x40] sm:$0xff] %vm1428_vm6, %v3459_v13  ;;  %v3269_v6 = vpop.permute.xlu1 %3268 }
 0x58c   : > { %3355 = vst.msk [vmem:[#allocation3 + $0x48] sm:$0xff] %vm1235_vm5, %v3269_v6  ;;  %4054 = vrot.lane.b32.xlu0 %v3972_v62, %s5180_s8 }
 0x58d   : > { %3864 = vrot.lane.b32.xlu1 %v3781_v35, %s5179_s29 }
 0x58e   : > { %v3461_v16 = vpop.permute.xlu0 %3460  ;;  %v4152_v41 = vld [vmem:[#allocation3 + $0x30] sm:$0xff] }
 0x58f   : > { %3547 = vst.msk [vmem:[#allocation3 + $0x48] sm:$0xff] %vm1428_vm6, %v3461_v16  ;;  %v4033_v45 = vpop.permute.xlu1 %4032  ;;  %4989 = vmatprep.mubr.msk.f32.mxu1 %vm2082_vm10, %v4152_v41  ;;  %v3596_v16 = vld [vmem:[#allocation2 + $0x168] sm:$0xff] }
 0x590   : > { %4121 = vst.msk [vmem:[#allocation3 + $0x38] sm:$0xff] %vm2008_vm9, %v4033_v45  ;;  %3482 = vrot.lane.b32.xlu0 %v3972_v62, %s5177_s22  ;;  %v3597_v62 = vld [vmem:[#allocation2 + $0x170] sm:$0xff] }
 0x591   : > { %3292 = vrot.lane.b32.xlu1 %v3781_v35, %s5176_s21 }
 0x592   : > { %v3653_v19 = vpop.permute.xlu0 %3652 }
 0x593   : > { %3739 = vst.msk [vmem:[#allocation3 + $0x48] sm:$0xff] %vm1622_vm7, %v3653_v19  ;;  %v3651_v36 = vpop.permute.xlu1 %3650  ;;  %v3214_v19 = vld [vmem:[#allocation2 + $0x169] sm:$0xff] }
 0x594   : > { %3738 = vst.msk [vmem:[#allocation3 + $0x40] sm:$0xff] %vm1622_vm7, %v3651_v36  ;;  %3484 = vrot.lane.b32.xlu0 %v3399_v31, %s5177_s22 }
 0x595   : > { %4056 = vrot.lane.b32.xlu1 %v3399_v31, %s5180_s8 }
 0x596   : > { %v3271_v14 = vpop.permute.xlu0 %3270 }
 0x597   : > { %3356 = vst.msk [vmem:[#allocation3 + $0x50] sm:$0xff] %vm1235_vm5, %v3271_v14  ;;  %v3843_v33 = vpop.permute.xlu1 %3842  ;;  %v4153_v59 = vld [vmem:[#allocation3 + $0x38] sm:$0xff] }
 0x598   : > { %3930 = vst.msk [vmem:[#allocation3 + $0x40] sm:$0xff] %vm1815_vm8, %v3843_v33  ;;  %3676 = vrot.lane.b32.xlu0 %v3591_v34, %s5178_s23  ;;  %4990 = vmatmul.mubr.msk.f32.gmra.mrb[6].mxu1 %vm2082_vm10, %v4153_v59  ;;  %v3980_v14 = vld [vmem:[#allocation2 + $0x16a] sm:$0xff] }
 0x599   : > { %3674 = vrot.lane.b32.xlu1 %v3590_v5, %s5178_s23  ;;  %v3789_v33 = vld [vmem:[#allocation2 + $0x171] sm:$0xff] }
 0x59a   : > { %v4035_v15 = vpop.permute.xlu0 %4034 }
 0x59b   : > { %4122 = vst.msk [vmem:[#allocation3 + $0x40] sm:$0xff] %vm2008_vm9, %v4035_v15  ;;  %v3845_v60 = vpop.permute.xlu1 %3844 }
 0x59c   : > { %3931 = vst.msk [vmem:[#allocation3 + $0x48] sm:$0xff] %vm1815_vm8, %v3845_v60  ;;  %3294 = vrot.lane.b32.xlu0 %v3208_v22, %s5176_s21 }
 0x59d   : > { %3866 = vrot.lane.b32.xlu1 %v3208_v22, %s5179_s29  ;;  %v3407_v22 = vld [vmem:[#allocation2 + $0x172] sm:$0xff] }
 0x59e   : > { %v3463_v7 = vpop.permute.xlu0 %3462 }
 0x59f   : > { %3548 = vst.msk [vmem:[#allocation3 + $0x50] sm:$0xff] %vm1428_vm6, %v3463_v7  ;;  %v3273_v56 = vpop.permute.xlu1 %3272 }
 0x5a0   : > { %3357 = vst.msk [vmem:[#allocation3 + $0x58] sm:$0xff] %vm1235_vm5, %v3273_v56  ;;  %4058 = vrot.lane.b32.xlu0 %v3974_v44, %s5180_s8 }
 0x5a1   : > { %3868 = vrot.lane.b32.xlu1 %v3783_v40, %s5179_s29 }
 0x5a2   : > { %v3465_v3 = vpop.permute.xlu0 %3464  ;;  %v4154_v39 = vld [vmem:[#allocation3 + $0x40] sm:$0xff] }
 0x5a3   : > { %3549 = vst.msk [vmem:[#allocation3 + $0x58] sm:$0xff] %vm1428_vm6, %v3465_v3  ;;  %v4037_v38 = vpop.permute.xlu1 %4036  ;;  %4992 = vmatprep.mubr.msk.f32.mxu1 %vm2082_vm10, %v4154_v39  ;;  %v3598_v3 = vld [vmem:[#allocation2 + $0x180] sm:$0xff] }
 0x5a4   : > { %4123 = vst.msk [vmem:[#allocation3 + $0x48] sm:$0xff] %vm2008_vm9, %v4037_v38  ;;  %3486 = vrot.lane.b32.xlu0 %v3974_v44, %s5177_s22  ;;  %v3599_v44 = vld [vmem:[#allocation2 + $0x188] sm:$0xff] }
 0x5a5   : > { %3296 = vrot.lane.b32.xlu1 %v3783_v40, %s5176_s21 }
 0x5a6   : > { %v3657_v26 = vpop.permute.xlu0 %3656 }
 0x5a7   : > { %3741 = vst.msk [vmem:[#allocation3 + $0x58] sm:$0xff] %vm1622_vm7, %v3657_v26  ;;  %v3655_v24 = vpop.permute.xlu1 %3654  ;;  %v3216_v26 = vld [vmem:[#allocation2 + $0x181] sm:$0xff] }
 0x5a8   : > { %3740 = vst.msk [vmem:[#allocation3 + $0x50] sm:$0xff] %vm1622_vm7, %v3655_v24  ;;  %3488 = vrot.lane.b32.xlu0 %v3401_v61, %s5177_s22 }
 0x5a9   : > { %4060 = vrot.lane.b32.xlu1 %v3401_v61, %s5180_s8 }
 0x5aa   : > { %v3275_v0 = vpop.permute.xlu0 %3274 }
 0x5ab   : > { %3358 = vst.msk [vmem:[#allocation3 + $0x60] sm:$0xff] %vm1235_vm5, %v3275_v0  ;;  %v3847_v4 = vpop.permute.xlu1 %3846  ;;  %v4155_v27 = vld [vmem:[#allocation3 + $0x48] sm:$0xff]  ;;  %v3982_v0 = vld [vmem:[#allocation2 + $0x182] sm:$0xff] }
 0x5ac   : > { %3932 = vst.msk [vmem:[#allocation3 + $0x50] sm:$0xff] %vm1815_vm8, %v3847_v4  ;;  %3680 = vrot.lane.b32.xlu0 %v3593_v18, %s5178_s23  ;;  %4993 = vmatmul.mubr.msk.f32.gmra.mrb[8].mxu1 %vm2082_vm10, %v4155_v27  ;;  %v3791_v4 = vld [vmem:[#allocation2 + $0x189] sm:$0xff] }
 0x5ad   : > { %3678 = vrot.lane.b32.xlu1 %v3592_v12, %s5178_s23 }
 0x5ae   : > { %v4039_v46 = vpop.permute.xlu0 %4038 }
 0x5af   : > { %4124 = vst.msk [vmem:[#allocation3 + $0x50] sm:$0xff] %vm2008_vm9, %v4039_v46  ;;  %v3849_v52 = vpop.permute.xlu1 %3848 }
 0x5b0   : > { %3933 = vst.msk [vmem:[#allocation3 + $0x58] sm:$0xff] %vm1815_vm8, %v3849_v52  ;;  %3298 = vrot.lane.b32.xlu0 %v3210_v29, %s5176_s21 }
 0x5b1   : > { %3870 = vrot.lane.b32.xlu1 %v3210_v29, %s5179_s29  ;;  %v3409_v29 = vld [vmem:[#allocation2 + $0x18a] sm:$0xff] }
 0x5b2   : > { %v3467_v1 = vpop.permute.xlu0 %3466 }
 0x5b3   : > { %3550 = vst.msk [vmem:[#allocation3 + $0x60] sm:$0xff] %vm1428_vm6, %v3467_v1  ;;  %v3277_v57 = vpop.permute.xlu1 %3276  ;;  %v3601_v1 = vld [vmem:[#allocation2 + $0x1a0] sm:$0xff] }
 0x5b4   : > { %3359 = vst.msk [vmem:[#allocation3 + $0x68] sm:$0xff] %vm1235_vm5, %v3277_v57  ;;  %4062 = vrot.lane.b32.xlu0 %v3976_v9, %s5180_s8 }
 0x5b5   : > { %3872 = vrot.lane.b32.xlu1 %v3785_v32, %s5179_s29 }
 0x5b6   : > { %v3469_v58 = vpop.permute.xlu0 %3468  ;;  %v4156_v50 = vld [vmem:[#allocation3 + $0x50] sm:$0xff] }
 0x5b7   : > { %3551 = vst.msk [vmem:[#allocation3 + $0x68] sm:$0xff] %vm1428_vm6, %v3469_v58  ;;  %v4041_v2 = vpop.permute.xlu1 %4040  ;;  %4995 = vmatprep.mubr.msk.f32.mxu1 %vm2082_vm10, %v4156_v50  ;;  %v3793_v50 = vld [vmem:[#allocation2 + $0x1a1] sm:$0xff] }
 0x5b8   : > { %4125 = vst.msk [vmem:[#allocation3 + $0x58] sm:$0xff] %vm2008_vm9, %v4041_v2  ;;  %3490 = vrot.lane.b32.xlu0 %v3976_v9, %s5177_s22  ;;  %v3600_v9 = vld [vmem:[#allocation2 + $0x198] sm:$0xff] }
 0x5b9   : > { %3300 = vrot.lane.b32.xlu1 %v3785_v32, %s5176_s21 }
 0x5ba   : > { %v3661_v42 = vpop.permute.xlu0 %3660 }
 0x5bb   : > { %3743 = vst.msk [vmem:[#allocation3 + $0x68] sm:$0xff] %vm1622_vm7, %v3661_v42  ;;  %v3659_v11 = vpop.permute.xlu1 %3658  ;;  %v3792_v42 = vld [vmem:[#allocation2 + $0x199] sm:$0xff] }
 0x5bc   : > { %3742 = vst.msk [vmem:[#allocation3 + $0x60] sm:$0xff] %vm1622_vm7, %v3659_v11  ;;  %3492 = vrot.lane.b32.xlu0 %v3403_v23, %s5177_s22 }
 0x5bd   : > { %4064 = vrot.lane.b32.xlu1 %v3403_v23, %s5180_s8  ;;  %v3985_v23 = vld [vmem:[#allocation2 + $0x1a2] sm:$0xff] }
 0x5be   : > { %v3279_v21 = vpop.permute.xlu0 %3278 }
 0x5bf   : > { %3360 = vst.msk [vmem:[#allocation3 + $0x70] sm:$0xff] %vm1235_vm5, %v3279_v21  ;;  %v3851_v25 = vpop.permute.xlu1 %3850  ;;  %v4157_v51 = vld [vmem:[#allocation3 + $0x58] sm:$0xff] }
 0x5c0   : > { %3934 = vst.msk [vmem:[#allocation3 + $0x60] sm:$0xff] %vm1815_vm8, %v3851_v25  ;;  %3684 = vrot.lane.b32.xlu0 %v3595_v17, %s5178_s23  ;;  %4996 = vmatmul.mubr.msk.f32.gmra.mrb[10].mxu1 %vm2082_vm10, %v4157_v51  ;;  %v3984_v25 = vld [vmem:[#allocation2 + $0x19a] sm:$0xff] }
 0x5c1   : > { %3682 = vrot.lane.b32.xlu1 %v3594_v63, %s5178_s23 }
 0x5c2   : > { %v4043_v49 = vpop.permute.xlu0 %4042 }
 0x5c3   : > { %4126 = vst.msk [vmem:[#allocation3 + $0x60] sm:$0xff] %vm2008_vm9, %v4043_v49  ;;  %v3853_v28 = vpop.permute.xlu1 %3852 }
 0x5c4   : > { %3935 = vst.msk [vmem:[#allocation3 + $0x68] sm:$0xff] %vm1815_vm8, %v3853_v28  ;;  %3302 = vrot.lane.b32.xlu0 %v3212_v8, %s5176_s21 }
 0x5c5   : > { %3874 = vrot.lane.b32.xlu1 %v3212_v8, %s5179_s29 }
 0x5c6   : > { %v3471_v48 = vpop.permute.xlu0 %3470 }
 0x5c7   : > { %3552 = vst.msk [vmem:[#allocation3 + $0x70] sm:$0xff] %vm1428_vm6, %v3471_v48  ;;  %v3281_v30 = vpop.permute.xlu1 %3280 }
 0x5c8   : > { %3361 = vst.msk [vmem:[#allocation3 + $0x78] sm:$0xff] %vm1235_vm5, %v3281_v30  ;;  %4066 = vrot.lane.b32.xlu0 %v3978_v37, %s5180_s8 }
 0x5c9   : > { %3876 = vrot.lane.b32.xlu1 %v3787_v43, %s5179_s29 }
 0x5ca   : > { %v3473_v47 = vpop.permute.xlu0 %3472  ;;  %v4158_v10 = vld [vmem:[#allocation3 + $0x60] sm:$0xff] }
 0x5cb   : > { %3553 = vst.msk [vmem:[#allocation3 + $0x78] sm:$0xff] %vm1428_vm6, %v3473_v47  ;;  %v4045_v54 = vpop.permute.xlu1 %4044  ;;  %4998 = vmatprep.mubr.msk.f32.mxu1 %vm2082_vm10, %v4158_v10 }
 0x5cc   : > { %4127 = vst.msk [vmem:[#allocation3 + $0x68] sm:$0xff] %vm2008_vm9, %v4045_v54  ;;  %3494 = vrot.lane.b32.xlu0 %v3978_v37, %s5177_s22 }
 0x5cd   : > { %3304 = vrot.lane.b32.xlu1 %v3787_v43, %s5176_s21 }
 0x5ce   : > { %v3665_v20 = vpop.permute.xlu0 %3664 }
 0x5cf   : > { %3745 = vst.msk [vmem:[#allocation3 + $0x78] sm:$0xff] %vm1622_vm7, %v3665_v20  ;;  %v3663_v55 = vpop.permute.xlu1 %3662 }
 0x5d0   : > { %3744 = vst.msk [vmem:[#allocation3 + $0x70] sm:$0xff] %vm1622_vm7, %v3663_v55  ;;  %3496 = vrot.lane.b32.xlu0 %v3405_v53, %s5177_s22 }
 0x5d1   : > { %4068 = vrot.lane.b32.xlu1 %v3405_v53, %s5180_s8 }
 0x5d2   : > { %v3283_v13 = vpop.permute.xlu0 %3282 }
 0x5d3   : > { %3362 = vst.msk [vmem:[#allocation3 + $0x80] sm:$0xff] %vm1235_vm5, %v3283_v13  ;;  %v3855_v6 = vpop.permute.xlu1 %3854  ;;  %v4159_v35 = vld [vmem:[#allocation3 + $0x68] sm:$0xff] }
 0x5d4   : > { %3936 = vst.msk [vmem:[#allocation3 + $0x70] sm:$0xff] %vm1815_vm8, %v3855_v6  ;;  %3688 = vrot.lane.b32.xlu0 %v3597_v62, %s5178_s23  ;;  %4999 = vmatmul.mubr.msk.f32.gmra.mrb[12].mxu1 %vm2082_vm10, %v4159_v35 }
 0x5d5   : > { %3686 = vrot.lane.b32.xlu1 %v3596_v16, %s5178_s23 }
 0x5d6   : > { %v4047_v41 = vpop.permute.xlu0 %4046 }
 0x5d7   : > { %4128 = vst.msk [vmem:[#allocation3 + $0x70] sm:$0xff] %vm2008_vm9, %v4047_v41  ;;  %v3857_v45 = vpop.permute.xlu1 %3856 }
 0x5d8   : > { %3937 = vst.msk [vmem:[#allocation3 + $0x78] sm:$0xff] %vm1815_vm8, %v3857_v45  ;;  %3306 = vrot.lane.b32.xlu0 %v3214_v19, %s5176_s21 }
 0x5d9   : > { %3878 = vrot.lane.b32.xlu1 %v3214_v19, %s5179_s29 }
 0x5da   : > { %v3475_v36 = vpop.permute.xlu0 %3474 }
 0x5db   : > { %3554 = vst.msk [vmem:[#allocation3 + $0x80] sm:$0xff] %vm1428_vm6, %v3475_v36  ;;  %v3285_v31 = vpop.permute.xlu1 %3284 }
 0x5dc   : > { %3363 = vst.msk [vmem:[#allocation3 + $0x88] sm:$0xff] %vm1235_vm5, %v3285_v31  ;;  %4070 = vrot.lane.b32.xlu0 %v3980_v14, %s5180_s8 }
 0x5dd   : > { %3880 = vrot.lane.b32.xlu1 %v3789_v33, %s5179_s29 }
 0x5de   : > { %v3477_v34 = vpop.permute.xlu0 %3476  ;;  %v4160_v59 = vld [vmem:[#allocation3 + $0x70] sm:$0xff] }
 0x5df   : > { %3555 = vst.msk [vmem:[#allocation3 + $0x88] sm:$0xff] %vm1428_vm6, %v3477_v34  ;;  %v4049_v5 = vpop.permute.xlu1 %4048  ;;  %5001 = vmatprep.mubr.msk.f32.mxu1 %vm2082_vm10, %v4160_v59 }
 0x5e0   : > { %4129 = vst.msk [vmem:[#allocation3 + $0x78] sm:$0xff] %vm2008_vm9, %v4049_v5  ;;  %3498 = vrot.lane.b32.xlu0 %v3980_v14, %s5177_s22  ;;  %v7280_v14 = vld [vmem:[%s7462_s5] ss:$0 sm:$0xff] }
 0x5e1   : > { %3308 = vrot.lane.b32.xlu1 %v3789_v33, %s5176_s21  ;;  %v7288_v5 = vld [vmem:[%s7463_s6] ss:$0 sm:$0xff] }
 0x5e2   : > { %v3669_v15 = vpop.permute.xlu0 %3668 }
 0x5e3   : > { %3747 = vst.msk [vmem:[#allocation3 + $0x88] sm:$0xff] %vm1622_vm7, %v3669_v15  ;;  %v3667_v60 = vpop.permute.xlu1 %3666 }
 0x5e4   : > { %3746 = vst.msk [vmem:[#allocation3 + $0x80] sm:$0xff] %vm1622_vm7, %v3667_v60  ;;  %3500 = vrot.lane.b32.xlu0 %v3407_v22, %s5177_s22 }
 0x5e5   : > { %4072 = vrot.lane.b32.xlu1 %v3407_v22, %s5180_s8 }
 0x5e6   : > { %v3287_v7 = vpop.permute.xlu0 %3286 }
 0x5e7   : > { %3364 = vst.msk [vmem:[#allocation3 + $0x90] sm:$0xff] %vm1235_vm5, %v3287_v7  ;;  %v3859_v56 = vpop.permute.xlu1 %3858  ;;  %v4161_v40 = vld [vmem:[#allocation3 + $0x78] sm:$0xff] }
 0x5e8   : > { %3938 = vst.msk [vmem:[#allocation3 + $0x80] sm:$0xff] %vm1815_vm8, %v3859_v56  ;;  %3692 = vrot.lane.b32.xlu0 %v3599_v44, %s5178_s23  ;;  %5002 = vmatmul.mubr.msk.f32.gmra.mrb[14].mxu1 %vm2082_vm10, %v4161_v40 }
 0x5e9   : > { %3690 = vrot.lane.b32.xlu1 %v3598_v3, %s5178_s23 }
 0x5ea   : > { %v4051_v39 = vpop.permute.xlu0 %4050 }
 0x5eb   : > { %4130 = vst.msk [vmem:[#allocation3 + $0x80] sm:$0xff] %vm2008_vm9, %v4051_v39  ;;  %v3861_v38 = vpop.permute.xlu1 %3860 }
 0x5ec   : > { %3939 = vst.msk [vmem:[#allocation3 + $0x88] sm:$0xff] %vm1815_vm8, %v3861_v38  ;;  %3310 = vrot.lane.b32.xlu0 %v3216_v26, %s5176_s21 }
 0x5ed   : > { %3882 = vrot.lane.b32.xlu1 %v3216_v26, %s5179_s29 }
 0x5ee   : > { %v3479_v24 = vpop.permute.xlu0 %3478 }
 0x5ef   : > { %3556 = vst.msk [vmem:[#allocation3 + $0x90] sm:$0xff] %vm1428_vm6, %v3479_v24  ;;  %v3289_v61 = vpop.permute.xlu1 %3288 }
 0x5f0   : > { %3365 = vst.msk [vmem:[#allocation3 + $0x98] sm:$0xff] %vm1235_vm5, %v3289_v61  ;;  %4074 = vrot.lane.b32.xlu0 %v3982_v0, %s5180_s8 }
 0x5f1   : > { %3884 = vrot.lane.b32.xlu1 %v3791_v4, %s5179_s29 }
 0x5f2   : > { %v3481_v18 = vpop.permute.xlu0 %3480  ;;  %v4162_v27 = vld [vmem:[#allocation3 + $0x80] sm:$0xff] }
 0x5f3   : > { %3557 = vst.msk [vmem:[#allocation3 + $0x98] sm:$0xff] %vm1428_vm6, %v3481_v18  ;;  %v4053_v12 = vpop.permute.xlu1 %4052  ;;  %5004 = vmatprep.mubr.msk.f32.mxu1 %vm2082_vm10, %v4162_v27 }
 0x5f4   : > { %4131 = vst.msk [vmem:[#allocation3 + $0x88] sm:$0xff] %vm2008_vm9, %v4053_v12  ;;  %3502 = vrot.lane.b32.xlu0 %v3982_v0, %s5177_s22 }
 0x5f5   : > { %3312 = vrot.lane.b32.xlu1 %v3791_v4, %s5176_s21 }
 0x5f6   : > { %v3673_v46 = vpop.permute.xlu0 %3672 }
 0x5f7   : > { %3749 = vst.msk [vmem:[#allocation3 + $0x98] sm:$0xff] %vm1622_vm7, %v3673_v46  ;;  %v3671_v52 = vpop.permute.xlu1 %3670 }
 0x5f8   : > { %3748 = vst.msk [vmem:[#allocation3 + $0x90] sm:$0xff] %vm1622_vm7, %v3671_v52  ;;  %3504 = vrot.lane.b32.xlu0 %v3409_v29, %s5177_s22 }
 0x5f9   : > { %4076 = vrot.lane.b32.xlu1 %v3409_v29, %s5180_s8 }
 0x5fa   : > { %v3291_v57 = vpop.permute.xlu0 %3290 }
 0x5fb   : > { %3366 = vst.msk [vmem:[#allocation3 + $0xa0] sm:$0xff] %vm1235_vm5, %v3291_v57  ;;  %v3863_v32 = vpop.permute.xlu1 %3862  ;;  %v4163_v58 = vld [vmem:[#allocation3 + $0x88] sm:$0xff] }
 0x5fc   : > { %3940 = vst.msk [vmem:[#allocation3 + $0x90] sm:$0xff] %vm1815_vm8, %v3863_v32  ;;  %5005 = vmatmul.mubr.msk.f32.gmra.mrb[16].mxu1 %vm2082_vm10, %v4163_v58  ;;  %3696 = vrot.lane.b32.xlu0 %v3601_v1, %s5178_s23 }
 0x5fd   : > { %3694 = vrot.lane.b32.xlu1 %v3600_v9, %s5178_s23 }
 0x5fe   : > { %v4055_v2 = vpop.permute.xlu0 %4054 }
 0x5ff   : > { %4132 = vst.msk [vmem:[#allocation3 + $0x90] sm:$0xff] %vm2008_vm9, %v4055_v2  ;;  %v3865_v11 = vpop.permute.xlu1 %3864 }
 0x600   : > { %3941 = vst.msk [vmem:[#allocation3 + $0x98] sm:$0xff] %vm1815_vm8, %v3865_v11  ;;  %3888 = vrot.lane.b32.xlu0 %v3793_v50, %s5179_s29 }
 0x601   : > { %3886 = vrot.lane.b32.xlu1 %v3792_v42, %s5179_s29 }
 0x602   : > { %v3483_v21 = vpop.permute.xlu0 %3482 }
 0x603   : > { %3558 = vst.msk [vmem:[#allocation3 + $0xa0] sm:$0xff] %vm1428_vm6, %v3483_v21  ;;  %v3293_v17 = vpop.permute.xlu1 %3292 }
 0x604   : > { %3367 = vst.msk [vmem:[#allocation3 + $0xa8] sm:$0xff] %vm1235_vm5, %v3293_v17  ;;  %4080 = vrot.lane.b32.xlu0 %v3985_v23, %s5180_s8 }
 0x605   : > { %4078 = vrot.lane.b32.xlu1 %v3984_v25, %s5180_s8  ;;  %s269_s8 = sand.u32 1, %s5162_s25  }
 0x606   : > { %v3485_v51 = vpop.permute.xlu0 %3484  ;;  %v4164_v63 = vld [vmem:[#allocation3 + $0x90] sm:$0xff]  ;;  %s4736_s14 = sshll.u32 %s269_s8, 4  ;;  %s4659_s19 = scalar_lea.sflag [#allocation5], %s269_s8 }
 0x607   : > { %3559 = vst.msk [vmem:[#allocation3 + $0xa8] sm:$0xff] %vm1428_vm6, %v3485_v51  ;;  %v4057_v49 = vpop.permute.xlu1 %4056  ;;  %5007 = vmatprep.mubr.msk.f32.mxu1 %vm2082_vm10, %v4164_v63  ;;  %s7384_s15 = scalar_lea.vmem [#allocation4], %s4736_s14 }
 0x608   : > { %4133 = vst.msk [vmem:[#allocation3 + $0x98] sm:$0xff] %vm2008_vm9, %v4057_v49  ;;  %s4673_s16 = sshll.u32 %s7384_s15, 4  ;;  %s7414_s16 = int_to_ptr.vmem [resolvable:$true] %s4673_s16 }
 0x609   : > { %s5108_s21 = scalar_lea.vmem %s7414_s16, 256 }
 0x60a   : > { %v3677_v28 = vpop.permute.xlu0 %3676  ;;  %p5109_p11 = scmp.ne.s32.totalorder %s7414_s16, %s5108_s21 }
 0x60b   : > { %3751 = vst.msk [vmem:[#allocation3 + $0xa8] sm:$0xff] %vm1622_vm7, %v3677_v28  ;;  %v3675_v8 = vpop.permute.xlu1 %3674 }
 0x60c   : > { %3750 = vst.msk [vmem:[#allocation3 + $0xa0] sm:$0xff] %vm1622_vm7, %v3675_v8  ;;  %p5110_p12 = pnand %p5109_p11, %p5260_p5 }
 0x60e   : > { %v3295_v48 = vpop.permute.xlu0 %3294  ;;  %p5111_p13 = pneg %p5110_p12 }
 0x60f   : > { %3368 = vst.msk [vmem:[#allocation3 + $0xb0] sm:$0xff] %vm1235_vm5, %v3295_v48  ;;  %v3867_v30 = vpop.permute.xlu1 %3866  ;;  %v4165_v37 = vld [vmem:[#allocation3 + $0x98] sm:$0xff] }
 0x610   : > { %3942 = vst.msk [vmem:[#allocation3 + $0xa0] sm:$0xff] %vm1815_vm8, %v3867_v30  ;;  %5008 = vmatmul.mubr.msk.f32.gmra.mrb[18].mxu1 %vm2082_vm10, %v4165_v37 }
 0x612   : > { %v4059_v43 = vpop.permute.xlu0 %4058 }
 0x613   : > { %4134 = vst.msk [vmem:[#allocation3 + $0xa0] sm:$0xff] %vm2008_vm9, %v4059_v43  ;;  %v3869_v47 = vpop.permute.xlu1 %3868 }
 0x614   : > { %3943 = vst.msk [vmem:[#allocation3 + $0xa8] sm:$0xff] %vm1815_vm8, %v3869_v47 }
 0x616   : > { %v3487_v10 = vpop.permute.xlu0 %3486 }
 0x617   : > { %3560 = vst.msk [vmem:[#allocation3 + $0xb0] sm:$0xff] %vm1428_vm6, %v3487_v10  ;;  %v3297_v54 = vpop.permute.xlu1 %3296 }
 0x618   : > { %3369 = vst.msk [vmem:[#allocation3 + $0xb8] sm:$0xff] %vm1235_vm5, %v3297_v54 }
 0x61a   : > { %v3489_v20 = vpop.permute.xlu0 %3488  ;;  %v4166_v55 = vld [vmem:[#allocation3 + $0xa0] sm:$0xff] }
 0x61b   : > { %3561 = vst.msk [vmem:[#allocation3 + $0xb8] sm:$0xff] %vm1428_vm6, %v3489_v20  ;;  %v4061_v53 = vpop.permute.xlu1 %4060  ;;  %5010 = vmatprep.mubr.msk.f32.mxu1 %vm2082_vm10, %v4166_v55 }
 0x61c   : > { %4135 = vst.msk [vmem:[#allocation3 + $0xa8] sm:$0xff] %vm2008_vm9, %v4061_v53 }
 0x61e   : > { %v3681_v13 = vpop.permute.xlu0 %3680 }
 0x61f   : > { %3753 = vst.msk [vmem:[#allocation3 + $0xb8] sm:$0xff] %vm1622_vm7, %v3681_v13  ;;  %v3679_v6 = vpop.permute.xlu1 %3678 }
 0x620   : > { %3752 = vst.msk [vmem:[#allocation3 + $0xb0] sm:$0xff] %vm1622_vm7, %v3679_v6 }
 0x622   : > { %v3299_v62 = vpop.permute.xlu0 %3298 }
 0x623   : > { %3370 = vst.msk [vmem:[#allocation3 + $0xc0] sm:$0xff] %vm1235_vm5, %v3299_v62  ;;  %v3871_v35 = vpop.permute.xlu1 %3870  ;;  %v4167_v16 = vld [vmem:[#allocation3 + $0xa8] sm:$0xff] }
 0x624   : > { %3944 = vst.msk [vmem:[#allocation3 + $0xb0] sm:$0xff] %vm1815_vm8, %v3871_v35  ;;  %5011 = vmatmul.mubr.msk.f32.gmra.mrb[20].mxu1 %vm2082_vm10, %v4167_v16 }
 0x626   : > { %v4063_v41 = vpop.permute.xlu0 %4062 }
 0x627   : > { %4136 = vst.msk [vmem:[#allocation3 + $0xb0] sm:$0xff] %vm2008_vm9, %v4063_v41  ;;  %v3873_v45 = vpop.permute.xlu1 %3872 }
 0x628   : > { %3945 = vst.msk [vmem:[#allocation3 + $0xb8] sm:$0xff] %vm1815_vm8, %v3873_v45 }
 0x62a   : > { %v3491_v19 = vpop.permute.xlu0 %3490 }
 0x62b   : > { %3562 = vst.msk [vmem:[#allocation3 + $0xc0] sm:$0xff] %vm1428_vm6, %v3491_v19  ;;  %v3301_v36 = vpop.permute.xlu1 %3300 }
 0x62c   : > { %3371 = vst.msk [vmem:[#allocation3 + $0xc8] sm:$0xff] %vm1235_vm5, %v3301_v36 }
 0x62e   : > { %v3493_v31 = vpop.permute.xlu0 %3492  ;;  %v4168_v33 = vld [vmem:[#allocation3 + $0xb0] sm:$0xff] }
 0x62f   : > { %3563 = vst.msk [vmem:[#allocation3 + $0xc8] sm:$0xff] %vm1428_vm6, %v3493_v31  ;;  %v4065_v34 = vpop.permute.xlu1 %4064  ;;  %v4982_v59 = vpop.f32.mrb[0].mxu1  ;;  %5013 = vmatprep.mubr.msk.f32.mxu1 %vm2082_vm10, %v4168_v33 }
 0x630   : > { %4137 = vst.msk [vmem:[#allocation3 + $0xb8] sm:$0xff] %vm2008_vm9, %v4065_v34  ;;  %v4349_v15 = vpop.f32.mrb[1].mxu1  ;;  %v4516_v7 = vmul.f32 %v4982_v59, %v7280_v14 }
 0x631   : > { %v4515_v60 = vmul.f32 %v7280_v14, %v4349_v15 }
 0x632   : > { %v3685_v22 = vpop.permute.xlu0 %3684  ;;  %v4555_v3 = vadd.f32 %v7288_v5, %v4516_v7 }
 0x633   : > { %v4554_v56 = vadd.f32 %v7288_v5, %v4515_v60  ;;  %3755 = vst.msk [vmem:[#allocation3 + $0xc8] sm:$0xff] %vm1622_vm7, %v3685_v22  ;;  %v3683_v44 = vpop.permute.xlu1 %3682 }
 0x634   : > { %3754 = vst.msk [vmem:[#allocation3 + $0xc0] sm:$0xff] %vm1622_vm7, %v3683_v44 }
 0x635   : > { %4586 = vxpose.xlu1.b32.start [1/16] (narrow) %v4554_v56, 8 }
 0x636   : > { %v3303_v40 = vpop.permute.xlu0 %3302 }
 0x637   : > { %3372 = vst.msk [vmem:[#allocation3 + $0xd0] sm:$0xff] %vm1235_vm5, %v3303_v40  ;;  %v3875_v39 = vpop.permute.xlu1 %3874  ;;  %v4169_v38 = vld [vmem:[#allocation3 + $0xb8] sm:$0xff] }
 0x638   : > { %3946 = vst.msk [vmem:[#allocation3 + $0xc0] sm:$0xff] %vm1815_vm8, %v3875_v39  ;;  %5014 = vmatmul.mubr.msk.f32.gmra.mrb[22].mxu1 %vm2082_vm10, %v4169_v38 }
 0x639   : > { %4587 = vxpose.xlu1.b32.cont [2/16] (narrow) %v4555_v3, 8 }
 0x63a   : > { %v4067_v26 = vpop.permute.xlu0 %4066 }
 0x63b   : > { %4138 = vst.msk [vmem:[#allocation3 + $0xc0] sm:$0xff] %vm2008_vm9, %v4067_v26  ;;  %v3877_v24 = vpop.permute.xlu1 %3876 }
 0x63c   : > { %3947 = vst.msk [vmem:[#allocation3 + $0xc8] sm:$0xff] %vm1815_vm8, %v3877_v24 }
 0x63e   : > { %v3495_v61 = vpop.permute.xlu0 %3494 }
 0x63f   : > { %3564 = vst.msk [vmem:[#allocation3 + $0xd0] sm:$0xff] %vm1428_vm6, %v3495_v61  ;;  %v3305_v0 = vpop.permute.xlu1 %3304 }
 0x640   : > { %3373 = vst.msk [vmem:[#allocation3 + $0xd8] sm:$0xff] %vm1235_vm5, %v3305_v0 }
 0x642   : > { %v3497_v4 = vpop.permute.xlu0 %3496  ;;  %v4170_v18 = vld [vmem:[#allocation3 + $0xc0] sm:$0xff] }
 0x643   : > { %3565 = vst.msk [vmem:[#allocation3 + $0xd8] sm:$0xff] %vm1428_vm6, %v3497_v4  ;;  %v4069_v27 = vpop.permute.xlu1 %4068  ;;  %v4985_v12 = vpop.f32.mrb[2].mxu1  ;;  %5016 = vmatprep.mubr.msk.f32.mxu1 %vm2082_vm10, %v4170_v18 }
 0x644   : > { %4139 = vst.msk [vmem:[#allocation3 + $0xc8] sm:$0xff] %vm2008_vm9, %v4069_v27  ;;  %v4359_v46 = vpop.f32.mrb[3].mxu1  ;;  %v4518_v1 = vmul.f32 %v4985_v12, %v7280_v14 }
 0x645   : > { %v4517_v52 = vmul.f32 %v7280_v14, %v4359_v46 }
 0x646   : > { %v3689_v29 = vpop.permute.xlu0 %3688  ;;  %v4557_v58 = vadd.f32 %v7288_v5, %v4518_v1 }
 0x647   : > { %v4556_v57 = vadd.f32 %v7288_v5, %v4517_v52  ;;  %3757 = vst.msk [vmem:[#allocation3 + $0xd8] sm:$0xff] %vm1622_vm7, %v3689_v29  ;;  %v3687_v9 = vpop.permute.xlu1 %3686 }
 0x648   : > { %3756 = vst.msk [vmem:[#allocation3 + $0xd0] sm:$0xff] %vm1622_vm7, %v3687_v9 }
 0x649   : > { %4588 = vxpose.xlu1.b32.cont [3/16] (narrow) %v4556_v57, 8 }
 0x64a   : > { %v3307_v32 = vpop.permute.xlu0 %3306 }
 0x64b   : > { %3374 = vst.msk [vmem:[#allocation3 + $0xe0] sm:$0xff] %vm1235_vm5, %v3307_v32  ;;  %v3879_v50 = vpop.permute.xlu1 %3878  ;;  %v4171_v2 = vld [vmem:[#allocation3 + $0xc8] sm:$0xff] }
 0x64c   : > { %3948 = vst.msk [vmem:[#allocation3 + $0xd0] sm:$0xff] %vm1815_vm8, %v3879_v50  ;;  %5017 = vmatmul.mubr.msk.f32.gmra.mrb[24].mxu1 %vm2082_vm10, %v4171_v2 }
 0x64d   : > { %4589 = vxpose.xlu1.b32.cont [4/16] (narrow) %v4557_v58, 8 }
 0x64e   : > { %v4071_v42 = vpop.permute.xlu0 %4070 }
 0x64f   : > { %4140 = vst.msk [vmem:[#allocation3 + $0xd0] sm:$0xff] %vm2008_vm9, %v4071_v42  ;;  %v3881_v11 = vpop.permute.xlu1 %3880 }
 0x650   : > { %3949 = vst.msk [vmem:[#allocation3 + $0xd8] sm:$0xff] %vm1815_vm8, %v3881_v11 }
 0x652   : > { %v3499_v23 = vpop.permute.xlu0 %3498 }
 0x653   : > { %3566 = vst.msk [vmem:[#allocation3 + $0xe0] sm:$0xff] %vm1428_vm6, %v3499_v23  ;;  %v3309_v21 = vpop.permute.xlu1 %3308 }
 0x654   : > { %3375 = vst.msk [vmem:[#allocation3 + $0xe8] sm:$0xff] %vm1235_vm5, %v3309_v21 }
 0x656   : > { %v3501_v25 = vpop.permute.xlu0 %3500  ;;  %v4172_v17 = vld [vmem:[#allocation3 + $0xd0] sm:$0xff] }
 0x657   : > { %3567 = vst.msk [vmem:[#allocation3 + $0xe8] sm:$0xff] %vm1428_vm6, %v3501_v25  ;;  %v4073_v51 = vpop.permute.xlu1 %4072  ;;  %v4988_v63 = vpop.f32.mrb[4].mxu1  ;;  %5019 = vmatprep.mubr.msk.f32.mxu1 %vm2082_vm10, %v4172_v17 }
 0x658   : > { %4141 = vst.msk [vmem:[#allocation3 + $0xd8] sm:$0xff] %vm2008_vm9, %v4073_v51  ;;  %v4369_v49 = vpop.f32.mrb[5].mxu1  ;;  %v4520_v48 = vmul.f32 %v4988_v63, %v7280_v14 }
 0x659   : > { %v4519_v28 = vmul.f32 %v7280_v14, %v4369_v49 }
 0x65a   : > { %v3693_v8 = vpop.permute.xlu0 %3692  ;;  %v4559_v47 = vadd.f32 %v7288_v5, %v4520_v48 }
 0x65b   : > { %v4558_v30 = vadd.f32 %v7288_v5, %v4519_v28  ;;  %3759 = vst.msk [vmem:[#allocation3 + $0xe8] sm:$0xff] %vm1622_vm7, %v3693_v8  ;;  %v3691_v37 = vpop.permute.xlu1 %3690 }
 0x65c   : > { %3758 = vst.msk [vmem:[#allocation3 + $0xe0] sm:$0xff] %vm1622_vm7, %v3691_v37 }
 0x65d   : > { %4590 = vxpose.xlu1.b32.cont [5/16] (narrow) %v4558_v30, 8 }
 0x65e   : > { %v3311_v43 = vpop.permute.xlu0 %3310 }
 0x65f   : > { %3376 = vst.msk [vmem:[#allocation3 + $0xf0] sm:$0xff] %vm1235_vm5, %v3311_v43  ;;  %v3883_v10 = vpop.permute.xlu1 %3882  ;;  %v4173_v54 = vld [vmem:[#allocation3 + $0xd8] sm:$0xff] }
 0x660   : > { %3950 = vst.msk [vmem:[#allocation3 + $0xe0] sm:$0xff] %vm1815_vm8, %v3883_v10  ;;  %5020 = vmatmul.mubr.msk.f32.gmra.mrb[26].mxu1 %vm2082_vm10, %v4173_v54 }
 0x661   : > { %4591 = vxpose.xlu1.b32.cont [6/16] (narrow) %v4559_v47, 8 }
 0x662   : > { %v4075_v20 = vpop.permute.xlu0 %4074 }
 0x663   : > { %4142 = vst.msk [vmem:[#allocation3 + $0xe0] sm:$0xff] %vm2008_vm9, %v4075_v20  ;;  %v3885_v55 = vpop.permute.xlu1 %3884 }
 0x664   : > { %3951 = vst.msk [vmem:[#allocation3 + $0xe8] sm:$0xff] %vm1815_vm8, %v3885_v55 }
 0x666   : > { %v3503_v53 = vpop.permute.xlu0 %3502 }
 0x667   : > { %3568 = vst.msk [vmem:[#allocation3 + $0xf0] sm:$0xff] %vm1428_vm6, %v3503_v53  ;;  %v3313_v13 = vpop.permute.xlu1 %3312  ;;  %v4650_v53 = vld [vmem:[%s5331_s17] sm:$0xff] }
 0x668   : > { %3377 = vst.msk [vmem:[#allocation3 + $0xf8] sm:$0xff] %vm1235_vm5, %v3313_v13 }
 0x66a   : > { %v3505_v6 = vpop.permute.xlu0 %3504  ;;  %v4174_v62 = vld [vmem:[#allocation3 + $0xe0] sm:$0xff] }
 0x66b   : > { %3569 = vst.msk [vmem:[#allocation3 + $0xf8] sm:$0xff] %vm1428_vm6, %v3505_v6  ;;  %v4077_v35 = vpop.permute.xlu1 %4076  ;;  %v4991_v16 = vpop.f32.mrb[6].mxu1  ;;  %5022 = vmatprep.mubr.msk.f32.mxu1 %vm2082_vm10, %v4174_v62 }
 0x66c   : > { %4143 = vst.msk [vmem:[#allocation3 + $0xe8] sm:$0xff] %vm2008_vm9, %v4077_v35  ;;  %v4379_v41 = vpop.f32.mrb[7].mxu1  ;;  %v4522_v36 = vmul.f32 %v4991_v16, %v7280_v14 }
 0x66d   : > { %v4521_v45 = vmul.f32 %v7280_v14, %v4379_v41 }
 0x66e   : > { %v3697_v19 = vpop.permute.xlu0 %3696  ;;  %v4561_v59 = vadd.f32 %v7288_v5, %v4522_v36 }
 0x66f   : > { %v4560_v31 = vadd.f32 %v7288_v5, %v4521_v45  ;;  %v3695_v33 = vpop.permute.xlu1 %3694  ;;  %3761 = vst.msk [vmem:[#allocation3 + $0xf8] sm:$0xff] %vm1622_vm7, %v3697_v19 }
 0x670   : > { %3760 = vst.msk [vmem:[#allocation3 + $0xf0] sm:$0xff] %vm1622_vm7, %v3695_v33 }
 0x671   : > { %4592 = vxpose.xlu1.b32.cont [7/16] (narrow) %v4560_v31, 8 }
 0x672   : > { %v3889_v34 = vpop.permute.xlu0 %3888 }
 0x673   : > { %v3887_v15 = vpop.permute.xlu1 %3886  ;;  %v4175_v60 = vld [vmem:[#allocation3 + $0xe8] sm:$0xff]  ;;  %3953 = vst.msk [vmem:[#allocation3 + $0xf8] sm:$0xff] %vm1815_vm8, %v3889_v34 }
 0x674   : > { %3952 = vst.msk [vmem:[#allocation3 + $0xf0] sm:$0xff] %vm1815_vm8, %v3887_v15  ;;  %5023 = vmatmul.mubr.msk.f32.gmra.mrb[28].mxu1 %vm2082_vm10, %v4175_v60 }
 0x675   : > { %4593 = vxpose.xlu1.b32.cont [8/16] (narrow) %v4561_v59, 8 }
 0x676   : > { %v4081_v22 = vpop.permute.xlu0 %4080 }
 0x677   : > { %v4079_v7 = vpop.permute.xlu1 %4078  ;;  %4145 = vst.msk [vmem:[#allocation3 + $0xf8] sm:$0xff] %vm2008_vm9, %v4081_v22 }
 0x678   : > { %4144 = vst.msk [vmem:[#allocation3 + $0xf0] sm:$0xff] %vm2008_vm9, %v4079_v7 }
 0x67e   : > { %v4177_v56 = vld [vmem:[#allocation3 + $0xf8] sm:$0xff] }
 0x67f   : > { %v4994_v44 = vpop.f32.mrb[8].mxu1  ;;  %v4176_v40 = vld [vmem:[#allocation3 + $0xf0] sm:$0xff] }
 0x680   : > { %v4389_v3 = vpop.f32.mrb[9].mxu1  ;;  %5025 = vmatprep.mubr.msk.f32.mxu1 %vm2082_vm10, %v4176_v40  ;;  %v4524_v38 = vmul.f32 %v4994_v44, %v7280_v14 }
 0x681   : > { %v4523_v39 = vmul.f32 %v7280_v14, %v4389_v3  ;;  %5026 = vmatmul.mubr.msk.f32.gmra.mrb[30].mxu1 %vm2082_vm10, %v4177_v56 }
 0x682   : > { %v4563_v24 = vadd.f32 %v7288_v5, %v4524_v38 }
 0x683   : > { %v4562_v26 = vadd.f32 %v7288_v5, %v4523_v39 }
 0x685   : > { %4594 = vxpose.xlu1.b32.cont [9/16] (narrow) %v4562_v26, 8 }
 0x689   : > { %4595 = vxpose.xlu1.b32.cont [10/16] (narrow) %v4563_v24, 8 }
 0x693   : > { %v4997_v61 = vpop.f32.mrb[10].mxu1 }
 0x694   : > { %v4399_v0 = vpop.f32.mrb[11].mxu1  ;;  %v4526_v18 = vmul.f32 %v4997_v61, %v7280_v14 }
 0x695   : > { %v4525_v4 = vmul.f32 %v7280_v14, %v4399_v0 }
 0x696   : > { %v4565_v12 = vadd.f32 %v7288_v5, %v4526_v18 }
 0x697   : > { %v4564_v27 = vadd.f32 %v7288_v5, %v4525_v4 }
 0x699   : > { %4596 = vxpose.xlu1.b32.cont [11/16] (narrow) %v4564_v27, 8 }
 0x69d   : > { %4597 = vxpose.xlu1.b32.cont [12/16] (narrow) %v4565_v12, 8 }
 0x6a7   : > { %v5000_v46 = vpop.f32.mrb[12].mxu1 }
 0x6a8   : > { %v4409_v52 = vpop.f32.mrb[13].mxu1  ;;  %v4528_v1 = vmul.f32 %v5000_v46, %v7280_v14 }
 0x6a9   : > { %v4527_v29 = vmul.f32 %v7280_v14, %v4409_v52 }
 0x6aa   : > { %v4567_v9 = vadd.f32 %v7288_v5, %v4528_v1 }
 0x6ab   : > { %v4566_v57 = vadd.f32 %v7288_v5, %v4527_v29  ;;  %v4651_v29 = vld [vmem:[%s5331_s17 + $0x8] sm:$0xff]  ;;  %s5112_s17 = sshll.u32 %s5181_s28, 4  ;;  %s5113_s17 = int_to_ptr.vmem [resolvable:$false] %s5112_s17 }
 0x6ac   : > { %s5114_s22 = scalar_lea.vmem %s5113_s17, 512  ;;  %p5115_p0 = scmp.lt.s32.totalorder %s7414_s16, %s5113_s17 }
 0x6ad   : > { %4598 = vxpose.xlu1.b32.cont [13/16] (narrow) %v4566_v57, 8  ;;  %p5116_p1 = scmp.lt.s32.totalorder %s5114_s22, %s5108_s21 }
 0x6af   : > { %p5117_p2 = por %p5116_p1, %p5115_p0 }
 0x6b1   : > { %4599 = vxpose.xlu1.b32.cont [14/16] (narrow) %v4567_v9, 8  ;;  %p5118_p3 = pnand %p5117_p2, %p5111_p13 }
 0x6bb   : > { %v5003_v32 = vpop.f32.mrb[14].mxu1 }
 0x6bc   : > { %v4419_v58 = vpop.f32.mrb[15].mxu1  ;;  %v4530_v2 = vmul.f32 %v5003_v32, %v7280_v14 }
 0x6bd   : > { %v4529_v50 = vmul.f32 %v7280_v14, %v4419_v58 }
 0x6be   : > { %v4569_v11 = vadd.f32 %v7288_v5, %v4530_v2 }
 0x6bf   : > { %v4568_v42 = vadd.f32 %v7288_v5, %v4529_v50 }
 0x6c1   : > { %4600 = vxpose.xlu1.b32.cont [15/16] (narrow) %v4568_v42, 8 }
 0x6c5   : > { %4601 = vxpose.xlu1.b32.end [16/16] (narrow) %v4569_v11, 8 }
 0x6cf   : > { %v5006_v23 = vpop.f32.mrb[16].mxu1 }
 0x6d0   : > { %v4429_v21 = vpop.f32.mrb[17].mxu1  ;;  %v4532_v17 = vmul.f32 %v5006_v23, %v7280_v14 }
 0x6d1   : > { %v4531_v25 = vmul.f32 %v7280_v14, %v4429_v21 }
 0x6d2   : > { %v4571_v63 = vadd.f32 %v7288_v5, %v4532_v17 }
 0x6d3   : > { %v4570_v51 = vadd.f32 %v7288_v5, %v4531_v25 }
 0x6d5   : > { %4618 = vxpose.xlu0.b32.start [1/16] (narrow) %v4570_v51, 8 }
 0x6d9   : > { %4619 = vxpose.xlu0.b32.cont [2/16] (narrow) %v4571_v63, 8 }
 0x6e3   : > { %v5009_v49 = vpop.f32.mrb[18].mxu1 }
 0x6e4   : > { %v4439_v28 = vpop.f32.mrb[19].mxu1  ;;  %v4534_v48 = vmul.f32 %v5009_v49, %v7280_v14 }
 0x6e5   : > { %v4533_v8 = vmul.f32 %v7280_v14, %v4439_v28 }
 0x6e6   : > { %v4573_v37 = vadd.f32 %v7288_v5, %v4534_v48 }
 0x6e7   : > { %v4572_v30 = vadd.f32 %v7288_v5, %v4533_v8 }
 0x6e9   : > { %4620 = vxpose.xlu0.b32.cont [3/16] (narrow) %v4572_v30, 8 }
 0x6ed   : > { %4621 = vxpose.xlu0.b32.cont [4/16] (narrow) %v4573_v37, 8 }
 0x6f7   : > { %v5012_v43 = vpop.f32.mrb[20].mxu1 }
 0x6f8   : > { %v4449_v47 = vpop.f32.mrb[21].mxu1  ;;  %v4536_v54 = vmul.f32 %v5012_v43, %v7280_v14 }
 0x6f9   : > { %v4535_v10 = vmul.f32 %v7280_v14, %v4449_v47 }
 0x6fa   : > { %v4575_v55 = vadd.f32 %v7288_v5, %v4536_v54 }
 0x6fb   : > { %v4574_v20 = vadd.f32 %v7288_v5, %v4535_v10 }
 0x6fd   : > { %4622 = vxpose.xlu0.b32.cont [5/16] (narrow) %v4574_v20, 8 }
 0x701   : > { %4623 = vxpose.xlu0.b32.cont [6/16] (narrow) %v4575_v55, 8 }
 0x709   : > { %v4602_v13 = vpop.trf.xlu1 }
 0x70a   : > { %v4652_v6 = vadd.f32 %v4650_v53, %v4602_v13 }
 0x70b   : > { %v5015_v62 = vpop.f32.mrb[22].mxu1 }
 0x70c   : > { %v4459_v35 = vpop.f32.mrb[23].mxu1  ;;  %v4654_v16 = vmax.f32 %v4652_v6, 0.0  ;;  %v4538_v45 = vmul.f32 %v5015_v62, %v7280_v14 }
 0x70d   : > { %v4537_v41 = vmul.f32 %v7280_v14, %v4459_v35 }
 0x70e   : > { %4656 = vst [vmem:[%s7384_s15] sm:$0xff] %v4654_v16  ;;  %v4577_v36 = vadd.f32 %v7288_v5, %v4538_v45 }
 0x70f   : > { %v4576_v19 = vadd.f32 %v7288_v5, %v4537_v41 }
 0x711   : > { %4624 = vxpose.xlu0.b32.cont [7/16] (narrow) %v4576_v19, 8 }
 0x715   : > { %4625 = vxpose.xlu0.b32.cont [8/16] (narrow) %v4577_v36, 8 }
 0x71f   : > { %v5018_v31 = vpop.f32.mrb[24].mxu1 }
 0x720   : > { %v4469_v33 = vpop.f32.mrb[25].mxu1  ;;  %v4540_v59 = vmul.f32 %v5018_v31, %v7280_v14 }
 0x721   : > { %v4539_v34 = vmul.f32 %v7280_v14, %v4469_v33 }
 0x722   : > { %v4579_v60 = vadd.f32 %v7288_v5, %v4540_v59 }
 0x723   : > { %v4578_v15 = vadd.f32 %v7288_v5, %v4539_v34 }
 0x725   : > { %4626 = vxpose.xlu0.b32.cont [9/16] (narrow) %v4578_v15, 8 }
 0x729   : > { %4627 = vxpose.xlu0.b32.cont [10/16] (narrow) %v4579_v60, 8 }
 0x733   : > { %v5021_v22 = vpop.f32.mrb[26].mxu1 }
 0x734   : > { %v4479_v7 = vpop.f32.mrb[27].mxu1  ;;  %v4542_v44 = vmul.f32 %v5021_v22, %v7280_v14 }
 0x735   : > { %v4541_v56 = vmul.f32 %v7280_v14, %v4479_v7 }
 0x736   : > { %v4581_v3 = vadd.f32 %v7288_v5, %v4542_v44 }
 0x737   : > { %v4580_v40 = vadd.f32 %v7288_v5, %v4541_v56 }
 0x739   : > { %4628 = vxpose.xlu0.b32.cont [11/16] (narrow) %v4580_v40, 8 }
 0x73d   : > { %4629 = vxpose.xlu0.b32.cont [12/16] (narrow) %v4581_v3, 8 }
 0x747   : > { %v5024_v39 = vpop.f32.mrb[28].mxu1 }
 0x748   : > { %v4489_v38 = vpop.f32.mrb[29].mxu1  ;;  %v4544_v24 = vmul.f32 %v5024_v39, %v7280_v14 }
 0x749   : > { %v4543_v26 = vmul.f32 %v7280_v14, %v4489_v38 }
 0x74a   : > { %v4583_v0 = vadd.f32 %v7288_v5, %v4544_v24 }
 0x74b   : > { %v4582_v61 = vadd.f32 %v7288_v5, %v4543_v26 }
 0x74d   : > { %4630 = vxpose.xlu0.b32.cont [13/16] (narrow) %v4582_v61, 8 }
 0x751   : > { %4631 = vxpose.xlu0.b32.cont [14/16] (narrow) %v4583_v0, 8 }
 0x754   : > { %v5027_v4 = vpop.f32.mrb[30].mxu1 }
 0x755   : > { %v4499_v18 = vpop.f32.mrb[31].mxu1  ;;  %v4546_v12 = vmul.f32 %v5027_v4, %v7280_v14 }
 0x756   : > { %v4545_v27 = vmul.f32 %v7280_v14, %v4499_v18 }
 0x757   : > { %v4585_v52 = vadd.f32 %v7288_v5, %v4546_v12 }
 0x758   : > { %v4584_v46 = vadd.f32 %v7288_v5, %v4545_v27 }
 0x75a   : > { %4632 = vxpose.xlu0.b32.cont [15/16] (narrow) %v4584_v46, 8 }
 0x75e   : > { %4633 = vxpose.xlu0.b32.end [16/16] (narrow) %v4585_v52, 8 }
 0x7a2   : > { %v4634_v1 = vpop.trf.xlu0 }
 0x7a3   : > { %v4653_v57 = vadd.f32 %v4651_v29, %v4634_v1 }
 0x7a5   : > { %v4655_v9 = vmax.f32 %v4653_v57, 0.0 }
 0x7a7   : > { %4657 = vst [vmem:[%s7384_s15 + $0x8] sm:$0xff] %v4655_v9 }
 0x7a8   : > { %5121 = shalt.err (!%p5118_p3)
}
 0x7a9   : > { %s5122_s23 = scalar_lea.hbm %s7412_s18, 256  ;;  %s5126_s14 = scalar_lea.hbm %s7464_s7, 512 }
 0x7aa   : > { %p5123_p4 = scmp.ne.s32.totalorder %s7412_s18, %s5122_s23  ;;  %p5127_p9 = scmp.lt.u32.totalorder %s7412_s18, %s7464_s7 }
 0x7ab   : > { %p5128_p10 = scmp.lt.u32.totalorder %s5126_s14, %s5122_s23  ;;  %p5130_p12 = scmp.lt.u32.totalorder %s5122_s23, %s7412_s18 }
 0x7ac   : > { %p5124_p7 = pnand %p5123_p4, %p5260_p5 }
 0x7ad   : > { %p5129_p11 = por %p5128_p10, %p5127_p9 }
 0x7ae   : > { %p5125_p8 = pneg %p5124_p7 }
 0x7af   : > { %p5131_p13 = por %p5130_p12, %p5129_p11 }
 0x7b1   : > { %p5132_p0 = pnand %p5131_p13, %p5125_p8 }
 0x7b3   : > { %5135 = shalt.err (!%p5132_p0)
}
 0x7b4   : > { %5060 = dma.vmem_to_hbm [thread:$0]  (%p5260_p5), %s7414_s16, 256, %s7412_s18, %s4659_s19  }
 0x7b5 PF: > { %p5066_p1 = scmp.ge.s32.totalorder %s5170_s27, 2  ;;  %s4685_s9 = sand.u32 1, %s5158_s24  }
 0x7b6   : > { %s4686_s13 = scalar_lea.sflag [#allocation5], %s4685_s9 }
 0x7b7   : > { %p5063_p2 = pnand %p5066_p1, %p5264_p6 }
 0x7b9   : > { %5153 = dma.done.wait (!%p5063_p2), %s4686_s13, 256  }
 0x7ba   : > { %5155 = vsyncadd (!%p5063_p2), %s4686_s13, 4294967040  ;;  %p17_p3 = scmp.ge.s32.totalorder %s5247_s30, 4   ;;  %s7548_s24 = smov %s5162_s25 }
 0x7bb   : > { %s7549_s25 = smov %s5166_s26  ;;  %s7550_s26 = smov %s5258_s10 }
 0x7bc   : > { %s7551_s27 = smov %s5247_s30  ;;  %19 = sbr.rel (!%p17_p3) target bundleno = 3 (0x3), region = 85 }
 0x7c3   :  { %4691 = vsyncpa [#allocation5], 1 }
 0x7c4   :  { %4693 = vsyncpa [#allocation5 + $0x1], 1 }

</bundles_post_ra>
